<compile_context>
chip_gen: v6e
topology: v6e:2x2x1
jax: 0.10.0
libtpu: 0.0.40
codegen_flags: <defaults>
</compile_context>

<pallas_src>
import jax
import jax.numpy as jnp
from jax.experimental import pallas as pl
from jax.experimental.pallas import tpu as pltpu

NUM_NODES = 21
NEG_SLOPE = 0.1


def _leaky_relu(x):
    # LeakyReLU(0.1) == max(x, 0.1*x): one vmul + one vmax on the VPU.
    return jnp.maximum(x, NEG_SLOPE * x)


def _structured_mlp_kernel(x_ref, w1_ref, b1_ref, w2_ref, b2_ref,
                           w3_ref, b3_ref, o_ref):
    # x_ref : (B, N, c_in)  f32
    # w*_ref: (N, fin, fout) bf16   (stacked per-node weights)
    # b*_ref: (N, 1,  fout)  f32
    # o_ref : (B, N, c_out)  f32
    x = x_ref[...]                       # (B, N, c_in), ~10 KB

    outs = []
    for n in range(NUM_NODES):           # static unroll: 21 per-node 3-layer MLPs
        h = x[:, n, :]                   # (B, c_in) f32

        h = jnp.dot(h.astype(jnp.bfloat16), w1_ref[n],
                    preferred_element_type=jnp.float32) + b1_ref[n]
        h = _leaky_relu(h)

        h = jnp.dot(h.astype(jnp.bfloat16), w2_ref[n],
                    preferred_element_type=jnp.float32) + b2_ref[n]
        h = _leaky_relu(h)

        h = jnp.dot(h.astype(jnp.bfloat16), w3_ref[n],
                    preferred_element_type=jnp.float32) + b3_ref[n]
        h = _leaky_relu(h)               # MLP output_layer also has the activation

        outs.append(h)                   # (B, c_out) f32

    o_ref[...] = jnp.stack(outs, axis=1).astype(o_ref.dtype)   # (B, N, c_out)


def pack_params(w1, b1, w2, b2, w3, b3):
    """One-time packing: stacked per-node weights cast to bf16 (biases stay f32)."""
    to_bf16 = lambda w: w.astype(jnp.bfloat16)
    return to_bf16(w1), b1, to_bf16(w2), b2, to_bf16(w3), b3


def _cost_estimate(x, w1, w2, w3, b1, b2, b3):
    B, N, c_in = x.shape
    h1, h2, c_out = w1.shape[-1], w2.shape[-1], w3.shape[-1]
    flops = 2 * B * N * (c_in * h1 + h1 * h2 + h2 * c_out)
    bytes_accessed = (
        x.size * x.dtype.itemsize
        + sum(w.size * w.dtype.itemsize for w in (w1, w2, w3))
        + sum(b.size * b.dtype.itemsize for b in (b1, b2, b3))
        + B * N * c_out * 4)             # f32 output
    return pl.CostEstimate(flops=flops, transcendentals=0,
                           bytes_accessed=bytes_accessed)


@jax.jit
def structured_mlp_coder(x, w1, b1, w2, b2, w3, b3):
    """x: (B, 21, c_in) f32 -> (B, 21, c_out) f32.  Params pre-packed via pack_params."""
    B, N, c_in = x.shape
    assert N == NUM_NODES
    c_out = w3.shape[-1]

    vmem = pl.BlockSpec(memory_space=pltpu.MemorySpace.VMEM)
    # NOTE(scaling): for large B, add a grid over B (TILE_B multiple of 8, marked
    # "parallel") with constant-block index_maps for the weights so they stay
    # VMEM-resident; unnecessary at B=8.
    return pl.pallas_call(
        _structured_mlp_kernel,
        out_shape=jax.ShapeDtypeStruct((B, N, c_out), jnp.float32),
        in_specs=[vmem] * 7,
        out_specs=vmem,
        cost_estimate=_cost_estimate(x, w1, w2, w3, b1, b2, b3),
    )(x, w1, b1, w2, b2, w3, b3)


def init_params(key, in_channels, out_channels, layer_dims):
    """Stacked per-node parameters, PyTorch-Linear-style uniform init (f32)."""
    h1, h2 = layer_dims

    def linear(k, fan_in, fan_out):
        kw, kb = jax.random.split(k)
        bound = 1.0 / jnp.sqrt(fan_in)
        w = jax.random.uniform(kw, (NUM_NODES, fan_in, fan_out),
                               minval=-bound, maxval=bound, dtype=jnp.float32)
        b = jax.random.uniform(kb, (NUM_NODES, 1, fan_out),
                               minval=-bound, maxval=bound, dtype=jnp.float32)
        return w, b

    k1, k2, k3 = jax.random.split(key, 3)
    w1, b1 = linear(k1, in_channels, h1)
    w2, b2 = linear(k2, h1, h2)
    w3, b3 = linear(k3, h2, out_channels)
    return w1, b1, w2, b2, w3, b3


def reference_forward(x, w1, b1, w2, b2, w3, b3):
    """Pure-JAX f32 reference matching the PyTorch module semantics (per-node MLPs)."""
    xt = jnp.transpose(x, (1, 0, 2))                   # (N, B, c_in)

    def one_node(xn, w1n, b1n, w2n, b2n, w3n, b3n):
        h = _leaky_relu(xn @ w1n + b1n)
        h = _leaky_relu(h @ w2n + b2n)
        h = _leaky_relu(h @ w3n + b3n)
        return h

    out = jax.vmap(one_node)(xt, w1, b1[:, 0], w2, b2[:, 0], w3, b3[:, 0])
    return jnp.transpose(out, (1, 0, 2))


if __name__ == "__main__":
    key = jax.random.PRNGKey(0)
    k_x, k_p = jax.random.split(key)

    B = 8
    in_channels = 16
    out_channels = 16
    layer_dims = [32, 32]

    x = jax.random.normal(k_x, (B, NUM_NODES, in_channels), dtype=jnp.float32)
    params = init_params(k_p, in_channels, out_channels, layer_dims)
    packed = pack_params(*params)      # one-time bf16 cast of stacked weights

    y = structured_mlp_coder(x, *packed)
    y = jax.block_until_ready(y)

    y_ref = reference_forward(x, *params)
    assert y.shape == (B, NUM_NODES, out_channels)
    # bf16 weights / bf16 matmul inputs vs f32 reference -> relaxed tolerance
    # (per perf-review correctness note).
    assert jnp.allclose(y, y_ref, atol=5e-2, rtol=5e-2), "mismatch vs reference"

    print("KERNEL_OK")
</pallas_src>

<mosaic_0001>
module attributes {stable_mosaic.version = 11 : i64} {
  func.func @_structured_mlp_kernel(%arg0: memref<8x21x16xf32, #tpu.memory_space<vmem>>, %arg1: memref<21x16x32xbf16, #tpu.memory_space<vmem>>, %arg2: memref<21x1x32xf32, #tpu.memory_space<vmem>>, %arg3: memref<21x32x32xbf16, #tpu.memory_space<vmem>>, %arg4: memref<21x1x32xf32, #tpu.memory_space<vmem>>, %arg5: memref<21x32x16xbf16, #tpu.memory_space<vmem>>, %arg6: memref<21x1x16xf32, #tpu.memory_space<vmem>>, %arg7: memref<8x21x16xf32, #tpu.memory_space<vmem>>) attributes {dimension_semantics = [], scalar_prefetch = 0 : i64, scratch_operands = 0 : i64, tpu.core_type = #tpu.core_type<tc>} {
    %c0 = arith.constant 0 : index
    %c0_0 = arith.constant 0 : index
    %c0_1 = arith.constant 0 : index
    %0 = vector.load %arg0[%c0, %c0_0, %c0_1] : memref<8x21x16xf32, #tpu.memory_space<vmem>>, vector<8x21x16xf32>
    %1 = vector.extract_strided_slice %0 {offsets = [0, 0, 0], sizes = [8, 1, 16], strides = [1, 1, 1]} : vector<8x21x16xf32> to vector<8x1x16xf32>
    %2 = vector.shape_cast %1 : vector<8x1x16xf32> to vector<8x16xf32>
    %3 = arith.truncf %2 : vector<8x16xf32> to vector<8x16xbf16>
    %c0_2 = arith.constant 0 : index
    %c0_3 = arith.constant 0 : index
    %c0_4 = arith.constant 0 : index
    %4 = vector.load %arg1[%c0_2, %c0_3, %c0_4] : memref<21x16x32xbf16, #tpu.memory_space<vmem>>, vector<1x16x32xbf16>
    %5 = vector.shape_cast %4 : vector<1x16x32xbf16> to vector<16x32xbf16>
    %cst = arith.constant dense<0.000000e+00> : vector<8x32xf32>
    %6 = tpu.matmul %3, %5, %cst {dimension_numbers = #tpu.dot_dimension_numbers<[1], [0], [0], [1], [0, 0, 1, 1], [], []>} : vector<8x16xbf16>, vector<16x32xbf16>, vector<8x32xf32> -> vector<8x32xf32>
    %c0_5 = arith.constant 0 : index
    %c0_6 = arith.constant 0 : index
    %c0_7 = arith.constant 0 : index
    %7 = vector.load %arg2[%c0_5, %c0_6, %c0_7] : memref<21x1x32xf32, #tpu.memory_space<vmem>>, vector<1x1x32xf32>
    %8 = vector.shape_cast %7 : vector<1x1x32xf32> to vector<1x32xf32>
    %9 = vector.broadcast %8 : vector<1x32xf32> to vector<8x32xf32>
    %10 = arith.addf %6, %9 : vector<8x32xf32>
    %cst_8 = arith.constant 1.000000e-01 : f32
    %11 = vector.broadcast %cst_8 : f32 to vector<8x32xf32>
    %12 = arith.mulf %11, %10 : vector<8x32xf32>
    %13 = arith.maximumf %10, %12 : vector<8x32xf32>
    %14 = arith.truncf %13 : vector<8x32xf32> to vector<8x32xbf16>
    %c0_9 = arith.constant 0 : index
    %c0_10 = arith.constant 0 : index
    %c0_11 = arith.constant 0 : index
    %15 = vector.load %arg3[%c0_9, %c0_10, %c0_11] : memref<21x32x32xbf16, #tpu.memory_space<vmem>>, vector<1x32x32xbf16>
    %16 = vector.shape_cast %15 : vector<1x32x32xbf16> to vector<32x32xbf16>
    %cst_12 = arith.constant dense<0.000000e+00> : vector<8x32xf32>
    %17 = tpu.matmul %14, %16, %cst_12 {dimension_numbers = #tpu.dot_dimension_numbers<[1], [0], [0], [1], [0, 0, 1, 1], [], []>} : vector<8x32xbf16>, vector<32x32xbf16>, vector<8x32xf32> -> vector<8x32xf32>
    %c0_13 = arith.constant 0 : index
    %c0_14 = arith.constant 0 : index
    %c0_15 = arith.constant 0 : index
    %18 = vector.load %arg4[%c0_13, %c0_14, %c0_15] : memref<21x1x32xf32, #tpu.memory_space<vmem>>, vector<1x1x32xf32>
    %19 = vector.shape_cast %18 : vector<1x1x32xf32> to vector<1x32xf32>
    %20 = vector.broadcast %19 : vector<1x32xf32> to vector<8x32xf32>
    %21 = arith.addf %17, %20 : vector<8x32xf32>
    %cst_16 = arith.constant 1.000000e-01 : f32
    %22 = vector.broadcast %cst_16 : f32 to vector<8x32xf32>
    %23 = arith.mulf %22, %21 : vector<8x32xf32>
    %24 = arith.maximumf %21, %23 : vector<8x32xf32>
    %25 = arith.truncf %24 : vector<8x32xf32> to vector<8x32xbf16>
    %c0_17 = arith.constant 0 : index
    %c0_18 = arith.constant 0 : index
    %c0_19 = arith.constant 0 : index
    %26 = vector.load %arg5[%c0_17, %c0_18, %c0_19] : memref<21x32x16xbf16, #tpu.memory_space<vmem>>, vector<1x32x16xbf16>
    %27 = vector.shape_cast %26 : vector<1x32x16xbf16> to vector<32x16xbf16>
    %cst_20 = arith.constant dense<0.000000e+00> : vector<8x16xf32>
    %28 = tpu.matmul %25, %27, %cst_20 {dimension_numbers = #tpu.dot_dimension_numbers<[1], [0], [0], [1], [0, 0, 1, 1], [], []>} : vector<8x32xbf16>, vector<32x16xbf16>, vector<8x16xf32> -> vector<8x16xf32>
    %c0_21 = arith.constant 0 : index
    %c0_22 = arith.constant 0 : index
    %c0_23 = arith.constant 0 : index
    %29 = vector.load %arg6[%c0_21, %c0_22, %c0_23] : memref<21x1x16xf32, #tpu.memory_space<vmem>>, vector<1x1x16xf32>
    %30 = vector.shape_cast %29 : vector<1x1x16xf32> to vector<1x16xf32>
    %31 = vector.broadcast %30 : vector<1x16xf32> to vector<8x16xf32>
    %32 = arith.addf %28, %31 : vector<8x16xf32>
    %cst_24 = arith.constant 1.000000e-01 : f32
    %33 = vector.broadcast %cst_24 : f32 to vector<8x16xf32>
    %34 = arith.mulf %33, %32 : vector<8x16xf32>
    %35 = arith.maximumf %32, %34 : vector<8x16xf32>
    %36 = vector.extract_strided_slice %0 {offsets = [0, 1, 0], sizes = [8, 1, 16], strides = [1, 1, 1]} : vector<8x21x16xf32> to vector<8x1x16xf32>
    %37 = vector.shape_cast %36 : vector<8x1x16xf32> to vector<8x16xf32>
    %38 = arith.truncf %37 : vector<8x16xf32> to vector<8x16xbf16>
    %c1 = arith.constant 1 : index
    %c0_25 = arith.constant 0 : index
    %c0_26 = arith.constant 0 : index
    %39 = vector.load %arg1[%c1, %c0_25, %c0_26] : memref<21x16x32xbf16, #tpu.memory_space<vmem>>, vector<1x16x32xbf16>
    %40 = vector.shape_cast %39 : vector<1x16x32xbf16> to vector<16x32xbf16>
    %cst_27 = arith.constant dense<0.000000e+00> : vector<8x32xf32>
    %41 = tpu.matmul %38, %40, %cst_27 {dimension_numbers = #tpu.dot_dimension_numbers<[1], [0], [0], [1], [0, 0, 1, 1], [], []>} : vector<8x16xbf16>, vector<16x32xbf16>, vector<8x32xf32> -> vector<8x32xf32>
    %c1_28 = arith.constant 1 : index
    %c0_29 = arith.constant 0 : index
    %c0_30 = arith.constant 0 : index
    %42 = vector.load %arg2[%c1_28, %c0_29, %c0_30] : memref<21x1x32xf32, #tpu.memory_space<vmem>>, vector<1x1x32xf32>
    %43 = vector.shape_cast %42 : vector<1x1x32xf32> to vector<1x32xf32>
    %44 = vector.broadcast %43 : vector<1x32xf32> to vector<8x32xf32>
    %45 = arith.addf %41, %44 : vector<8x32xf32>
    %cst_31 = arith.constant 1.000000e-01 : f32
    %46 = vector.broadcast %cst_31 : f32 to vector<8x32xf32>
    %47 = arith.mulf %46, %45 : vector<8x32xf32>
    %48 = arith.maximumf %45, %47 : vector<8x32xf32>
    %49 = arith.truncf %48 : vector<8x32xf32> to vector<8x32xbf16>
    %c1_32 = arith.constant 1 : index
    %c0_33 = arith.constant 0 : index
    %c0_34 = arith.constant 0 : index
    %50 = vector.load %arg3[%c1_32, %c0_33, %c0_34] : memref<21x32x32xbf16, #tpu.memory_space<vmem>>, vector<1x32x32xbf16>
    %51 = vector.shape_cast %50 : vector<1x32x32xbf16> to vector<32x32xbf16>
    %cst_35 = arith.constant dense<0.000000e+00> : vector<8x32xf32>
    %52 = tpu.matmul %49, %51, %cst_35 {dimension_numbers = #tpu.dot_dimension_numbers<[1], [0], [0], [1], [0, 0, 1, 1], [], []>} : vector<8x32xbf16>, vector<32x32xbf16>, vector<8x32xf32> -> vector<8x32xf32>
    %c1_36 = arith.constant 1 : index
    %c0_37 = arith.constant 0 : index
    %c0_38 = arith.constant 0 : index
    %53 = vector.load %arg4[%c1_36, %c0_37, %c0_38] : memref<21x1x32xf32, #tpu.memory_space<vmem>>, vector<1x1x32xf32>
    %54 = vector.shape_cast %53 : vector<1x1x32xf32> to vector<1x32xf32>
    %55 = vector.broadcast %54 : vector<1x32xf32> to vector<8x32xf32>
    %56 = arith.addf %52, %55 : vector<8x32xf32>
    %cst_39 = arith.constant 1.000000e-01 : f32
    %57 = vector.broadcast %cst_39 : f32 to vector<8x32xf32>
    %58 = arith.mulf %57, %56 : vector<8x32xf32>
    %59 = arith.maximumf %56, %58 : vector<8x32xf32>
    %60 = arith.truncf %59 : vector<8x32xf32> to vector<8x32xbf16>
    %c1_40 = arith.constant 1 : index
    %c0_41 = arith.constant 0 : index
    %c0_42 = arith.constant 0 : index
    %61 = vector.load %arg5[%c1_40, %c0_41, %c0_42] : memref<21x32x16xbf16, #tpu.memory_space<vmem>>, vector<1x32x16xbf16>
    %62 = vector.shape_cast %61 : vector<1x32x16xbf16> to vector<32x16xbf16>
    %cst_43 = arith.constant dense<0.000000e+00> : vector<8x16xf32>
    %63 = tpu.matmul %60, %62, %cst_43 {dimension_numbers = #tpu.dot_dimension_numbers<[1], [0], [0], [1], [0, 0, 1, 1], [], []>} : vector<8x32xbf16>, vector<32x16xbf16>, vector<8x16xf32> -> vector<8x16xf32>
    %c1_44 = arith.constant 1 : index
    %c0_45 = arith.constant 0 : index
    %c0_46 = arith.constant 0 : index
    %64 = vector.load %arg6[%c1_44, %c0_45, %c0_46] : memref<21x1x16xf32, #tpu.memory_space<vmem>>, vector<1x1x16xf32>
    %65 = vector.shape_cast %64 : vector<1x1x16xf32> to vector<1x16xf32>
    %66 = vector.broadcast %65 : vector<1x16xf32> to vector<8x16xf32>
    %67 = arith.addf %63, %66 : vector<8x16xf32>
    %cst_47 = arith.constant 1.000000e-01 : f32
    %68 = vector.broadcast %cst_47 : f32 to vector<8x16xf32>
    %69 = arith.mulf %68, %67 : vector<8x16xf32>
    %70 = arith.maximumf %67, %69 : vector<8x16xf32>
    %71 = vector.extract_strided_slice %0 {offsets = [0, 2, 0], sizes = [8, 1, 16], strides = [1, 1, 1]} : vector<8x21x16xf32> to vector<8x1x16xf32>
    %72 = vector.shape_cast %71 : vector<8x1x16xf32> to vector<8x16xf32>
    %73 = arith.truncf %72 : vector<8x16xf32> to vector<8x16xbf16>
    %c2 = arith.constant 2 : index
    %c0_48 = arith.constant 0 : index
    %c0_49 = arith.constant 0 : index
    %74 = vector.load %arg1[%c2, %c0_48, %c0_49] : memref<21x16x32xbf16, #tpu.memory_space<vmem>>, vector<1x16x32xbf16>
    %75 = vector.shape_cast %74 : vector<1x16x32xbf16> to vector<16x32xbf16>
    %cst_50 = arith.constant dense<0.000000e+00> : vector<8x32xf32>
    %76 = tpu.matmul %73, %75, %cst_50 {dimension_numbers = #tpu.dot_dimension_numbers<[1], [0], [0], [1], [0, 0, 1, 1], [], []>} : vector<8x16xbf16>, vector<16x32xbf16>, vector<8x32xf32> -> vector<8x32xf32>
    %c2_51 = arith.constant 2 : index
    %c0_52 = arith.constant 0 : index
    %c0_53 = arith.constant 0 : index
    %77 = vector.load %arg2[%c2_51, %c0_52, %c0_53] : memref<21x1x32xf32, #tpu.memory_space<vmem>>, vector<1x1x32xf32>
    %78 = vector.shape_cast %77 : vector<1x1x32xf32> to vector<1x32xf32>
    %79 = vector.broadcast %78 : vector<1x32xf32> to vector<8x32xf32>
    %80 = arith.addf %76, %79 : vector<8x32xf32>
    %cst_54 = arith.constant 1.000000e-01 : f32
    %81 = vector.broadcast %cst_54 : f32 to vector<8x32xf32>
    %82 = arith.mulf %81, %80 : vector<8x32xf32>
    %83 = arith.maximumf %80, %82 : vector<8x32xf32>
    %84 = arith.truncf %83 : vector<8x32xf32> to vector<8x32xbf16>
    %c2_55 = arith.constant 2 : index
    %c0_56 = arith.constant 0 : index
    %c0_57 = arith.constant 0 : index
    %85 = vector.load %arg3[%c2_55, %c0_56, %c0_57] : memref<21x32x32xbf16, #tpu.memory_space<vmem>>, vector<1x32x32xbf16>
    %86 = vector.shape_cast %85 : vector<1x32x32xbf16> to vector<32x32xbf16>
    %cst_58 = arith.constant dense<0.000000e+00> : vector<8x32xf32>
    %87 = tpu.matmul %84, %86, %cst_58 {dimension_numbers = #tpu.dot_dimension_numbers<[1], [0], [0], [1], [0, 0, 1, 1], [], []>} : vector<8x32xbf16>, vector<32x32xbf16>, vector<8x32xf32> -> vector<8x32xf32>
    %c2_59 = arith.constant 2 : index
    %c0_60 = arith.constant 0 : index
    %c0_61 = arith.constant 0 : index
    %88 = vector.load %arg4[%c2_59, %c0_60, %c0_61] : memref<21x1x32xf32, #tpu.memory_space<vmem>>, vector<1x1x32xf32>
    %89 = vector.shape_cast %88 : vector<1x1x32xf32> to vector<1x32xf32>
    %90 = vector.broadcast %89 : vector<1x32xf32> to vector<8x32xf32>
    %91 = arith.addf %87, %90 : vector<8x32xf32>
    %cst_62 = arith.constant 1.000000e-01 : f32
    %92 = vector.broadcast %cst_62 : f32 to vector<8x32xf32>
    %93 = arith.mulf %92, %91 : vector<8x32xf32>
    %94 = arith.maximumf %91, %93 : vector<8x32xf32>
    %95 = arith.truncf %94 : vector<8x32xf32> to vector<8x32xbf16>
    %c2_63 = arith.constant 2 : index
    %c0_64 = arith.constant 0 : index
    %c0_65 = arith.constant 0 : index
    %96 = vector.load %arg5[%c2_63, %c0_64, %c0_65] : memref<21x32x16xbf16, #tpu.memory_space<vmem>>, vector<1x32x16xbf16>
    %97 = vector.shape_cast %96 : vector<1x32x16xbf16> to vector<32x16xbf16>
    %cst_66 = arith.constant dense<0.000000e+00> : vector<8x16xf32>
    %98 = tpu.matmul %95, %97, %cst_66 {dimension_numbers = #tpu.dot_dimension_numbers<[1], [0], [0], [1], [0, 0, 1, 1], [], []>} : vector<8x32xbf16>, vector<32x16xbf16>, vector<8x16xf32> -> vector<8x16xf32>
    %c2_67 = arith.constant 2 : index
    %c0_68 = arith.constant 0 : index
    %c0_69 = arith.constant 0 : index
    %99 = vector.load %arg6[%c2_67, %c0_68, %c0_69] : memref<21x1x16xf32, #tpu.memory_space<vmem>>, vector<1x1x16xf32>
    %100 = vector.shape_cast %99 : vector<1x1x16xf32> to vector<1x16xf32>
    %101 = vector.broadcast %100 : vector<1x16xf32> to vector<8x16xf32>
    %102 = arith.addf %98, %101 : vector<8x16xf32>
    %cst_70 = arith.constant 1.000000e-01 : f32
    %103 = vector.broadcast %cst_70 : f32 to vector<8x16xf32>
    %104 = arith.mulf %103, %102 : vector<8x16xf32>
    %105 = arith.maximumf %102, %104 : vector<8x16xf32>
    %106 = vector.extract_strided_slice %0 {offsets = [0, 3, 0], sizes = [8, 1, 16], strides = [1, 1, 1]} : vector<8x21x16xf32> to vector<8x1x16xf32>
    %107 = vector.shape_cast %106 : vector<8x1x16xf32> to vector<8x16xf32>
    %108 = arith.truncf %107 : vector<8x16xf32> to vector<8x16xbf16>
    %c3 = arith.constant 3 : index
    %c0_71 = arith.constant 0 : index
    %c0_72 = arith.constant 0 : index
    %109 = vector.load %arg1[%c3, %c0_71, %c0_72] : memref<21x16x32xbf16, #tpu.memory_space<vmem>>, vector<1x16x32xbf16>
    %110 = vector.shape_cast %109 : vector<1x16x32xbf16> to vector<16x32xbf16>
    %cst_73 = arith.constant dense<0.000000e+00> : vector<8x32xf32>
    %111 = tpu.matmul %108, %110, %cst_73 {dimension_numbers = #tpu.dot_dimension_numbers<[1], [0], [0], [1], [0, 0, 1, 1], [], []>} : vector<8x16xbf16>, vector<16x32xbf16>, vector<8x32xf32> -> vector<8x32xf32>
    %c3_74 = arith.constant 3 : index
    %c0_75 = arith.constant 0 : index
    %c0_76 = arith.constant 0 : index
    %112 = vector.load %arg2[%c3_74, %c0_75, %c0_76] : memref<21x1x32xf32, #tpu.memory_space<vmem>>, vector<1x1x32xf32>
    %113 = vector.shape_cast %112 : vector<1x1x32xf32> to vector<1x32xf32>
    %114 = vector.broadcast %113 : vector<1x32xf32> to vector<8x32xf32>
    %115 = arith.addf %111, %114 : vector<8x32xf32>
    %cst_77 = arith.constant 1.000000e-01 : f32
    %116 = vector.broadcast %cst_77 : f32 to vector<8x32xf32>
    %117 = arith.mulf %116, %115 : vector<8x32xf32>
    %118 = arith.maximumf %115, %117 : vector<8x32xf32>
    %119 = arith.truncf %118 : vector<8x32xf32> to vector<8x32xbf16>
    %c3_78 = arith.constant 3 : index
    %c0_79 = arith.constant 0 : index
    %c0_80 = arith.constant 0 : index
    %120 = vector.load %arg3[%c3_78, %c0_79, %c0_80] : memref<21x32x32xbf16, #tpu.memory_space<vmem>>, vector<1x32x32xbf16>
    %121 = vector.shape_cast %120 : vector<1x32x32xbf16> to vector<32x32xbf16>
    %cst_81 = arith.constant dense<0.000000e+00> : vector<8x32xf32>
    %122 = tpu.matmul %119, %121, %cst_81 {dimension_numbers = #tpu.dot_dimension_numbers<[1], [0], [0], [1], [0, 0, 1, 1], [], []>} : vector<8x32xbf16>, vector<32x32xbf16>, vector<8x32xf32> -> vector<8x32xf32>
    %c3_82 = arith.constant 3 : index
    %c0_83 = arith.constant 0 : index
    %c0_84 = arith.constant 0 : index
    %123 = vector.load %arg4[%c3_82, %c0_83, %c0_84] : memref<21x1x32xf32, #tpu.memory_space<vmem>>, vector<1x1x32xf32>
    %124 = vector.shape_cast %123 : vector<1x1x32xf32> to vector<1x32xf32>
    %125 = vector.broadcast %124 : vector<1x32xf32> to vector<8x32xf32>
    %126 = arith.addf %122, %125 : vector<8x32xf32>
    %cst_85 = arith.constant 1.000000e-01 : f32
    %127 = vector.broadcast %cst_85 : f32 to vector<8x32xf32>
    %128 = arith.mulf %127, %126 : vector<8x32xf32>
    %129 = arith.maximumf %126, %128 : vector<8x32xf32>
    %130 = arith.truncf %129 : vector<8x32xf32> to vector<8x32xbf16>
    %c3_86 = arith.constant 3 : index
    %c0_87 = arith.constant 0 : index
    %c0_88 = arith.constant 0 : index
    %131 = vector.load %arg5[%c3_86, %c0_87, %c0_88] : memref<21x32x16xbf16, #tpu.memory_space<vmem>>, vector<1x32x16xbf16>
    %132 = vector.shape_cast %131 : vector<1x32x16xbf16> to vector<32x16xbf16>
    %cst_89 = arith.constant dense<0.000000e+00> : vector<8x16xf32>
    %133 = tpu.matmul %130, %132, %cst_89 {dimension_numbers = #tpu.dot_dimension_numbers<[1], [0], [0], [1], [0, 0, 1, 1], [], []>} : vector<8x32xbf16>, vector<32x16xbf16>, vector<8x16xf32> -> vector<8x16xf32>
    %c3_90 = arith.constant 3 : index
    %c0_91 = arith.constant 0 : index
    %c0_92 = arith.constant 0 : index
    %134 = vector.load %arg6[%c3_90, %c0_91, %c0_92] : memref<21x1x16xf32, #tpu.memory_space<vmem>>, vector<1x1x16xf32>
    %135 = vector.shape_cast %134 : vector<1x1x16xf32> to vector<1x16xf32>
    %136 = vector.broadcast %135 : vector<1x16xf32> to vector<8x16xf32>
    %137 = arith.addf %133, %136 : vector<8x16xf32>
    %cst_93 = arith.constant 1.000000e-01 : f32
    %138 = vector.broadcast %cst_93 : f32 to vector<8x16xf32>
    %139 = arith.mulf %138, %137 : vector<8x16xf32>
    %140 = arith.maximumf %137, %139 : vector<8x16xf32>
    %141 = vector.extract_strided_slice %0 {offsets = [0, 4, 0], sizes = [8, 1, 16], strides = [1, 1, 1]} : vector<8x21x16xf32> to vector<8x1x16xf32>
    %142 = vector.shape_cast %141 : vector<8x1x16xf32> to vector<8x16xf32>
    %143 = arith.truncf %142 : vector<8x16xf32> to vector<8x16xbf16>
    %c4 = arith.constant 4 : index
    %c0_94 = arith.constant 0 : index
    %c0_95 = arith.constant 0 : index
    %144 = vector.load %arg1[%c4, %c0_94, %c0_95] : memref<21x16x32xbf16, #tpu.memory_space<vmem>>, vector<1x16x32xbf16>
    %145 = vector.shape_cast %144 : vector<1x16x32xbf16> to vector<16x32xbf16>
    %cst_96 = arith.constant dense<0.000000e+00> : vector<8x32xf32>
    %146 = tpu.matmul %143, %145, %cst_96 {dimension_numbers = #tpu.dot_dimension_numbers<[1], [0], [0], [1], [0, 0, 1, 1], [], []>} : vector<8x16xbf16>, vector<16x32xbf16>, vector<8x32xf32> -> vector<8x32xf32>
    %c4_97 = arith.constant 4 : index
    %c0_98 = arith.constant 0 : index
    %c0_99 = arith.constant 0 : index
    %147 = vector.load %arg2[%c4_97, %c0_98, %c0_99] : memref<21x1x32xf32, #tpu.memory_space<vmem>>, vector<1x1x32xf32>
    %148 = vector.shape_cast %147 : vector<1x1x32xf32> to vector<1x32xf32>
    %149 = vector.broadcast %148 : vector<1x32xf32> to vector<8x32xf32>
    %150 = arith.addf %146, %149 : vector<8x32xf32>
    %cst_100 = arith.constant 1.000000e-01 : f32
    %151 = vector.broadcast %cst_100 : f32 to vector<8x32xf32>
    %152 = arith.mulf %151, %150 : vector<8x32xf32>
    %153 = arith.maximumf %150, %152 : vector<8x32xf32>
    %154 = arith.truncf %153 : vector<8x32xf32> to vector<8x32xbf16>
    %c4_101 = arith.constant 4 : index
    %c0_102 = arith.constant 0 : index
    %c0_103 = arith.constant 0 : index
    %155 = vector.load %arg3[%c4_101, %c0_102, %c0_103] : memref<21x32x32xbf16, #tpu.memory_space<vmem>>, vector<1x32x32xbf16>
    %156 = vector.shape_cast %155 : vector<1x32x32xbf16> to vector<32x32xbf16>
    %cst_104 = arith.constant dense<0.000000e+00> : vector<8x32xf32>
    %157 = tpu.matmul %154, %156, %cst_104 {dimension_numbers = #tpu.dot_dimension_numbers<[1], [0], [0], [1], [0, 0, 1, 1], [], []>} : vector<8x32xbf16>, vector<32x32xbf16>, vector<8x32xf32> -> vector<8x32xf32>
    %c4_105 = arith.constant 4 : index
    %c0_106 = arith.constant 0 : index
    %c0_107 = arith.constant 0 : index
    %158 = vector.load %arg4[%c4_105, %c0_106, %c0_107] : memref<21x1x32xf32, #tpu.memory_space<vmem>>, vector<1x1x32xf32>
    %159 = vector.shape_cast %158 : vector<1x1x32xf32> to vector<1x32xf32>
    %160 = vector.broadcast %159 : vector<1x32xf32> to vector<8x32xf32>
    %161 = arith.addf %157, %160 : vector<8x32xf32>
    %cst_108 = arith.constant 1.000000e-01 : f32
    %162 = vector.broadcast %cst_108 : f32 to vector<8x32xf32>
    %163 = arith.mulf %162, %161 : vector<8x32xf32>
    %164 = arith.maximumf %161, %163 : vector<8x32xf32>
    %165 = arith.truncf %164 : vector<8x32xf32> to vector<8x32xbf16>
    %c4_109 = arith.constant 4 : index
    %c0_110 = arith.constant 0 : index
    %c0_111 = arith.constant 0 : index
    %166 = vector.load %arg5[%c4_109, %c0_110, %c0_111] : memref<21x32x16xbf16, #tpu.memory_space<vmem>>, vector<1x32x16xbf16>
    %167 = vector.shape_cast %166 : vector<1x32x16xbf16> to vector<32x16xbf16>
    %cst_112 = arith.constant dense<0.000000e+00> : vector<8x16xf32>
    %168 = tpu.matmul %165, %167, %cst_112 {dimension_numbers = #tpu.dot_dimension_numbers<[1], [0], [0], [1], [0, 0, 1, 1], [], []>} : vector<8x32xbf16>, vector<32x16xbf16>, vector<8x16xf32> -> vector<8x16xf32>
    %c4_113 = arith.constant 4 : index
    %c0_114 = arith.constant 0 : index
    %c0_115 = arith.constant 0 : index
    %169 = vector.load %arg6[%c4_113, %c0_114, %c0_115] : memref<21x1x16xf32, #tpu.memory_space<vmem>>, vector<1x1x16xf32>
    %170 = vector.shape_cast %169 : vector<1x1x16xf32> to vector<1x16xf32>
    %171 = vector.broadcast %170 : vector<1x16xf32> to vector<8x16xf32>
    %172 = arith.addf %168, %171 : vector<8x16xf32>
    %cst_116 = arith.constant 1.000000e-01 : f32
    %173 = vector.broadcast %cst_116 : f32 to vector<8x16xf32>
    %174 = arith.mulf %173, %172 : vector<8x16xf32>
    %175 = arith.maximumf %172, %174 : vector<8x16xf32>
    %176 = vector.extract_strided_slice %0 {offsets = [0, 5, 0], sizes = [8, 1, 16], strides = [1, 1, 1]} : vector<8x21x16xf32> to vector<8x1x16xf32>
    %177 = vector.shape_cast %176 : vector<8x1x16xf32> to vector<8x16xf32>
    %178 = arith.truncf %177 : vector<8x16xf32> to vector<8x16xbf16>
    %c5 = arith.constant 5 : index
    %c0_117 = arith.constant 0 : index
    %c0_118 = arith.constant 0 : index
    %179 = vector.load %arg1[%c5, %c0_117, %c0_118] : memref<21x16x32xbf16, #tpu.memory_space<vmem>>, vector<1x16x32xbf16>
    %180 = vector.shape_cast %179 : vector<1x16x32xbf16> to vector<16x32xbf16>
    %cst_119 = arith.constant dense<0.000000e+00> : vector<8x32xf32>
    %181 = tpu.matmul %178, %180, %cst_119 {dimension_numbers = #tpu.dot_dimension_numbers<[1], [0], [0], [1], [0, 0, 1, 1], [], []>} : vector<8x16xbf16>, vector<16x32xbf16>, vector<8x32xf32> -> vector<8x32xf32>
    %c5_120 = arith.constant 5 : index
    %c0_121 = arith.constant 0 : index
    %c0_122 = arith.constant 0 : index
    %182 = vector.load %arg2[%c5_120, %c0_121, %c0_122] : memref<21x1x32xf32, #tpu.memory_space<vmem>>, vector<1x1x32xf32>
    %183 = vector.shape_cast %182 : vector<1x1x32xf32> to vector<1x32xf32>
    %184 = vector.broadcast %183 : vector<1x32xf32> to vector<8x32xf32>
    %185 = arith.addf %181, %184 : vector<8x32xf32>
    %cst_123 = arith.constant 1.000000e-01 : f32
    %186 = vector.broadcast %cst_123 : f32 to vector<8x32xf32>
    %187 = arith.mulf %186, %185 : vector<8x32xf32>
    %188 = arith.maximumf %185, %187 : vector<8x32xf32>
    %189 = arith.truncf %188 : vector<8x32xf32> to vector<8x32xbf16>
    %c5_124 = arith.constant 5 : index
    %c0_125 = arith.constant 0 : index
    %c0_126 = arith.constant 0 : index
    %190 = vector.load %arg3[%c5_124, %c0_125, %c0_126] : memref<21x32x32xbf16, #tpu.memory_space<vmem>>, vector<1x32x32xbf16>
    %191 = vector.shape_cast %190 : vector<1x32x32xbf16> to vector<32x32xbf16>
    %cst_127 = arith.constant dense<0.000000e+00> : vector<8x32xf32>
    %192 = tpu.matmul %189, %191, %cst_127 {dimension_numbers = #tpu.dot_dimension_numbers<[1], [0], [0], [1], [0, 0, 1, 1], [], []>} : vector<8x32xbf16>, vector<32x32xbf16>, vector<8x32xf32> -> vector<8x32xf32>
    %c5_128 = arith.constant 5 : index
    %c0_129 = arith.constant 0 : index
    %c0_130 = arith.constant 0 : index
    %193 = vector.load %arg4[%c5_128, %c0_129, %c0_130] : memref<21x1x32xf32, #tpu.memory_space<vmem>>, vector<1x1x32xf32>
    %194 = vector.shape_cast %193 : vector<1x1x32xf32> to vector<1x32xf32>
    %195 = vector.broadcast %194 : vector<1x32xf32> to vector<8x32xf32>
    %196 = arith.addf %192, %195 : vector<8x32xf32>
    %cst_131 = arith.constant 1.000000e-01 : f32
    %197 = vector.broadcast %cst_131 : f32 to vector<8x32xf32>
    %198 = arith.mulf %197, %196 : vector<8x32xf32>
    %199 = arith.maximumf %196, %198 : vector<8x32xf32>
    %200 = arith.truncf %199 : vector<8x32xf32> to vector<8x32xbf16>
    %c5_132 = arith.constant 5 : index
    %c0_133 = arith.constant 0 : index
    %c0_134 = arith.constant 0 : index
    %201 = vector.load %arg5[%c5_132, %c0_133, %c0_134] : memref<21x32x16xbf16, #tpu.memory_space<vmem>>, vector<1x32x16xbf16>
    %202 = vector.shape_cast %201 : vector<1x32x16xbf16> to vector<32x16xbf16>
    %cst_135 = arith.constant dense<0.000000e+00> : vector<8x16xf32>
    %203 = tpu.matmul %200, %202, %cst_135 {dimension_numbers = #tpu.dot_dimension_numbers<[1], [0], [0], [1], [0, 0, 1, 1], [], []>} : vector<8x32xbf16>, vector<32x16xbf16>, vector<8x16xf32> -> vector<8x16xf32>
    %c5_136 = arith.constant 5 : index
    %c0_137 = arith.constant 0 : index
    %c0_138 = arith.constant 0 : index
    %204 = vector.load %arg6[%c5_136, %c0_137, %c0_138] : memref<21x1x16xf32, #tpu.memory_space<vmem>>, vector<1x1x16xf32>
    %205 = vector.shape_cast %204 : vector<1x1x16xf32> to vector<1x16xf32>
    %206 = vector.broadcast %205 : vector<1x16xf32> to vector<8x16xf32>
    %207 = arith.addf %203, %206 : vector<8x16xf32>
    %cst_139 = arith.constant 1.000000e-01 : f32
    %208 = vector.broadcast %cst_139 : f32 to vector<8x16xf32>
    %209 = arith.mulf %208, %207 : vector<8x16xf32>
    %210 = arith.maximumf %207, %209 : vector<8x16xf32>
    %211 = vector.extract_strided_slice %0 {offsets = [0, 6, 0], sizes = [8, 1, 16], strides = [1, 1, 1]} : vector<8x21x16xf32> to vector<8x1x16xf32>
    %212 = vector.shape_cast %211 : vector<8x1x16xf32> to vector<8x16xf32>
    %213 = arith.truncf %212 : vector<8x16xf32> to vector<8x16xbf16>
    %c6 = arith.constant 6 : index
    %c0_140 = arith.constant 0 : index
    %c0_141 = arith.constant 0 : index
    %214 = vector.load %arg1[%c6, %c0_140, %c0_141] : memref<21x16x32xbf16, #tpu.memory_space<vmem>>, vector<1x16x32xbf16>
    %215 = vector.shape_cast %214 : vector<1x16x32xbf16> to vector<16x32xbf16>
    %cst_142 = arith.constant dense<0.000000e+00> : vector<8x32xf32>
    %216 = tpu.matmul %213, %215, %cst_142 {dimension_numbers = #tpu.dot_dimension_numbers<[1], [0], [0], [1], [0, 0, 1, 1], [], []>} : vector<8x16xbf16>, vector<16x32xbf16>, vector<8x32xf32> -> vector<8x32xf32>
    %c6_143 = arith.constant 6 : index
    %c0_144 = arith.constant 0 : index
    %c0_145 = arith.constant 0 : index
    %217 = vector.load %arg2[%c6_143, %c0_144, %c0_145] : memref<21x1x32xf32, #tpu.memory_space<vmem>>, vector<1x1x32xf32>
    %218 = vector.shape_cast %217 : vector<1x1x32xf32> to vector<1x32xf32>
    %219 = vector.broadcast %218 : vector<1x32xf32> to vector<8x32xf32>
    %220 = arith.addf %216, %219 : vector<8x32xf32>
    %cst_146 = arith.constant 1.000000e-01 : f32
    %221 = vector.broadcast %cst_146 : f32 to vector<8x32xf32>
    %222 = arith.mulf %221, %220 : vector<8x32xf32>
    %223 = arith.maximumf %220, %222 : vector<8x32xf32>
    %224 = arith.truncf %223 : vector<8x32xf32> to vector<8x32xbf16>
    %c6_147 = arith.constant 6 : index
    %c0_148 = arith.constant 0 : index
    %c0_149 = arith.constant 0 : index
    %225 = vector.load %arg3[%c6_147, %c0_148, %c0_149] : memref<21x32x32xbf16, #tpu.memory_space<vmem>>, vector<1x32x32xbf16>
    %226 = vector.shape_cast %225 : vector<1x32x32xbf16> to vector<32x32xbf16>
    %cst_150 = arith.constant dense<0.000000e+00> : vector<8x32xf32>
    %227 = tpu.matmul %224, %226, %cst_150 {dimension_numbers = #tpu.dot_dimension_numbers<[1], [0], [0], [1], [0, 0, 1, 1], [], []>} : vector<8x32xbf16>, vector<32x32xbf16>, vector<8x32xf32> -> vector<8x32xf32>
    %c6_151 = arith.constant 6 : index
    %c0_152 = arith.constant 0 : index
    %c0_153 = arith.constant 0 : index
    %228 = vector.load %arg4[%c6_151, %c0_152, %c0_153] : memref<21x1x32xf32, #tpu.memory_space<vmem>>, vector<1x1x32xf32>
    %229 = vector.shape_cast %228 : vector<1x1x32xf32> to vector<1x32xf32>
    %230 = vector.broadcast %229 : vector<1x32xf32> to vector<8x32xf32>
    %231 = arith.addf %227, %230 : vector<8x32xf32>
    %cst_154 = arith.constant 1.000000e-01 : f32
    %232 = vector.broadcast %cst_154 : f32 to vector<8x32xf32>
    %233 = arith.mulf %232, %231 : vector<8x32xf32>
    %234 = arith.maximumf %231, %233 : vector<8x32xf32>
    %235 = arith.truncf %234 : vector<8x32xf32> to vector<8x32xbf16>
    %c6_155 = arith.constant 6 : index
    %c0_156 = arith.constant 0 : index
    %c0_157 = arith.constant 0 : index
    %236 = vector.load %arg5[%c6_155, %c0_156, %c0_157] : memref<21x32x16xbf16, #tpu.memory_space<vmem>>, vector<1x32x16xbf16>
    %237 = vector.shape_cast %236 : vector<1x32x16xbf16> to vector<32x16xbf16>
    %cst_158 = arith.constant dense<0.000000e+00> : vector<8x16xf32>
    %238 = tpu.matmul %235, %237, %cst_158 {dimension_numbers = #tpu.dot_dimension_numbers<[1], [0], [0], [1], [0, 0, 1, 1], [], []>} : vector<8x32xbf16>, vector<32x16xbf16>, vector<8x16xf32> -> vector<8x16xf32>
    %c6_159 = arith.constant 6 : index
    %c0_160 = arith.constant 0 : index
    %c0_161 = arith.constant 0 : index
    %239 = vector.load %arg6[%c6_159, %c0_160, %c0_161] : memref<21x1x16xf32, #tpu.memory_space<vmem>>, vector<1x1x16xf32>
    %240 = vector.shape_cast %239 : vector<1x1x16xf32> to vector<1x16xf32>
    %241 = vector.broadcast %240 : vector<1x16xf32> to vector<8x16xf32>
    %242 = arith.addf %238, %241 : vector<8x16xf32>
    %cst_162 = arith.constant 1.000000e-01 : f32
    %243 = vector.broadcast %cst_162 : f32 to vector<8x16xf32>
    %244 = arith.mulf %243, %242 : vector<8x16xf32>
    %245 = arith.maximumf %242, %244 : vector<8x16xf32>
    %246 = vector.extract_strided_slice %0 {offsets = [0, 7, 0], sizes = [8, 1, 16], strides = [1, 1, 1]} : vector<8x21x16xf32> to vector<8x1x16xf32>
    %247 = vector.shape_cast %246 : vector<8x1x16xf32> to vector<8x16xf32>
    %248 = arith.truncf %247 : vector<8x16xf32> to vector<8x16xbf16>
    %c7 = arith.constant 7 : index
    %c0_163 = arith.constant 0 : index
    %c0_164 = arith.constant 0 : index
    %249 = vector.load %arg1[%c7, %c0_163, %c0_164] : memref<21x16x32xbf16, #tpu.memory_space<vmem>>, vector<1x16x32xbf16>
    %250 = vector.shape_cast %249 : vector<1x16x32xbf16> to vector<16x32xbf16>
    %cst_165 = arith.constant dense<0.000000e+00> : vector<8x32xf32>
    %251 = tpu.matmul %248, %250, %cst_165 {dimension_numbers = #tpu.dot_dimension_numbers<[1], [0], [0], [1], [0, 0, 1, 1], [], []>} : vector<8x16xbf16>, vector<16x32xbf16>, vector<8x32xf32> -> vector<8x32xf32>
    %c7_166 = arith.constant 7 : index
    %c0_167 = arith.constant 0 : index
    %c0_168 = arith.constant 0 : index
    %252 = vector.load %arg2[%c7_166, %c0_167, %c0_168] : memref<21x1x32xf32, #tpu.memory_space<vmem>>, vector<1x1x32xf32>
    %253 = vector.shape_cast %252 : vector<1x1x32xf32> to vector<1x32xf32>
    %254 = vector.broadcast %253 : vector<1x32xf32> to vector<8x32xf32>
    %255 = arith.addf %251, %254 : vector<8x32xf32>
    %cst_169 = arith.constant 1.000000e-01 : f32
    %256 = vector.broadcast %cst_169 : f32 to vector<8x32xf32>
    %257 = arith.mulf %256, %255 : vector<8x32xf32>
    %258 = arith.maximumf %255, %257 : vector<8x32xf32>
    %259 = arith.truncf %258 : vector<8x32xf32> to vector<8x32xbf16>
    %c7_170 = arith.constant 7 : index
    %c0_171 = arith.constant 0 : index
    %c0_172 = arith.constant 0 : index
    %260 = vector.load %arg3[%c7_170, %c0_171, %c0_172] : memref<21x32x32xbf16, #tpu.memory_space<vmem>>, vector<1x32x32xbf16>
    %261 = vector.shape_cast %260 : vector<1x32x32xbf16> to vector<32x32xbf16>
    %cst_173 = arith.constant dense<0.000000e+00> : vector<8x32xf32>
    %262 = tpu.matmul %259, %261, %cst_173 {dimension_numbers = #tpu.dot_dimension_numbers<[1], [0], [0], [1], [0, 0, 1, 1], [], []>} : vector<8x32xbf16>, vector<32x32xbf16>, vector<8x32xf32> -> vector<8x32xf32>
    %c7_174 = arith.constant 7 : index
    %c0_175 = arith.constant 0 : index
    %c0_176 = arith.constant 0 : index
    %263 = vector.load %arg4[%c7_174, %c0_175, %c0_176] : memref<21x1x32xf32, #tpu.memory_space<vmem>>, vector<1x1x32xf32>
    %264 = vector.shape_cast %263 : vector<1x1x32xf32> to vector<1x32xf32>
    %265 = vector.broadcast %264 : vector<1x32xf32> to vector<8x32xf32>
    %266 = arith.addf %262, %265 : vector<8x32xf32>
    %cst_177 = arith.constant 1.000000e-01 : f32
    %267 = vector.broadcast %cst_177 : f32 to vector<8x32xf32>
    %268 = arith.mulf %267, %266 : vector<8x32xf32>
    %269 = arith.maximumf %266, %268 : vector<8x32xf32>
    %270 = arith.truncf %269 : vector<8x32xf32> to vector<8x32xbf16>
    %c7_178 = arith.constant 7 : index
    %c0_179 = arith.constant 0 : index
    %c0_180 = arith.constant 0 : index
    %271 = vector.load %arg5[%c7_178, %c0_179, %c0_180] : memref<21x32x16xbf16, #tpu.memory_space<vmem>>, vector<1x32x16xbf16>
    %272 = vector.shape_cast %271 : vector<1x32x16xbf16> to vector<32x16xbf16>
    %cst_181 = arith.constant dense<0.000000e+00> : vector<8x16xf32>
    %273 = tpu.matmul %270, %272, %cst_181 {dimension_numbers = #tpu.dot_dimension_numbers<[1], [0], [0], [1], [0, 0, 1, 1], [], []>} : vector<8x32xbf16>, vector<32x16xbf16>, vector<8x16xf32> -> vector<8x16xf32>
    %c7_182 = arith.constant 7 : index
    %c0_183 = arith.constant 0 : index
    %c0_184 = arith.constant 0 : index
    %274 = vector.load %arg6[%c7_182, %c0_183, %c0_184] : memref<21x1x16xf32, #tpu.memory_space<vmem>>, vector<1x1x16xf32>
    %275 = vector.shape_cast %274 : vector<1x1x16xf32> to vector<1x16xf32>
    %276 = vector.broadcast %275 : vector<1x16xf32> to vector<8x16xf32>
    %277 = arith.addf %273, %276 : vector<8x16xf32>
    %cst_185 = arith.constant 1.000000e-01 : f32
    %278 = vector.broadcast %cst_185 : f32 to vector<8x16xf32>
    %279 = arith.mulf %278, %277 : vector<8x16xf32>
    %280 = arith.maximumf %277, %279 : vector<8x16xf32>
    %281 = vector.extract_strided_slice %0 {offsets = [0, 8, 0], sizes = [8, 1, 16], strides = [1, 1, 1]} : vector<8x21x16xf32> to vector<8x1x16xf32>
    %282 = vector.shape_cast %281 : vector<8x1x16xf32> to vector<8x16xf32>
    %283 = arith.truncf %282 : vector<8x16xf32> to vector<8x16xbf16>
    %c8 = arith.constant 8 : index
    %c0_186 = arith.constant 0 : index
    %c0_187 = arith.constant 0 : index
    %284 = vector.load %arg1[%c8, %c0_186, %c0_187] : memref<21x16x32xbf16, #tpu.memory_space<vmem>>, vector<1x16x32xbf16>
    %285 = vector.shape_cast %284 : vector<1x16x32xbf16> to vector<16x32xbf16>
    %cst_188 = arith.constant dense<0.000000e+00> : vector<8x32xf32>
    %286 = tpu.matmul %283, %285, %cst_188 {dimension_numbers = #tpu.dot_dimension_numbers<[1], [0], [0], [1], [0, 0, 1, 1], [], []>} : vector<8x16xbf16>, vector<16x32xbf16>, vector<8x32xf32> -> vector<8x32xf32>
    %c8_189 = arith.constant 8 : index
    %c0_190 = arith.constant 0 : index
    %c0_191 = arith.constant 0 : index
    %287 = vector.load %arg2[%c8_189, %c0_190, %c0_191] : memref<21x1x32xf32, #tpu.memory_space<vmem>>, vector<1x1x32xf32>
    %288 = vector.shape_cast %287 : vector<1x1x32xf32> to vector<1x32xf32>
    %289 = vector.broadcast %288 : vector<1x32xf32> to vector<8x32xf32>
    %290 = arith.addf %286, %289 : vector<8x32xf32>
    %cst_192 = arith.constant 1.000000e-01 : f32
    %291 = vector.broadcast %cst_192 : f32 to vector<8x32xf32>
    %292 = arith.mulf %291, %290 : vector<8x32xf32>
    %293 = arith.maximumf %290, %292 : vector<8x32xf32>
    %294 = arith.truncf %293 : vector<8x32xf32> to vector<8x32xbf16>
    %c8_193 = arith.constant 8 : index
    %c0_194 = arith.constant 0 : index
    %c0_195 = arith.constant 0 : index
    %295 = vector.load %arg3[%c8_193, %c0_194, %c0_195] : memref<21x32x32xbf16, #tpu.memory_space<vmem>>, vector<1x32x32xbf16>
    %296 = vector.shape_cast %295 : vector<1x32x32xbf16> to vector<32x32xbf16>
    %cst_196 = arith.constant dense<0.000000e+00> : vector<8x32xf32>
    %297 = tpu.matmul %294, %296, %cst_196 {dimension_numbers = #tpu.dot_dimension_numbers<[1], [0], [0], [1], [0, 0, 1, 1], [], []>} : vector<8x32xbf16>, vector<32x32xbf16>, vector<8x32xf32> -> vector<8x32xf32>
    %c8_197 = arith.constant 8 : index
    %c0_198 = arith.constant 0 : index
    %c0_199 = arith.constant 0 : index
    %298 = vector.load %arg4[%c8_197, %c0_198, %c0_199] : memref<21x1x32xf32, #tpu.memory_space<vmem>>, vector<1x1x32xf32>
    %299 = vector.shape_cast %298 : vector<1x1x32xf32> to vector<1x32xf32>
    %300 = vector.broadcast %299 : vector<1x32xf32> to vector<8x32xf32>
    %301 = arith.addf %297, %300 : vector<8x32xf32>
    %cst_200 = arith.constant 1.000000e-01 : f32
    %302 = vector.broadcast %cst_200 : f32 to vector<8x32xf32>
    %303 = arith.mulf %302, %301 : vector<8x32xf32>
    %304 = arith.maximumf %301, %303 : vector<8x32xf32>
    %305 = arith.truncf %304 : vector<8x32xf32> to vector<8x32xbf16>
    %c8_201 = arith.constant 8 : index
    %c0_202 = arith.constant 0 : index
    %c0_203 = arith.constant 0 : index
    %306 = vector.load %arg5[%c8_201, %c0_202, %c0_203] : memref<21x32x16xbf16, #tpu.memory_space<vmem>>, vector<1x32x16xbf16>
    %307 = vector.shape_cast %306 : vector<1x32x16xbf16> to vector<32x16xbf16>
    %cst_204 = arith.constant dense<0.000000e+00> : vector<8x16xf32>
    %308 = tpu.matmul %305, %307, %cst_204 {dimension_numbers = #tpu.dot_dimension_numbers<[1], [0], [0], [1], [0, 0, 1, 1], [], []>} : vector<8x32xbf16>, vector<32x16xbf16>, vector<8x16xf32> -> vector<8x16xf32>
    %c8_205 = arith.constant 8 : index
    %c0_206 = arith.constant 0 : index
    %c0_207 = arith.constant 0 : index
    %309 = vector.load %arg6[%c8_205, %c0_206, %c0_207] : memref<21x1x16xf32, #tpu.memory_space<vmem>>, vector<1x1x16xf32>
    %310 = vector.shape_cast %309 : vector<1x1x16xf32> to vector<1x16xf32>
    %311 = vector.broadcast %310 : vector<1x16xf32> to vector<8x16xf32>
    %312 = arith.addf %308, %311 : vector<8x16xf32>
    %cst_208 = arith.constant 1.000000e-01 : f32
    %313 = vector.broadcast %cst_208 : f32 to vector<8x16xf32>
    %314 = arith.mulf %313, %312 : vector<8x16xf32>
    %315 = arith.maximumf %312, %314 : vector<8x16xf32>
    %316 = vector.extract_strided_slice %0 {offsets = [0, 9, 0], sizes = [8, 1, 16], strides = [1, 1, 1]} : vector<8x21x16xf32> to vector<8x1x16xf32>
    %317 = vector.shape_cast %316 : vector<8x1x16xf32> to vector<8x16xf32>
    %318 = arith.truncf %317 : vector<8x16xf32> to vector<8x16xbf16>
    %c9 = arith.constant 9 : index
    %c0_209 = arith.constant 0 : index
    %c0_210 = arith.constant 0 : index
    %319 = vector.load %arg1[%c9, %c0_209, %c0_210] : memref<21x16x32xbf16, #tpu.memory_space<vmem>>, vector<1x16x32xbf16>
    %320 = vector.shape_cast %319 : vector<1x16x32xbf16> to vector<16x32xbf16>
    %cst_211 = arith.constant dense<0.000000e+00> : vector<8x32xf32>
    %321 = tpu.matmul %318, %320, %cst_211 {dimension_numbers = #tpu.dot_dimension_numbers<[1], [0], [0], [1], [0, 0, 1, 1], [], []>} : vector<8x16xbf16>, vector<16x32xbf16>, vector<8x32xf32> -> vector<8x32xf32>
    %c9_212 = arith.constant 9 : index
    %c0_213 = arith.constant 0 : index
    %c0_214 = arith.constant 0 : index
    %322 = vector.load %arg2[%c9_212, %c0_213, %c0_214] : memref<21x1x32xf32, #tpu.memory_space<vmem>>, vector<1x1x32xf32>
    %323 = vector.shape_cast %322 : vector<1x1x32xf32> to vector<1x32xf32>
    %324 = vector.broadcast %323 : vector<1x32xf32> to vector<8x32xf32>
    %325 = arith.addf %321, %324 : vector<8x32xf32>
    %cst_215 = arith.constant 1.000000e-01 : f32
    %326 = vector.broadcast %cst_215 : f32 to vector<8x32xf32>
    %327 = arith.mulf %326, %325 : vector<8x32xf32>
    %328 = arith.maximumf %325, %327 : vector<8x32xf32>
    %329 = arith.truncf %328 : vector<8x32xf32> to vector<8x32xbf16>
    %c9_216 = arith.constant 9 : index
    %c0_217 = arith.constant 0 : index
    %c0_218 = arith.constant 0 : index
    %330 = vector.load %arg3[%c9_216, %c0_217, %c0_218] : memref<21x32x32xbf16, #tpu.memory_space<vmem>>, vector<1x32x32xbf16>
    %331 = vector.shape_cast %330 : vector<1x32x32xbf16> to vector<32x32xbf16>
    %cst_219 = arith.constant dense<0.000000e+00> : vector<8x32xf32>
    %332 = tpu.matmul %329, %331, %cst_219 {dimension_numbers = #tpu.dot_dimension_numbers<[1], [0], [0], [1], [0, 0, 1, 1], [], []>} : vector<8x32xbf16>, vector<32x32xbf16>, vector<8x32xf32> -> vector<8x32xf32>
    %c9_220 = arith.constant 9 : index
    %c0_221 = arith.constant 0 : index
    %c0_222 = arith.constant 0 : index
    %333 = vector.load %arg4[%c9_220, %c0_221, %c0_222] : memref<21x1x32xf32, #tpu.memory_space<vmem>>, vector<1x1x32xf32>
    %334 = vector.shape_cast %333 : vector<1x1x32xf32> to vector<1x32xf32>
    %335 = vector.broadcast %334 : vector<1x32xf32> to vector<8x32xf32>
    %336 = arith.addf %332, %335 : vector<8x32xf32>
    %cst_223 = arith.constant 1.000000e-01 : f32
    %337 = vector.broadcast %cst_223 : f32 to vector<8x32xf32>
    %338 = arith.mulf %337, %336 : vector<8x32xf32>
    %339 = arith.maximumf %336, %338 : vector<8x32xf32>
    %340 = arith.truncf %339 : vector<8x32xf32> to vector<8x32xbf16>
    %c9_224 = arith.constant 9 : index
    %c0_225 = arith.constant 0 : index
    %c0_226 = arith.constant 0 : index
    %341 = vector.load %arg5[%c9_224, %c0_225, %c0_226] : memref<21x32x16xbf16, #tpu.memory_space<vmem>>, vector<1x32x16xbf16>
    %342 = vector.shape_cast %341 : vector<1x32x16xbf16> to vector<32x16xbf16>
    %cst_227 = arith.constant dense<0.000000e+00> : vector<8x16xf32>
    %343 = tpu.matmul %340, %342, %cst_227 {dimension_numbers = #tpu.dot_dimension_numbers<[1], [0], [0], [1], [0, 0, 1, 1], [], []>} : vector<8x32xbf16>, vector<32x16xbf16>, vector<8x16xf32> -> vector<8x16xf32>
    %c9_228 = arith.constant 9 : index
    %c0_229 = arith.constant 0 : index
    %c0_230 = arith.constant 0 : index
    %344 = vector.load %arg6[%c9_228, %c0_229, %c0_230] : memref<21x1x16xf32, #tpu.memory_space<vmem>>, vector<1x1x16xf32>
    %345 = vector.shape_cast %344 : vector<1x1x16xf32> to vector<1x16xf32>
    %346 = vector.broadcast %345 : vector<1x16xf32> to vector<8x16xf32>
    %347 = arith.addf %343, %346 : vector<8x16xf32>
    %cst_231 = arith.constant 1.000000e-01 : f32
    %348 = vector.broadcast %cst_231 : f32 to vector<8x16xf32>
    %349 = arith.mulf %348, %347 : vector<8x16xf32>
    %350 = arith.maximumf %347, %349 : vector<8x16xf32>
    %351 = vector.extract_strided_slice %0 {offsets = [0, 10, 0], sizes = [8, 1, 16], strides = [1, 1, 1]} : vector<8x21x16xf32> to vector<8x1x16xf32>
    %352 = vector.shape_cast %351 : vector<8x1x16xf32> to vector<8x16xf32>
    %353 = arith.truncf %352 : vector<8x16xf32> to vector<8x16xbf16>
    %c10 = arith.constant 10 : index
    %c0_232 = arith.constant 0 : index
    %c0_233 = arith.constant 0 : index
    %354 = vector.load %arg1[%c10, %c0_232, %c0_233] : memref<21x16x32xbf16, #tpu.memory_space<vmem>>, vector<1x16x32xbf16>
    %355 = vector.shape_cast %354 : vector<1x16x32xbf16> to vector<16x32xbf16>
    %cst_234 = arith.constant dense<0.000000e+00> : vector<8x32xf32>
    %356 = tpu.matmul %353, %355, %cst_234 {dimension_numbers = #tpu.dot_dimension_numbers<[1], [0], [0], [1], [0, 0, 1, 1], [], []>} : vector<8x16xbf16>, vector<16x32xbf16>, vector<8x32xf32> -> vector<8x32xf32>
    %c10_235 = arith.constant 10 : index
    %c0_236 = arith.constant 0 : index
    %c0_237 = arith.constant 0 : index
    %357 = vector.load %arg2[%c10_235, %c0_236, %c0_237] : memref<21x1x32xf32, #tpu.memory_space<vmem>>, vector<1x1x32xf32>
    %358 = vector.shape_cast %357 : vector<1x1x32xf32> to vector<1x32xf32>
    %359 = vector.broadcast %358 : vector<1x32xf32> to vector<8x32xf32>
    %360 = arith.addf %356, %359 : vector<8x32xf32>
    %cst_238 = arith.constant 1.000000e-01 : f32
    %361 = vector.broadcast %cst_238 : f32 to vector<8x32xf32>
    %362 = arith.mulf %361, %360 : vector<8x32xf32>
    %363 = arith.maximumf %360, %362 : vector<8x32xf32>
    %364 = arith.truncf %363 : vector<8x32xf32> to vector<8x32xbf16>
    %c10_239 = arith.constant 10 : index
    %c0_240 = arith.constant 0 : index
    %c0_241 = arith.constant 0 : index
    %365 = vector.load %arg3[%c10_239, %c0_240, %c0_241] : memref<21x32x32xbf16, #tpu.memory_space<vmem>>, vector<1x32x32xbf16>
    %366 = vector.shape_cast %365 : vector<1x32x32xbf16> to vector<32x32xbf16>
    %cst_242 = arith.constant dense<0.000000e+00> : vector<8x32xf32>
    %367 = tpu.matmul %364, %366, %cst_242 {dimension_numbers = #tpu.dot_dimension_numbers<[1], [0], [0], [1], [0, 0, 1, 1], [], []>} : vector<8x32xbf16>, vector<32x32xbf16>, vector<8x32xf32> -> vector<8x32xf32>
    %c10_243 = arith.constant 10 : index
    %c0_244 = arith.constant 0 : index
    %c0_245 = arith.constant 0 : index
    %368 = vector.load %arg4[%c10_243, %c0_244, %c0_245] : memref<21x1x32xf32, #tpu.memory_space<vmem>>, vector<1x1x32xf32>
    %369 = vector.shape_cast %368 : vector<1x1x32xf32> to vector<1x32xf32>
    %370 = vector.broadcast %369 : vector<1x32xf32> to vector<8x32xf32>
    %371 = arith.addf %367, %370 : vector<8x32xf32>
    %cst_246 = arith.constant 1.000000e-01 : f32
    %372 = vector.broadcast %cst_246 : f32 to vector<8x32xf32>
    %373 = arith.mulf %372, %371 : vector<8x32xf32>
    %374 = arith.maximumf %371, %373 : vector<8x32xf32>
    %375 = arith.truncf %374 : vector<8x32xf32> to vector<8x32xbf16>
    %c10_247 = arith.constant 10 : index
    %c0_248 = arith.constant 0 : index
    %c0_249 = arith.constant 0 : index
    %376 = vector.load %arg5[%c10_247, %c0_248, %c0_249] : memref<21x32x16xbf16, #tpu.memory_space<vmem>>, vector<1x32x16xbf16>
    %377 = vector.shape_cast %376 : vector<1x32x16xbf16> to vector<32x16xbf16>
    %cst_250 = arith.constant dense<0.000000e+00> : vector<8x16xf32>
    %378 = tpu.matmul %375, %377, %cst_250 {dimension_numbers = #tpu.dot_dimension_numbers<[1], [0], [0], [1], [0, 0, 1, 1], [], []>} : vector<8x32xbf16>, vector<32x16xbf16>, vector<8x16xf32> -> vector<8x16xf32>
    %c10_251 = arith.constant 10 : index
    %c0_252 = arith.constant 0 : index
    %c0_253 = arith.constant 0 : index
    %379 = vector.load %arg6[%c10_251, %c0_252, %c0_253] : memref<21x1x16xf32, #tpu.memory_space<vmem>>, vector<1x1x16xf32>
    %380 = vector.shape_cast %379 : vector<1x1x16xf32> to vector<1x16xf32>
    %381 = vector.broadcast %380 : vector<1x16xf32> to vector<8x16xf32>
    %382 = arith.addf %378, %381 : vector<8x16xf32>
    %cst_254 = arith.constant 1.000000e-01 : f32
    %383 = vector.broadcast %cst_254 : f32 to vector<8x16xf32>
    %384 = arith.mulf %383, %382 : vector<8x16xf32>
    %385 = arith.maximumf %382, %384 : vector<8x16xf32>
    %386 = vector.extract_strided_slice %0 {offsets = [0, 11, 0], sizes = [8, 1, 16], strides = [1, 1, 1]} : vector<8x21x16xf32> to vector<8x1x16xf32>
    %387 = vector.shape_cast %386 : vector<8x1x16xf32> to vector<8x16xf32>
    %388 = arith.truncf %387 : vector<8x16xf32> to vector<8x16xbf16>
    %c11 = arith.constant 11 : index
    %c0_255 = arith.constant 0 : index
    %c0_256 = arith.constant 0 : index
    %389 = vector.load %arg1[%c11, %c0_255, %c0_256] : memref<21x16x32xbf16, #tpu.memory_space<vmem>>, vector<1x16x32xbf16>
    %390 = vector.shape_cast %389 : vector<1x16x32xbf16> to vector<16x32xbf16>
    %cst_257 = arith.constant dense<0.000000e+00> : vector<8x32xf32>
    %391 = tpu.matmul %388, %390, %cst_257 {dimension_numbers = #tpu.dot_dimension_numbers<[1], [0], [0], [1], [0, 0, 1, 1], [], []>} : vector<8x16xbf16>, vector<16x32xbf16>, vector<8x32xf32> -> vector<8x32xf32>
    %c11_258 = arith.constant 11 : index
    %c0_259 = arith.constant 0 : index
    %c0_260 = arith.constant 0 : index
    %392 = vector.load %arg2[%c11_258, %c0_259, %c0_260] : memref<21x1x32xf32, #tpu.memory_space<vmem>>, vector<1x1x32xf32>
    %393 = vector.shape_cast %392 : vector<1x1x32xf32> to vector<1x32xf32>
    %394 = vector.broadcast %393 : vector<1x32xf32> to vector<8x32xf32>
    %395 = arith.addf %391, %394 : vector<8x32xf32>
    %cst_261 = arith.constant 1.000000e-01 : f32
    %396 = vector.broadcast %cst_261 : f32 to vector<8x32xf32>
    %397 = arith.mulf %396, %395 : vector<8x32xf32>
    %398 = arith.maximumf %395, %397 : vector<8x32xf32>
    %399 = arith.truncf %398 : vector<8x32xf32> to vector<8x32xbf16>
    %c11_262 = arith.constant 11 : index
    %c0_263 = arith.constant 0 : index
    %c0_264 = arith.constant 0 : index
    %400 = vector.load %arg3[%c11_262, %c0_263, %c0_264] : memref<21x32x32xbf16, #tpu.memory_space<vmem>>, vector<1x32x32xbf16>
    %401 = vector.shape_cast %400 : vector<1x32x32xbf16> to vector<32x32xbf16>
    %cst_265 = arith.constant dense<0.000000e+00> : vector<8x32xf32>
    %402 = tpu.matmul %399, %401, %cst_265 {dimension_numbers = #tpu.dot_dimension_numbers<[1], [0], [0], [1], [0, 0, 1, 1], [], []>} : vector<8x32xbf16>, vector<32x32xbf16>, vector<8x32xf32> -> vector<8x32xf32>
    %c11_266 = arith.constant 11 : index
    %c0_267 = arith.constant 0 : index
    %c0_268 = arith.constant 0 : index
    %403 = vector.load %arg4[%c11_266, %c0_267, %c0_268] : memref<21x1x32xf32, #tpu.memory_space<vmem>>, vector<1x1x32xf32>
    %404 = vector.shape_cast %403 : vector<1x1x32xf32> to vector<1x32xf32>
    %405 = vector.broadcast %404 : vector<1x32xf32> to vector<8x32xf32>
    %406 = arith.addf %402, %405 : vector<8x32xf32>
    %cst_269 = arith.constant 1.000000e-01 : f32
    %407 = vector.broadcast %cst_269 : f32 to vector<8x32xf32>
    %408 = arith.mulf %407, %406 : vector<8x32xf32>
    %409 = arith.maximumf %406, %408 : vector<8x32xf32>
    %410 = arith.truncf %409 : vector<8x32xf32> to vector<8x32xbf16>
    %c11_270 = arith.constant 11 : index
    %c0_271 = arith.constant 0 : index
    %c0_272 = arith.constant 0 : index
    %411 = vector.load %arg5[%c11_270, %c0_271, %c0_272] : memref<21x32x16xbf16, #tpu.memory_space<vmem>>, vector<1x32x16xbf16>
    %412 = vector.shape_cast %411 : vector<1x32x16xbf16> to vector<32x16xbf16>
    %cst_273 = arith.constant dense<0.000000e+00> : vector<8x16xf32>
    %413 = tpu.matmul %410, %412, %cst_273 {dimension_numbers = #tpu.dot_dimension_numbers<[1], [0], [0], [1], [0, 0, 1, 1], [], []>} : vector<8x32xbf16>, vector<32x16xbf16>, vector<8x16xf32> -> vector<8x16xf32>
    %c11_274 = arith.constant 11 : index
    %c0_275 = arith.constant 0 : index
    %c0_276 = arith.constant 0 : index
    %414 = vector.load %arg6[%c11_274, %c0_275, %c0_276] : memref<21x1x16xf32, #tpu.memory_space<vmem>>, vector<1x1x16xf32>
    %415 = vector.shape_cast %414 : vector<1x1x16xf32> to vector<1x16xf32>
    %416 = vector.broadcast %415 : vector<1x16xf32> to vector<8x16xf32>
    %417 = arith.addf %413, %416 : vector<8x16xf32>
    %cst_277 = arith.constant 1.000000e-01 : f32
    %418 = vector.broadcast %cst_277 : f32 to vector<8x16xf32>
    %419 = arith.mulf %418, %417 : vector<8x16xf32>
    %420 = arith.maximumf %417, %419 : vector<8x16xf32>
    %421 = vector.extract_strided_slice %0 {offsets = [0, 12, 0], sizes = [8, 1, 16], strides = [1, 1, 1]} : vector<8x21x16xf32> to vector<8x1x16xf32>
    %422 = vector.shape_cast %421 : vector<8x1x16xf32> to vector<8x16xf32>
    %423 = arith.truncf %422 : vector<8x16xf32> to vector<8x16xbf16>
    %c12 = arith.constant 12 : index
    %c0_278 = arith.constant 0 : index
    %c0_279 = arith.constant 0 : index
    %424 = vector.load %arg1[%c12, %c0_278, %c0_279] : memref<21x16x32xbf16, #tpu.memory_space<vmem>>, vector<1x16x32xbf16>
    %425 = vector.shape_cast %424 : vector<1x16x32xbf16> to vector<16x32xbf16>
    %cst_280 = arith.constant dense<0.000000e+00> : vector<8x32xf32>
    %426 = tpu.matmul %423, %425, %cst_280 {dimension_numbers = #tpu.dot_dimension_numbers<[1], [0], [0], [1], [0, 0, 1, 1], [], []>} : vector<8x16xbf16>, vector<16x32xbf16>, vector<8x32xf32> -> vector<8x32xf32>
    %c12_281 = arith.constant 12 : index
    %c0_282 = arith.constant 0 : index
    %c0_283 = arith.constant 0 : index
    %427 = vector.load %arg2[%c12_281, %c0_282, %c0_283] : memref<21x1x32xf32, #tpu.memory_space<vmem>>, vector<1x1x32xf32>
    %428 = vector.shape_cast %427 : vector<1x1x32xf32> to vector<1x32xf32>
    %429 = vector.broadcast %428 : vector<1x32xf32> to vector<8x32xf32>
    %430 = arith.addf %426, %429 : vector<8x32xf32>
    %cst_284 = arith.constant 1.000000e-01 : f32
    %431 = vector.broadcast %cst_284 : f32 to vector<8x32xf32>
    %432 = arith.mulf %431, %430 : vector<8x32xf32>
    %433 = arith.maximumf %430, %432 : vector<8x32xf32>
    %434 = arith.truncf %433 : vector<8x32xf32> to vector<8x32xbf16>
    %c12_285 = arith.constant 12 : index
    %c0_286 = arith.constant 0 : index
    %c0_287 = arith.constant 0 : index
    %435 = vector.load %arg3[%c12_285, %c0_286, %c0_287] : memref<21x32x32xbf16, #tpu.memory_space<vmem>>, vector<1x32x32xbf16>
    %436 = vector.shape_cast %435 : vector<1x32x32xbf16> to vector<32x32xbf16>
    %cst_288 = arith.constant dense<0.000000e+00> : vector<8x32xf32>
    %437 = tpu.matmul %434, %436, %cst_288 {dimension_numbers = #tpu.dot_dimension_numbers<[1], [0], [0], [1], [0, 0, 1, 1], [], []>} : vector<8x32xbf16>, vector<32x32xbf16>, vector<8x32xf32> -> vector<8x32xf32>
    %c12_289 = arith.constant 12 : index
    %c0_290 = arith.constant 0 : index
    %c0_291 = arith.constant 0 : index
    %438 = vector.load %arg4[%c12_289, %c0_290, %c0_291] : memref<21x1x32xf32, #tpu.memory_space<vmem>>, vector<1x1x32xf32>
    %439 = vector.shape_cast %438 : vector<1x1x32xf32> to vector<1x32xf32>
    %440 = vector.broadcast %439 : vector<1x32xf32> to vector<8x32xf32>
    %441 = arith.addf %437, %440 : vector<8x32xf32>
    %cst_292 = arith.constant 1.000000e-01 : f32
    %442 = vector.broadcast %cst_292 : f32 to vector<8x32xf32>
    %443 = arith.mulf %442, %441 : vector<8x32xf32>
    %444 = arith.maximumf %441, %443 : vector<8x32xf32>
    %445 = arith.truncf %444 : vector<8x32xf32> to vector<8x32xbf16>
    %c12_293 = arith.constant 12 : index
    %c0_294 = arith.constant 0 : index
    %c0_295 = arith.constant 0 : index
    %446 = vector.load %arg5[%c12_293, %c0_294, %c0_295] : memref<21x32x16xbf16, #tpu.memory_space<vmem>>, vector<1x32x16xbf16>
    %447 = vector.shape_cast %446 : vector<1x32x16xbf16> to vector<32x16xbf16>
    %cst_296 = arith.constant dense<0.000000e+00> : vector<8x16xf32>
    %448 = tpu.matmul %445, %447, %cst_296 {dimension_numbers = #tpu.dot_dimension_numbers<[1], [0], [0], [1], [0, 0, 1, 1], [], []>} : vector<8x32xbf16>, vector<32x16xbf16>, vector<8x16xf32> -> vector<8x16xf32>
    %c12_297 = arith.constant 12 : index
    %c0_298 = arith.constant 0 : index
    %c0_299 = arith.constant 0 : index
    %449 = vector.load %arg6[%c12_297, %c0_298, %c0_299] : memref<21x1x16xf32, #tpu.memory_space<vmem>>, vector<1x1x16xf32>
    %450 = vector.shape_cast %449 : vector<1x1x16xf32> to vector<1x16xf32>
    %451 = vector.broadcast %450 : vector<1x16xf32> to vector<8x16xf32>
    %452 = arith.addf %448, %451 : vector<8x16xf32>
    %cst_300 = arith.constant 1.000000e-01 : f32
    %453 = vector.broadcast %cst_300 : f32 to vector<8x16xf32>
    %454 = arith.mulf %453, %452 : vector<8x16xf32>
    %455 = arith.maximumf %452, %454 : vector<8x16xf32>
    %456 = vector.extract_strided_slice %0 {offsets = [0, 13, 0], sizes = [8, 1, 16], strides = [1, 1, 1]} : vector<8x21x16xf32> to vector<8x1x16xf32>
    %457 = vector.shape_cast %456 : vector<8x1x16xf32> to vector<8x16xf32>
    %458 = arith.truncf %457 : vector<8x16xf32> to vector<8x16xbf16>
    %c13 = arith.constant 13 : index
    %c0_301 = arith.constant 0 : index
    %c0_302 = arith.constant 0 : index
    %459 = vector.load %arg1[%c13, %c0_301, %c0_302] : memref<21x16x32xbf16, #tpu.memory_space<vmem>>, vector<1x16x32xbf16>
    %460 = vector.shape_cast %459 : vector<1x16x32xbf16> to vector<16x32xbf16>
    %cst_303 = arith.constant dense<0.000000e+00> : vector<8x32xf32>
    %461 = tpu.matmul %458, %460, %cst_303 {dimension_numbers = #tpu.dot_dimension_numbers<[1], [0], [0], [1], [0, 0, 1, 1], [], []>} : vector<8x16xbf16>, vector<16x32xbf16>, vector<8x32xf32> -> vector<8x32xf32>
    %c13_304 = arith.constant 13 : index
    %c0_305 = arith.constant 0 : index
    %c0_306 = arith.constant 0 : index
    %462 = vector.load %arg2[%c13_304, %c0_305, %c0_306] : memref<21x1x32xf32, #tpu.memory_space<vmem>>, vector<1x1x32xf32>
    %463 = vector.shape_cast %462 : vector<1x1x32xf32> to vector<1x32xf32>
    %464 = vector.broadcast %463 : vector<1x32xf32> to vector<8x32xf32>
    %465 = arith.addf %461, %464 : vector<8x32xf32>
    %cst_307 = arith.constant 1.000000e-01 : f32
    %466 = vector.broadcast %cst_307 : f32 to vector<8x32xf32>
    %467 = arith.mulf %466, %465 : vector<8x32xf32>
    %468 = arith.maximumf %465, %467 : vector<8x32xf32>
    %469 = arith.truncf %468 : vector<8x32xf32> to vector<8x32xbf16>
    %c13_308 = arith.constant 13 : index
    %c0_309 = arith.constant 0 : index
    %c0_310 = arith.constant 0 : index
    %470 = vector.load %arg3[%c13_308, %c0_309, %c0_310] : memref<21x32x32xbf16, #tpu.memory_space<vmem>>, vector<1x32x32xbf16>
    %471 = vector.shape_cast %470 : vector<1x32x32xbf16> to vector<32x32xbf16>
    %cst_311 = arith.constant dense<0.000000e+00> : vector<8x32xf32>
    %472 = tpu.matmul %469, %471, %cst_311 {dimension_numbers = #tpu.dot_dimension_numbers<[1], [0], [0], [1], [0, 0, 1, 1], [], []>} : vector<8x32xbf16>, vector<32x32xbf16>, vector<8x32xf32> -> vector<8x32xf32>
    %c13_312 = arith.constant 13 : index
    %c0_313 = arith.constant 0 : index
    %c0_314 = arith.constant 0 : index
    %473 = vector.load %arg4[%c13_312, %c0_313, %c0_314] : memref<21x1x32xf32, #tpu.memory_space<vmem>>, vector<1x1x32xf32>
    %474 = vector.shape_cast %473 : vector<1x1x32xf32> to vector<1x32xf32>
    %475 = vector.broadcast %474 : vector<1x32xf32> to vector<8x32xf32>
    %476 = arith.addf %472, %475 : vector<8x32xf32>
    %cst_315 = arith.constant 1.000000e-01 : f32
    %477 = vector.broadcast %cst_315 : f32 to vector<8x32xf32>
    %478 = arith.mulf %477, %476 : vector<8x32xf32>
    %479 = arith.maximumf %476, %478 : vector<8x32xf32>
    %480 = arith.truncf %479 : vector<8x32xf32> to vector<8x32xbf16>
    %c13_316 = arith.constant 13 : index
    %c0_317 = arith.constant 0 : index
    %c0_318 = arith.constant 0 : index
    %481 = vector.load %arg5[%c13_316, %c0_317, %c0_318] : memref<21x32x16xbf16, #tpu.memory_space<vmem>>, vector<1x32x16xbf16>
    %482 = vector.shape_cast %481 : vector<1x32x16xbf16> to vector<32x16xbf16>
    %cst_319 = arith.constant dense<0.000000e+00> : vector<8x16xf32>
    %483 = tpu.matmul %480, %482, %cst_319 {dimension_numbers = #tpu.dot_dimension_numbers<[1], [0], [0], [1], [0, 0, 1, 1], [], []>} : vector<8x32xbf16>, vector<32x16xbf16>, vector<8x16xf32> -> vector<8x16xf32>
    %c13_320 = arith.constant 13 : index
    %c0_321 = arith.constant 0 : index
    %c0_322 = arith.constant 0 : index
    %484 = vector.load %arg6[%c13_320, %c0_321, %c0_322] : memref<21x1x16xf32, #tpu.memory_space<vmem>>, vector<1x1x16xf32>
    %485 = vector.shape_cast %484 : vector<1x1x16xf32> to vector<1x16xf32>
    %486 = vector.broadcast %485 : vector<1x16xf32> to vector<8x16xf32>
    %487 = arith.addf %483, %486 : vector<8x16xf32>
    %cst_323 = arith.constant 1.000000e-01 : f32
    %488 = vector.broadcast %cst_323 : f32 to vector<8x16xf32>
    %489 = arith.mulf %488, %487 : vector<8x16xf32>
    %490 = arith.maximumf %487, %489 : vector<8x16xf32>
    %491 = vector.extract_strided_slice %0 {offsets = [0, 14, 0], sizes = [8, 1, 16], strides = [1, 1, 1]} : vector<8x21x16xf32> to vector<8x1x16xf32>
    %492 = vector.shape_cast %491 : vector<8x1x16xf32> to vector<8x16xf32>
    %493 = arith.truncf %492 : vector<8x16xf32> to vector<8x16xbf16>
    %c14 = arith.constant 14 : index
    %c0_324 = arith.constant 0 : index
    %c0_325 = arith.constant 0 : index
    %494 = vector.load %arg1[%c14, %c0_324, %c0_325] : memref<21x16x32xbf16, #tpu.memory_space<vmem>>, vector<1x16x32xbf16>
    %495 = vector.shape_cast %494 : vector<1x16x32xbf16> to vector<16x32xbf16>
    %cst_326 = arith.constant dense<0.000000e+00> : vector<8x32xf32>
    %496 = tpu.matmul %493, %495, %cst_326 {dimension_numbers = #tpu.dot_dimension_numbers<[1], [0], [0], [1], [0, 0, 1, 1], [], []>} : vector<8x16xbf16>, vector<16x32xbf16>, vector<8x32xf32> -> vector<8x32xf32>
    %c14_327 = arith.constant 14 : index
    %c0_328 = arith.constant 0 : index
    %c0_329 = arith.constant 0 : index
    %497 = vector.load %arg2[%c14_327, %c0_328, %c0_329] : memref<21x1x32xf32, #tpu.memory_space<vmem>>, vector<1x1x32xf32>
    %498 = vector.shape_cast %497 : vector<1x1x32xf32> to vector<1x32xf32>
    %499 = vector.broadcast %498 : vector<1x32xf32> to vector<8x32xf32>
    %500 = arith.addf %496, %499 : vector<8x32xf32>
    %cst_330 = arith.constant 1.000000e-01 : f32
    %501 = vector.broadcast %cst_330 : f32 to vector<8x32xf32>
    %502 = arith.mulf %501, %500 : vector<8x32xf32>
    %503 = arith.maximumf %500, %502 : vector<8x32xf32>
    %504 = arith.truncf %503 : vector<8x32xf32> to vector<8x32xbf16>
    %c14_331 = arith.constant 14 : index
    %c0_332 = arith.constant 0 : index
    %c0_333 = arith.constant 0 : index
    %505 = vector.load %arg3[%c14_331, %c0_332, %c0_333] : memref<21x32x32xbf16, #tpu.memory_space<vmem>>, vector<1x32x32xbf16>
    %506 = vector.shape_cast %505 : vector<1x32x32xbf16> to vector<32x32xbf16>
    %cst_334 = arith.constant dense<0.000000e+00> : vector<8x32xf32>
    %507 = tpu.matmul %504, %506, %cst_334 {dimension_numbers = #tpu.dot_dimension_numbers<[1], [0], [0], [1], [0, 0, 1, 1], [], []>} : vector<8x32xbf16>, vector<32x32xbf16>, vector<8x32xf32> -> vector<8x32xf32>
    %c14_335 = arith.constant 14 : index
    %c0_336 = arith.constant 0 : index
    %c0_337 = arith.constant 0 : index
    %508 = vector.load %arg4[%c14_335, %c0_336, %c0_337] : memref<21x1x32xf32, #tpu.memory_space<vmem>>, vector<1x1x32xf32>
    %509 = vector.shape_cast %508 : vector<1x1x32xf32> to vector<1x32xf32>
    %510 = vector.broadcast %509 : vector<1x32xf32> to vector<8x32xf32>
    %511 = arith.addf %507, %510 : vector<8x32xf32>
    %cst_338 = arith.constant 1.000000e-01 : f32
    %512 = vector.broadcast %cst_338 : f32 to vector<8x32xf32>
    %513 = arith.mulf %512, %511 : vector<8x32xf32>
    %514 = arith.maximumf %511, %513 : vector<8x32xf32>
    %515 = arith.truncf %514 : vector<8x32xf32> to vector<8x32xbf16>
    %c14_339 = arith.constant 14 : index
    %c0_340 = arith.constant 0 : index
    %c0_341 = arith.constant 0 : index
    %516 = vector.load %arg5[%c14_339, %c0_340, %c0_341] : memref<21x32x16xbf16, #tpu.memory_space<vmem>>, vector<1x32x16xbf16>
    %517 = vector.shape_cast %516 : vector<1x32x16xbf16> to vector<32x16xbf16>
    %cst_342 = arith.constant dense<0.000000e+00> : vector<8x16xf32>
    %518 = tpu.matmul %515, %517, %cst_342 {dimension_numbers = #tpu.dot_dimension_numbers<[1], [0], [0], [1], [0, 0, 1, 1], [], []>} : vector<8x32xbf16>, vector<32x16xbf16>, vector<8x16xf32> -> vector<8x16xf32>
    %c14_343 = arith.constant 14 : index
    %c0_344 = arith.constant 0 : index
    %c0_345 = arith.constant 0 : index
    %519 = vector.load %arg6[%c14_343, %c0_344, %c0_345] : memref<21x1x16xf32, #tpu.memory_space<vmem>>, vector<1x1x16xf32>
    %520 = vector.shape_cast %519 : vector<1x1x16xf32> to vector<1x16xf32>
    %521 = vector.broadcast %520 : vector<1x16xf32> to vector<8x16xf32>
    %522 = arith.addf %518, %521 : vector<8x16xf32>
    %cst_346 = arith.constant 1.000000e-01 : f32
    %523 = vector.broadcast %cst_346 : f32 to vector<8x16xf32>
    %524 = arith.mulf %523, %522 : vector<8x16xf32>
    %525 = arith.maximumf %522, %524 : vector<8x16xf32>
    %526 = vector.extract_strided_slice %0 {offsets = [0, 15, 0], sizes = [8, 1, 16], strides = [1, 1, 1]} : vector<8x21x16xf32> to vector<8x1x16xf32>
    %527 = vector.shape_cast %526 : vector<8x1x16xf32> to vector<8x16xf32>
    %528 = arith.truncf %527 : vector<8x16xf32> to vector<8x16xbf16>
    %c15 = arith.constant 15 : index
    %c0_347 = arith.constant 0 : index
    %c0_348 = arith.constant 0 : index
    %529 = vector.load %arg1[%c15, %c0_347, %c0_348] : memref<21x16x32xbf16, #tpu.memory_space<vmem>>, vector<1x16x32xbf16>
    %530 = vector.shape_cast %529 : vector<1x16x32xbf16> to vector<16x32xbf16>
    %cst_349 = arith.constant dense<0.000000e+00> : vector<8x32xf32>
    %531 = tpu.matmul %528, %530, %cst_349 {dimension_numbers = #tpu.dot_dimension_numbers<[1], [0], [0], [1], [0, 0, 1, 1], [], []>} : vector<8x16xbf16>, vector<16x32xbf16>, vector<8x32xf32> -> vector<8x32xf32>
    %c15_350 = arith.constant 15 : index
    %c0_351 = arith.constant 0 : index
    %c0_352 = arith.constant 0 : index
    %532 = vector.load %arg2[%c15_350, %c0_351, %c0_352] : memref<21x1x32xf32, #tpu.memory_space<vmem>>, vector<1x1x32xf32>
    %533 = vector.shape_cast %532 : vector<1x1x32xf32> to vector<1x32xf32>
    %534 = vector.broadcast %533 : vector<1x32xf32> to vector<8x32xf32>
    %535 = arith.addf %531, %534 : vector<8x32xf32>
    %cst_353 = arith.constant 1.000000e-01 : f32
    %536 = vector.broadcast %cst_353 : f32 to vector<8x32xf32>
    %537 = arith.mulf %536, %535 : vector<8x32xf32>
    %538 = arith.maximumf %535, %537 : vector<8x32xf32>
    %539 = arith.truncf %538 : vector<8x32xf32> to vector<8x32xbf16>
    %c15_354 = arith.constant 15 : index
    %c0_355 = arith.constant 0 : index
    %c0_356 = arith.constant 0 : index
    %540 = vector.load %arg3[%c15_354, %c0_355, %c0_356] : memref<21x32x32xbf16, #tpu.memory_space<vmem>>, vector<1x32x32xbf16>
    %541 = vector.shape_cast %540 : vector<1x32x32xbf16> to vector<32x32xbf16>
    %cst_357 = arith.constant dense<0.000000e+00> : vector<8x32xf32>
    %542 = tpu.matmul %539, %541, %cst_357 {dimension_numbers = #tpu.dot_dimension_numbers<[1], [0], [0], [1], [0, 0, 1, 1], [], []>} : vector<8x32xbf16>, vector<32x32xbf16>, vector<8x32xf32> -> vector<8x32xf32>
    %c15_358 = arith.constant 15 : index
    %c0_359 = arith.constant 0 : index
    %c0_360 = arith.constant 0 : index
    %543 = vector.load %arg4[%c15_358, %c0_359, %c0_360] : memref<21x1x32xf32, #tpu.memory_space<vmem>>, vector<1x1x32xf32>
    %544 = vector.shape_cast %543 : vector<1x1x32xf32> to vector<1x32xf32>
    %545 = vector.broadcast %544 : vector<1x32xf32> to vector<8x32xf32>
    %546 = arith.addf %542, %545 : vector<8x32xf32>
    %cst_361 = arith.constant 1.000000e-01 : f32
    %547 = vector.broadcast %cst_361 : f32 to vector<8x32xf32>
    %548 = arith.mulf %547, %546 : vector<8x32xf32>
    %549 = arith.maximumf %546, %548 : vector<8x32xf32>
    %550 = arith.truncf %549 : vector<8x32xf32> to vector<8x32xbf16>
    %c15_362 = arith.constant 15 : index
    %c0_363 = arith.constant 0 : index
    %c0_364 = arith.constant 0 : index
    %551 = vector.load %arg5[%c15_362, %c0_363, %c0_364] : memref<21x32x16xbf16, #tpu.memory_space<vmem>>, vector<1x32x16xbf16>
    %552 = vector.shape_cast %551 : vector<1x32x16xbf16> to vector<32x16xbf16>
    %cst_365 = arith.constant dense<0.000000e+00> : vector<8x16xf32>
    %553 = tpu.matmul %550, %552, %cst_365 {dimension_numbers = #tpu.dot_dimension_numbers<[1], [0], [0], [1], [0, 0, 1, 1], [], []>} : vector<8x32xbf16>, vector<32x16xbf16>, vector<8x16xf32> -> vector<8x16xf32>
    %c15_366 = arith.constant 15 : index
    %c0_367 = arith.constant 0 : index
    %c0_368 = arith.constant 0 : index
    %554 = vector.load %arg6[%c15_366, %c0_367, %c0_368] : memref<21x1x16xf32, #tpu.memory_space<vmem>>, vector<1x1x16xf32>
    %555 = vector.shape_cast %554 : vector<1x1x16xf32> to vector<1x16xf32>
    %556 = vector.broadcast %555 : vector<1x16xf32> to vector<8x16xf32>
    %557 = arith.addf %553, %556 : vector<8x16xf32>
    %cst_369 = arith.constant 1.000000e-01 : f32
    %558 = vector.broadcast %cst_369 : f32 to vector<8x16xf32>
    %559 = arith.mulf %558, %557 : vector<8x16xf32>
    %560 = arith.maximumf %557, %559 : vector<8x16xf32>
    %561 = vector.extract_strided_slice %0 {offsets = [0, 16, 0], sizes = [8, 1, 16], strides = [1, 1, 1]} : vector<8x21x16xf32> to vector<8x1x16xf32>
    %562 = vector.shape_cast %561 : vector<8x1x16xf32> to vector<8x16xf32>
    %563 = arith.truncf %562 : vector<8x16xf32> to vector<8x16xbf16>
    %c16 = arith.constant 16 : index
    %c0_370 = arith.constant 0 : index
    %c0_371 = arith.constant 0 : index
    %564 = vector.load %arg1[%c16, %c0_370, %c0_371] : memref<21x16x32xbf16, #tpu.memory_space<vmem>>, vector<1x16x32xbf16>
    %565 = vector.shape_cast %564 : vector<1x16x32xbf16> to vector<16x32xbf16>
    %cst_372 = arith.constant dense<0.000000e+00> : vector<8x32xf32>
    %566 = tpu.matmul %563, %565, %cst_372 {dimension_numbers = #tpu.dot_dimension_numbers<[1], [0], [0], [1], [0, 0, 1, 1], [], []>} : vector<8x16xbf16>, vector<16x32xbf16>, vector<8x32xf32> -> vector<8x32xf32>
    %c16_373 = arith.constant 16 : index
    %c0_374 = arith.constant 0 : index
    %c0_375 = arith.constant 0 : index
    %567 = vector.load %arg2[%c16_373, %c0_374, %c0_375] : memref<21x1x32xf32, #tpu.memory_space<vmem>>, vector<1x1x32xf32>
    %568 = vector.shape_cast %567 : vector<1x1x32xf32> to vector<1x32xf32>
    %569 = vector.broadcast %568 : vector<1x32xf32> to vector<8x32xf32>
    %570 = arith.addf %566, %569 : vector<8x32xf32>
    %cst_376 = arith.constant 1.000000e-01 : f32
    %571 = vector.broadcast %cst_376 : f32 to vector<8x32xf32>
    %572 = arith.mulf %571, %570 : vector<8x32xf32>
    %573 = arith.maximumf %570, %572 : vector<8x32xf32>
    %574 = arith.truncf %573 : vector<8x32xf32> to vector<8x32xbf16>
    %c16_377 = arith.constant 16 : index
    %c0_378 = arith.constant 0 : index
    %c0_379 = arith.constant 0 : index
    %575 = vector.load %arg3[%c16_377, %c0_378, %c0_379] : memref<21x32x32xbf16, #tpu.memory_space<vmem>>, vector<1x32x32xbf16>
    %576 = vector.shape_cast %575 : vector<1x32x32xbf16> to vector<32x32xbf16>
    %cst_380 = arith.constant dense<0.000000e+00> : vector<8x32xf32>
    %577 = tpu.matmul %574, %576, %cst_380 {dimension_numbers = #tpu.dot_dimension_numbers<[1], [0], [0], [1], [0, 0, 1, 1], [], []>} : vector<8x32xbf16>, vector<32x32xbf16>, vector<8x32xf32> -> vector<8x32xf32>
    %c16_381 = arith.constant 16 : index
    %c0_382 = arith.constant 0 : index
    %c0_383 = arith.constant 0 : index
    %578 = vector.load %arg4[%c16_381, %c0_382, %c0_383] : memref<21x1x32xf32, #tpu.memory_space<vmem>>, vector<1x1x32xf32>
    %579 = vector.shape_cast %578 : vector<1x1x32xf32> to vector<1x32xf32>
    %580 = vector.broadcast %579 : vector<1x32xf32> to vector<8x32xf32>
    %581 = arith.addf %577, %580 : vector<8x32xf32>
    %cst_384 = arith.constant 1.000000e-01 : f32
    %582 = vector.broadcast %cst_384 : f32 to vector<8x32xf32>
    %583 = arith.mulf %582, %581 : vector<8x32xf32>
    %584 = arith.maximumf %581, %583 : vector<8x32xf32>
    %585 = arith.truncf %584 : vector<8x32xf32> to vector<8x32xbf16>
    %c16_385 = arith.constant 16 : index
    %c0_386 = arith.constant 0 : index
    %c0_387 = arith.constant 0 : index
    %586 = vector.load %arg5[%c16_385, %c0_386, %c0_387] : memref<21x32x16xbf16, #tpu.memory_space<vmem>>, vector<1x32x16xbf16>
    %587 = vector.shape_cast %586 : vector<1x32x16xbf16> to vector<32x16xbf16>
    %cst_388 = arith.constant dense<0.000000e+00> : vector<8x16xf32>
    %588 = tpu.matmul %585, %587, %cst_388 {dimension_numbers = #tpu.dot_dimension_numbers<[1], [0], [0], [1], [0, 0, 1, 1], [], []>} : vector<8x32xbf16>, vector<32x16xbf16>, vector<8x16xf32> -> vector<8x16xf32>
    %c16_389 = arith.constant 16 : index
    %c0_390 = arith.constant 0 : index
    %c0_391 = arith.constant 0 : index
    %589 = vector.load %arg6[%c16_389, %c0_390, %c0_391] : memref<21x1x16xf32, #tpu.memory_space<vmem>>, vector<1x1x16xf32>
    %590 = vector.shape_cast %589 : vector<1x1x16xf32> to vector<1x16xf32>
    %591 = vector.broadcast %590 : vector<1x16xf32> to vector<8x16xf32>
    %592 = arith.addf %588, %591 : vector<8x16xf32>
    %cst_392 = arith.constant 1.000000e-01 : f32
    %593 = vector.broadcast %cst_392 : f32 to vector<8x16xf32>
    %594 = arith.mulf %593, %592 : vector<8x16xf32>
    %595 = arith.maximumf %592, %594 : vector<8x16xf32>
    %596 = vector.extract_strided_slice %0 {offsets = [0, 17, 0], sizes = [8, 1, 16], strides = [1, 1, 1]} : vector<8x21x16xf32> to vector<8x1x16xf32>
    %597 = vector.shape_cast %596 : vector<8x1x16xf32> to vector<8x16xf32>
    %598 = arith.truncf %597 : vector<8x16xf32> to vector<8x16xbf16>
    %c17 = arith.constant 17 : index
    %c0_393 = arith.constant 0 : index
    %c0_394 = arith.constant 0 : index
    %599 = vector.load %arg1[%c17, %c0_393, %c0_394] : memref<21x16x32xbf16, #tpu.memory_space<vmem>>, vector<1x16x32xbf16>
    %600 = vector.shape_cast %599 : vector<1x16x32xbf16> to vector<16x32xbf16>
    %cst_395 = arith.constant dense<0.000000e+00> : vector<8x32xf32>
    %601 = tpu.matmul %598, %600, %cst_395 {dimension_numbers = #tpu.dot_dimension_numbers<[1], [0], [0], [1], [0, 0, 1, 1], [], []>} : vector<8x16xbf16>, vector<16x32xbf16>, vector<8x32xf32> -> vector<8x32xf32>
    %c17_396 = arith.constant 17 : index
    %c0_397 = arith.constant 0 : index
    %c0_398 = arith.constant 0 : index
    %602 = vector.load %arg2[%c17_396, %c0_397, %c0_398] : memref<21x1x32xf32, #tpu.memory_space<vmem>>, vector<1x1x32xf32>
    %603 = vector.shape_cast %602 : vector<1x1x32xf32> to vector<1x32xf32>
    %604 = vector.broadcast %603 : vector<1x32xf32> to vector<8x32xf32>
    %605 = arith.addf %601, %604 : vector<8x32xf32>
    %cst_399 = arith.constant 1.000000e-01 : f32
    %606 = vector.broadcast %cst_399 : f32 to vector<8x32xf32>
    %607 = arith.mulf %606, %605 : vector<8x32xf32>
    %608 = arith.maximumf %605, %607 : vector<8x32xf32>
    %609 = arith.truncf %608 : vector<8x32xf32> to vector<8x32xbf16>
    %c17_400 = arith.constant 17 : index
    %c0_401 = arith.constant 0 : index
    %c0_402 = arith.constant 0 : index
    %610 = vector.load %arg3[%c17_400, %c0_401, %c0_402] : memref<21x32x32xbf16, #tpu.memory_space<vmem>>, vector<1x32x32xbf16>
    %611 = vector.shape_cast %610 : vector<1x32x32xbf16> to vector<32x32xbf16>
    %cst_403 = arith.constant dense<0.000000e+00> : vector<8x32xf32>
    %612 = tpu.matmul %609, %611, %cst_403 {dimension_numbers = #tpu.dot_dimension_numbers<[1], [0], [0], [1], [0, 0, 1, 1], [], []>} : vector<8x32xbf16>, vector<32x32xbf16>, vector<8x32xf32> -> vector<8x32xf32>
    %c17_404 = arith.constant 17 : index
    %c0_405 = arith.constant 0 : index
    %c0_406 = arith.constant 0 : index
    %613 = vector.load %arg4[%c17_404, %c0_405, %c0_406] : memref<21x1x32xf32, #tpu.memory_space<vmem>>, vector<1x1x32xf32>
    %614 = vector.shape_cast %613 : vector<1x1x32xf32> to vector<1x32xf32>
    %615 = vector.broadcast %614 : vector<1x32xf32> to vector<8x32xf32>
    %616 = arith.addf %612, %615 : vector<8x32xf32>
    %cst_407 = arith.constant 1.000000e-01 : f32
    %617 = vector.broadcast %cst_407 : f32 to vector<8x32xf32>
    %618 = arith.mulf %617, %616 : vector<8x32xf32>
    %619 = arith.maximumf %616, %618 : vector<8x32xf32>
    %620 = arith.truncf %619 : vector<8x32xf32> to vector<8x32xbf16>
    %c17_408 = arith.constant 17 : index
    %c0_409 = arith.constant 0 : index
    %c0_410 = arith.constant 0 : index
    %621 = vector.load %arg5[%c17_408, %c0_409, %c0_410] : memref<21x32x16xbf16, #tpu.memory_space<vmem>>, vector<1x32x16xbf16>
    %622 = vector.shape_cast %621 : vector<1x32x16xbf16> to vector<32x16xbf16>
    %cst_411 = arith.constant dense<0.000000e+00> : vector<8x16xf32>
    %623 = tpu.matmul %620, %622, %cst_411 {dimension_numbers = #tpu.dot_dimension_numbers<[1], [0], [0], [1], [0, 0, 1, 1], [], []>} : vector<8x32xbf16>, vector<32x16xbf16>, vector<8x16xf32> -> vector<8x16xf32>
    %c17_412 = arith.constant 17 : index
    %c0_413 = arith.constant 0 : index
    %c0_414 = arith.constant 0 : index
    %624 = vector.load %arg6[%c17_412, %c0_413, %c0_414] : memref<21x1x16xf32, #tpu.memory_space<vmem>>, vector<1x1x16xf32>
    %625 = vector.shape_cast %624 : vector<1x1x16xf32> to vector<1x16xf32>
    %626 = vector.broadcast %625 : vector<1x16xf32> to vector<8x16xf32>
    %627 = arith.addf %623, %626 : vector<8x16xf32>
    %cst_415 = arith.constant 1.000000e-01 : f32
    %628 = vector.broadcast %cst_415 : f32 to vector<8x16xf32>
    %629 = arith.mulf %628, %627 : vector<8x16xf32>
    %630 = arith.maximumf %627, %629 : vector<8x16xf32>
    %631 = vector.extract_strided_slice %0 {offsets = [0, 18, 0], sizes = [8, 1, 16], strides = [1, 1, 1]} : vector<8x21x16xf32> to vector<8x1x16xf32>
    %632 = vector.shape_cast %631 : vector<8x1x16xf32> to vector<8x16xf32>
    %633 = arith.truncf %632 : vector<8x16xf32> to vector<8x16xbf16>
    %c18 = arith.constant 18 : index
    %c0_416 = arith.constant 0 : index
    %c0_417 = arith.constant 0 : index
    %634 = vector.load %arg1[%c18, %c0_416, %c0_417] : memref<21x16x32xbf16, #tpu.memory_space<vmem>>, vector<1x16x32xbf16>
    %635 = vector.shape_cast %634 : vector<1x16x32xbf16> to vector<16x32xbf16>
    %cst_418 = arith.constant dense<0.000000e+00> : vector<8x32xf32>
    %636 = tpu.matmul %633, %635, %cst_418 {dimension_numbers = #tpu.dot_dimension_numbers<[1], [0], [0], [1], [0, 0, 1, 1], [], []>} : vector<8x16xbf16>, vector<16x32xbf16>, vector<8x32xf32> -> vector<8x32xf32>
    %c18_419 = arith.constant 18 : index
    %c0_420 = arith.constant 0 : index
    %c0_421 = arith.constant 0 : index
    %637 = vector.load %arg2[%c18_419, %c0_420, %c0_421] : memref<21x1x32xf32, #tpu.memory_space<vmem>>, vector<1x1x32xf32>
    %638 = vector.shape_cast %637 : vector<1x1x32xf32> to vector<1x32xf32>
    %639 = vector.broadcast %638 : vector<1x32xf32> to vector<8x32xf32>
    %640 = arith.addf %636, %639 : vector<8x32xf32>
    %cst_422 = arith.constant 1.000000e-01 : f32
    %641 = vector.broadcast %cst_422 : f32 to vector<8x32xf32>
    %642 = arith.mulf %641, %640 : vector<8x32xf32>
    %643 = arith.maximumf %640, %642 : vector<8x32xf32>
    %644 = arith.truncf %643 : vector<8x32xf32> to vector<8x32xbf16>
    %c18_423 = arith.constant 18 : index
    %c0_424 = arith.constant 0 : index
    %c0_425 = arith.constant 0 : index
    %645 = vector.load %arg3[%c18_423, %c0_424, %c0_425] : memref<21x32x32xbf16, #tpu.memory_space<vmem>>, vector<1x32x32xbf16>
    %646 = vector.shape_cast %645 : vector<1x32x32xbf16> to vector<32x32xbf16>
    %cst_426 = arith.constant dense<0.000000e+00> : vector<8x32xf32>
    %647 = tpu.matmul %644, %646, %cst_426 {dimension_numbers = #tpu.dot_dimension_numbers<[1], [0], [0], [1], [0, 0, 1, 1], [], []>} : vector<8x32xbf16>, vector<32x32xbf16>, vector<8x32xf32> -> vector<8x32xf32>
    %c18_427 = arith.constant 18 : index
    %c0_428 = arith.constant 0 : index
    %c0_429 = arith.constant 0 : index
    %648 = vector.load %arg4[%c18_427, %c0_428, %c0_429] : memref<21x1x32xf32, #tpu.memory_space<vmem>>, vector<1x1x32xf32>
    %649 = vector.shape_cast %648 : vector<1x1x32xf32> to vector<1x32xf32>
    %650 = vector.broadcast %649 : vector<1x32xf32> to vector<8x32xf32>
    %651 = arith.addf %647, %650 : vector<8x32xf32>
    %cst_430 = arith.constant 1.000000e-01 : f32
    %652 = vector.broadcast %cst_430 : f32 to vector<8x32xf32>
    %653 = arith.mulf %652, %651 : vector<8x32xf32>
    %654 = arith.maximumf %651, %653 : vector<8x32xf32>
    %655 = arith.truncf %654 : vector<8x32xf32> to vector<8x32xbf16>
    %c18_431 = arith.constant 18 : index
    %c0_432 = arith.constant 0 : index
    %c0_433 = arith.constant 0 : index
    %656 = vector.load %arg5[%c18_431, %c0_432, %c0_433] : memref<21x32x16xbf16, #tpu.memory_space<vmem>>, vector<1x32x16xbf16>
    %657 = vector.shape_cast %656 : vector<1x32x16xbf16> to vector<32x16xbf16>
    %cst_434 = arith.constant dense<0.000000e+00> : vector<8x16xf32>
    %658 = tpu.matmul %655, %657, %cst_434 {dimension_numbers = #tpu.dot_dimension_numbers<[1], [0], [0], [1], [0, 0, 1, 1], [], []>} : vector<8x32xbf16>, vector<32x16xbf16>, vector<8x16xf32> -> vector<8x16xf32>
    %c18_435 = arith.constant 18 : index
    %c0_436 = arith.constant 0 : index
    %c0_437 = arith.constant 0 : index
    %659 = vector.load %arg6[%c18_435, %c0_436, %c0_437] : memref<21x1x16xf32, #tpu.memory_space<vmem>>, vector<1x1x16xf32>
    %660 = vector.shape_cast %659 : vector<1x1x16xf32> to vector<1x16xf32>
    %661 = vector.broadcast %660 : vector<1x16xf32> to vector<8x16xf32>
    %662 = arith.addf %658, %661 : vector<8x16xf32>
    %cst_438 = arith.constant 1.000000e-01 : f32
    %663 = vector.broadcast %cst_438 : f32 to vector<8x16xf32>
    %664 = arith.mulf %663, %662 : vector<8x16xf32>
    %665 = arith.maximumf %662, %664 : vector<8x16xf32>
    %666 = vector.extract_strided_slice %0 {offsets = [0, 19, 0], sizes = [8, 1, 16], strides = [1, 1, 1]} : vector<8x21x16xf32> to vector<8x1x16xf32>
    %667 = vector.shape_cast %666 : vector<8x1x16xf32> to vector<8x16xf32>
    %668 = arith.truncf %667 : vector<8x16xf32> to vector<8x16xbf16>
    %c19 = arith.constant 19 : index
    %c0_439 = arith.constant 0 : index
    %c0_440 = arith.constant 0 : index
    %669 = vector.load %arg1[%c19, %c0_439, %c0_440] : memref<21x16x32xbf16, #tpu.memory_space<vmem>>, vector<1x16x32xbf16>
    %670 = vector.shape_cast %669 : vector<1x16x32xbf16> to vector<16x32xbf16>
    %cst_441 = arith.constant dense<0.000000e+00> : vector<8x32xf32>
    %671 = tpu.matmul %668, %670, %cst_441 {dimension_numbers = #tpu.dot_dimension_numbers<[1], [0], [0], [1], [0, 0, 1, 1], [], []>} : vector<8x16xbf16>, vector<16x32xbf16>, vector<8x32xf32> -> vector<8x32xf32>
    %c19_442 = arith.constant 19 : index
    %c0_443 = arith.constant 0 : index
    %c0_444 = arith.constant 0 : index
    %672 = vector.load %arg2[%c19_442, %c0_443, %c0_444] : memref<21x1x32xf32, #tpu.memory_space<vmem>>, vector<1x1x32xf32>
    %673 = vector.shape_cast %672 : vector<1x1x32xf32> to vector<1x32xf32>
    %674 = vector.broadcast %673 : vector<1x32xf32> to vector<8x32xf32>
    %675 = arith.addf %671, %674 : vector<8x32xf32>
    %cst_445 = arith.constant 1.000000e-01 : f32
    %676 = vector.broadcast %cst_445 : f32 to vector<8x32xf32>
    %677 = arith.mulf %676, %675 : vector<8x32xf32>
    %678 = arith.maximumf %675, %677 : vector<8x32xf32>
    %679 = arith.truncf %678 : vector<8x32xf32> to vector<8x32xbf16>
    %c19_446 = arith.constant 19 : index
    %c0_447 = arith.constant 0 : index
    %c0_448 = arith.constant 0 : index
    %680 = vector.load %arg3[%c19_446, %c0_447, %c0_448] : memref<21x32x32xbf16, #tpu.memory_space<vmem>>, vector<1x32x32xbf16>
    %681 = vector.shape_cast %680 : vector<1x32x32xbf16> to vector<32x32xbf16>
    %cst_449 = arith.constant dense<0.000000e+00> : vector<8x32xf32>
    %682 = tpu.matmul %679, %681, %cst_449 {dimension_numbers = #tpu.dot_dimension_numbers<[1], [0], [0], [1], [0, 0, 1, 1], [], []>} : vector<8x32xbf16>, vector<32x32xbf16>, vector<8x32xf32> -> vector<8x32xf32>
    %c19_450 = arith.constant 19 : index
    %c0_451 = arith.constant 0 : index
    %c0_452 = arith.constant 0 : index
    %683 = vector.load %arg4[%c19_450, %c0_451, %c0_452] : memref<21x1x32xf32, #tpu.memory_space<vmem>>, vector<1x1x32xf32>
    %684 = vector.shape_cast %683 : vector<1x1x32xf32> to vector<1x32xf32>
    %685 = vector.broadcast %684 : vector<1x32xf32> to vector<8x32xf32>
    %686 = arith.addf %682, %685 : vector<8x32xf32>
    %cst_453 = arith.constant 1.000000e-01 : f32
    %687 = vector.broadcast %cst_453 : f32 to vector<8x32xf32>
    %688 = arith.mulf %687, %686 : vector<8x32xf32>
    %689 = arith.maximumf %686, %688 : vector<8x32xf32>
    %690 = arith.truncf %689 : vector<8x32xf32> to vector<8x32xbf16>
    %c19_454 = arith.constant 19 : index
    %c0_455 = arith.constant 0 : index
    %c0_456 = arith.constant 0 : index
    %691 = vector.load %arg5[%c19_454, %c0_455, %c0_456] : memref<21x32x16xbf16, #tpu.memory_space<vmem>>, vector<1x32x16xbf16>
    %692 = vector.shape_cast %691 : vector<1x32x16xbf16> to vector<32x16xbf16>
    %cst_457 = arith.constant dense<0.000000e+00> : vector<8x16xf32>
    %693 = tpu.matmul %690, %692, %cst_457 {dimension_numbers = #tpu.dot_dimension_numbers<[1], [0], [0], [1], [0, 0, 1, 1], [], []>} : vector<8x32xbf16>, vector<32x16xbf16>, vector<8x16xf32> -> vector<8x16xf32>
    %c19_458 = arith.constant 19 : index
    %c0_459 = arith.constant 0 : index
    %c0_460 = arith.constant 0 : index
    %694 = vector.load %arg6[%c19_458, %c0_459, %c0_460] : memref<21x1x16xf32, #tpu.memory_space<vmem>>, vector<1x1x16xf32>
    %695 = vector.shape_cast %694 : vector<1x1x16xf32> to vector<1x16xf32>
    %696 = vector.broadcast %695 : vector<1x16xf32> to vector<8x16xf32>
    %697 = arith.addf %693, %696 : vector<8x16xf32>
    %cst_461 = arith.constant 1.000000e-01 : f32
    %698 = vector.broadcast %cst_461 : f32 to vector<8x16xf32>
    %699 = arith.mulf %698, %697 : vector<8x16xf32>
    %700 = arith.maximumf %697, %699 : vector<8x16xf32>
    %701 = vector.extract_strided_slice %0 {offsets = [0, 20, 0], sizes = [8, 1, 16], strides = [1, 1, 1]} : vector<8x21x16xf32> to vector<8x1x16xf32>
    %702 = vector.shape_cast %701 : vector<8x1x16xf32> to vector<8x16xf32>
    %703 = arith.truncf %702 : vector<8x16xf32> to vector<8x16xbf16>
    %c20 = arith.constant 20 : index
    %c0_462 = arith.constant 0 : index
    %c0_463 = arith.constant 0 : index
    %704 = vector.load %arg1[%c20, %c0_462, %c0_463] : memref<21x16x32xbf16, #tpu.memory_space<vmem>>, vector<1x16x32xbf16>
    %705 = vector.shape_cast %704 : vector<1x16x32xbf16> to vector<16x32xbf16>
    %cst_464 = arith.constant dense<0.000000e+00> : vector<8x32xf32>
    %706 = tpu.matmul %703, %705, %cst_464 {dimension_numbers = #tpu.dot_dimension_numbers<[1], [0], [0], [1], [0, 0, 1, 1], [], []>} : vector<8x16xbf16>, vector<16x32xbf16>, vector<8x32xf32> -> vector<8x32xf32>
    %c20_465 = arith.constant 20 : index
    %c0_466 = arith.constant 0 : index
    %c0_467 = arith.constant 0 : index
    %707 = vector.load %arg2[%c20_465, %c0_466, %c0_467] : memref<21x1x32xf32, #tpu.memory_space<vmem>>, vector<1x1x32xf32>
    %708 = vector.shape_cast %707 : vector<1x1x32xf32> to vector<1x32xf32>
    %709 = vector.broadcast %708 : vector<1x32xf32> to vector<8x32xf32>
    %710 = arith.addf %706, %709 : vector<8x32xf32>
    %cst_468 = arith.constant 1.000000e-01 : f32
    %711 = vector.broadcast %cst_468 : f32 to vector<8x32xf32>
    %712 = arith.mulf %711, %710 : vector<8x32xf32>
    %713 = arith.maximumf %710, %712 : vector<8x32xf32>
    %714 = arith.truncf %713 : vector<8x32xf32> to vector<8x32xbf16>
    %c20_469 = arith.constant 20 : index
    %c0_470 = arith.constant 0 : index
    %c0_471 = arith.constant 0 : index
    %715 = vector.load %arg3[%c20_469, %c0_470, %c0_471] : memref<21x32x32xbf16, #tpu.memory_space<vmem>>, vector<1x32x32xbf16>
    %716 = vector.shape_cast %715 : vector<1x32x32xbf16> to vector<32x32xbf16>
    %cst_472 = arith.constant dense<0.000000e+00> : vector<8x32xf32>
    %717 = tpu.matmul %714, %716, %cst_472 {dimension_numbers = #tpu.dot_dimension_numbers<[1], [0], [0], [1], [0, 0, 1, 1], [], []>} : vector<8x32xbf16>, vector<32x32xbf16>, vector<8x32xf32> -> vector<8x32xf32>
    %c20_473 = arith.constant 20 : index
    %c0_474 = arith.constant 0 : index
    %c0_475 = arith.constant 0 : index
    %718 = vector.load %arg4[%c20_473, %c0_474, %c0_475] : memref<21x1x32xf32, #tpu.memory_space<vmem>>, vector<1x1x32xf32>
    %719 = vector.shape_cast %718 : vector<1x1x32xf32> to vector<1x32xf32>
    %720 = vector.broadcast %719 : vector<1x32xf32> to vector<8x32xf32>
    %721 = arith.addf %717, %720 : vector<8x32xf32>
    %cst_476 = arith.constant 1.000000e-01 : f32
    %722 = vector.broadcast %cst_476 : f32 to vector<8x32xf32>
    %723 = arith.mulf %722, %721 : vector<8x32xf32>
    %724 = arith.maximumf %721, %723 : vector<8x32xf32>
    %725 = arith.truncf %724 : vector<8x32xf32> to vector<8x32xbf16>
    %c20_477 = arith.constant 20 : index
    %c0_478 = arith.constant 0 : index
    %c0_479 = arith.constant 0 : index
    %726 = vector.load %arg5[%c20_477, %c0_478, %c0_479] : memref<21x32x16xbf16, #tpu.memory_space<vmem>>, vector<1x32x16xbf16>
    %727 = vector.shape_cast %726 : vector<1x32x16xbf16> to vector<32x16xbf16>
    %cst_480 = arith.constant dense<0.000000e+00> : vector<8x16xf32>
    %728 = tpu.matmul %725, %727, %cst_480 {dimension_numbers = #tpu.dot_dimension_numbers<[1], [0], [0], [1], [0, 0, 1, 1], [], []>} : vector<8x32xbf16>, vector<32x16xbf16>, vector<8x16xf32> -> vector<8x16xf32>
    %c20_481 = arith.constant 20 : index
    %c0_482 = arith.constant 0 : index
    %c0_483 = arith.constant 0 : index
    %729 = vector.load %arg6[%c20_481, %c0_482, %c0_483] : memref<21x1x16xf32, #tpu.memory_space<vmem>>, vector<1x1x16xf32>
    %730 = vector.shape_cast %729 : vector<1x1x16xf32> to vector<1x16xf32>
    %731 = vector.broadcast %730 : vector<1x16xf32> to vector<8x16xf32>
    %732 = arith.addf %728, %731 : vector<8x16xf32>
    %cst_484 = arith.constant 1.000000e-01 : f32
    %733 = vector.broadcast %cst_484 : f32 to vector<8x16xf32>
    %734 = arith.mulf %733, %732 : vector<8x16xf32>
    %735 = arith.maximumf %732, %734 : vector<8x16xf32>
    %736 = vector.shape_cast %35 : vector<8x16xf32> to vector<8x1x16xf32>
    %737 = vector.shape_cast %70 : vector<8x16xf32> to vector<8x1x16xf32>
    %738 = vector.shape_cast %105 : vector<8x16xf32> to vector<8x1x16xf32>
    %739 = vector.shape_cast %140 : vector<8x16xf32> to vector<8x1x16xf32>
    %740 = vector.shape_cast %175 : vector<8x16xf32> to vector<8x1x16xf32>
    %741 = vector.shape_cast %210 : vector<8x16xf32> to vector<8x1x16xf32>
    %742 = vector.shape_cast %245 : vector<8x16xf32> to vector<8x1x16xf32>
    %743 = vector.shape_cast %280 : vector<8x16xf32> to vector<8x1x16xf32>
    %744 = vector.shape_cast %315 : vector<8x16xf32> to vector<8x1x16xf32>
    %745 = vector.shape_cast %350 : vector<8x16xf32> to vector<8x1x16xf32>
    %746 = vector.shape_cast %385 : vector<8x16xf32> to vector<8x1x16xf32>
    %747 = vector.shape_cast %420 : vector<8x16xf32> to vector<8x1x16xf32>
    %748 = vector.shape_cast %455 : vector<8x16xf32> to vector<8x1x16xf32>
    %749 = vector.shape_cast %490 : vector<8x16xf32> to vector<8x1x16xf32>
    %750 = vector.shape_cast %525 : vector<8x16xf32> to vector<8x1x16xf32>
    %751 = vector.shape_cast %560 : vector<8x16xf32> to vector<8x1x16xf32>
    %752 = vector.shape_cast %595 : vector<8x16xf32> to vector<8x1x16xf32>
    %753 = vector.shape_cast %630 : vector<8x16xf32> to vector<8x1x16xf32>
    %754 = vector.shape_cast %665 : vector<8x16xf32> to vector<8x1x16xf32>
    %755 = vector.shape_cast %700 : vector<8x16xf32> to vector<8x1x16xf32>
    %756 = vector.shape_cast %735 : vector<8x16xf32> to vector<8x1x16xf32>
    %757 = tpu.concatenate %736, %737, %738, %739, %740, %741, %742, %743, %744, %745, %746, %747, %748, %749, %750, %751 in 1 : vector<8x1x16xf32>, vector<8x1x16xf32>, vector<8x1x16xf32>, vector<8x1x16xf32>, vector<8x1x16xf32>, vector<8x1x16xf32>, vector<8x1x16xf32>, vector<8x1x16xf32>, vector<8x1x16xf32>, vector<8x1x16xf32>, vector<8x1x16xf32>, vector<8x1x16xf32>, vector<8x1x16xf32>, vector<8x1x16xf32>, vector<8x1x16xf32>, vector<8x1x16xf32> -> vector<8x16x16xf32>
    %758 = tpu.concatenate %752, %753, %754, %755, %756 in 1 : vector<8x1x16xf32>, vector<8x1x16xf32>, vector<8x1x16xf32>, vector<8x1x16xf32>, vector<8x1x16xf32> -> vector<8x5x16xf32>
    %759 = tpu.concatenate %757, %758 in 1 : vector<8x16x16xf32>, vector<8x5x16xf32> -> vector<8x21x16xf32>
    %c0_485 = arith.constant 0 : index
    %c0_486 = arith.constant 0 : index
    %c0_487 = arith.constant 0 : index
    %760 = vector.load %arg7[%c0_485, %c0_486, %c0_487] : memref<8x21x16xf32, #tpu.memory_space<vmem>>, vector<8x21x16xf32>
    tpu.vector_store %arg7[%c0_485, %c0_486, %c0_487], %759 {strides = array<i32>} : memref<8x21x16xf32, #tpu.memory_space<vmem>>, vector<8x21x16xf32>,
    return
  }
}

</mosaic_0001>

<bundles_post_ra>
// kernel: structured_mlp_coder.1
= control target key start
LH: loop header
LB: loop body
LE: loop exit
PB: predicated region body
PF: predicated region fallthrough
CT: control target
= control target key end

     0   :  { %vm85_vm0 = vcmask 1041409   ;;  %v7928_v0 = vmov 0.0   ;;  %vm7929_vm1 = vmmov 0   ;;  %vm88_vm2 = vcmask 1042434   ;;  %s10054_s1 = inlined_call_operand.vmem [shape: bf16[21,16,32], index: 1, kind: input, shape index: {}]   ;;  %s10055_s0 = inlined_call_operand.vmem [shape: f32[8,21,16], index: 0, kind: input, shape index: {}]   ;;  %s10056_s3 = inlined_call_operand.vmem [shape: bf16[21,32,32], index: 3, kind: input, shape index: {}]   ;;  %s10057_s2 = inlined_call_operand.vmem [shape: f32[21,1,32], index: 2, kind: input, shape index: {}]   ;;  %s10058_s5 = inlined_call_operand.vmem [shape: bf16[21,32,16], index: 5, kind: input, shape index: {}]   ;;  %s10059_s4 = inlined_call_operand.vmem [shape: f32[21,1,32], index: 4, kind: input, shape index: {}]   ;;  %s10060_s6 = inlined_call_operand.vmem [shape: f32[21,1,16], index: 6, kind: input, shape index: {}]   ;;  %s10061_s7 = inlined_call_operand.vmem [shape: f32[8,21,16], index: 7, kind: output, shape index: {}]  }
   0x1   :  { %7358 = vmatprep.subr.bf16.mxu0 %v7928_v0  ;;  %v7823_v1 = vld [vmem:[%s10054_s1] sm:$0xff]   ;;  %7360 = vmatprep.mubr.msk.bf16.mxu0 %vm7929_vm1, %v7928_v0  ;;  %v30_v3 = vld [vmem:[%s10055_s0 + $0x18] sm:$0xff]  ;;  %v33_v4 = vld [vmem:[%s10055_s0 + $0x30] sm:$0xff]  ;;  %vm91_vm3 = vcmask 1043459   ;;  %vm94_vm4 = vcmask 1044484   ;;  %vm97_vm5 = vcmask 1045509  }
   0x2   :  { %v27_v2 = vld [vmem:[%s10055_s0] sm:$0xff]  ;;  %7364 = vmatprep.subr.bf16.mxu1 %v7928_v0  ;;  %7368 = vmatprep.mubr.msk.bf16.mxu1 %vm7929_vm1, %v7928_v0  ;;  %v36_v5 = vld [vmem:[%s10055_s0 + $0x48] sm:$0xff]  ;;  %v42_v7 = vld [vmem:[%s10055_s0 + $0x78] sm:$0xff]  ;;  %v52_v9 = vpack.c.bf16 %v30_v3, %v30_v3  ;;  %v53_v10 = vpack.c.bf16 %v33_v4, %v33_v4  ;;  %vm100_vm6 = vcmask 1046534   ;;  %vm103_vm7 = vcmask 1047559  }
   0x3   :  { %7359 = vmatpush3.bf16.msra.mxu0 %v7823_v1  ;;  %v39_v6 = vld [vmem:[%s10055_s0 + $0x60] sm:$0xff]  ;;  %v51_v8 = vpack.c.bf16 %v27_v2, %v27_v2  ;;  %v45_v11 = vld [vmem:[%s10055_s0 + $0x90] sm:$0xff]  ;;  %v48_v12 = vld [vmem:[%s10055_s0 + $0xa8] sm:$0xff]  ;;  %v54_v13 = vpack.c.bf16 %v36_v5, %v36_v5  ;;  %v56_v15 = vpack.c.bf16 %v42_v7, %v42_v7  ;;  %vm112_vm8 = vcmask 130048  }
   0x4   :  { %v55_v14 = vpack.c.bf16 %v39_v6, %v39_v6  ;;  %7372 = vmatprep.subr.bf16.mxu0 %v7928_v0  ;;  %v57_v16 = vpack.c.bf16 %v45_v11, %v45_v11  ;;  %v58_v17 = vpack.c.bf16 %v48_v12, %v48_v12  ;;  %v8007_v19 = vunpack.c.l.b16 %v52_v9  ;;  %v7824_v41 = vld [vmem:[%s10056_s3 + $0x8] sm:$0xff]   ;;  %v7825_v42 = vld [vmem:[%s10056_s3] sm:$0xff]  }
   0x5   :  { %v8005_v18 = vunpack.c.l.b16 %v51_v8  ;;  %v8009_v20 = vunpack.c.l.b16 %v53_v10  ;;  %v8011_v21 = vunpack.c.l.b16 %v54_v13  ;;  %v8015_v23 = vunpack.c.l.b16 %v56_v15  ;;  %7365 = vmatpush3.bf16.msra.mxu1 %v7824_v41  ;;  %v6699_v49 = vld [vmem:[%s10057_s2] ss:$0 sm:$0xff]  ;;  %v7826_v62 = vld [vmem:[%s10054_s1 + $0x8] sm:$0xff]  }
   0x6   :  { %v8013_v22 = vunpack.c.l.b16 %v55_v14  ;;  %v8017_v24 = vunpack.c.l.b16 %v57_v16  ;;  %v8019_v25 = vunpack.c.l.b16 %v58_v17  ;;  %v84_v26 = vrot.slane %v8007_v19, 7  ;;  %7366 = vmatprep.subr.bf16.mxu1 %v7928_v0  ;;  %v7827_v5 = vld [vmem:[%s10058_s5 + $0x8] sm:$0xff]   ;;  %v7828_v6 = vld [vmem:[%s10058_s5] sm:$0xff]  }
   0x7   :  { %v87_v27 = vrot.slane %v8009_v20, 6  ;;  %v90_v28 = vrot.slane %v8011_v21, 5  ;;  %v96_v30 = vrot.slane %v8015_v23, 3  ;;  %v308_v43 = vrot.slane %v8005_v18, 1  ;;  %v6702_v9 = vld [vmem:[%s10059_s4] ss:$0 sm:$0xff] }
   0x8   :  { %v93_v29 = vrot.slane %v8013_v22, 4  ;;  %v86_v31 = vsel %vm85_vm0, %v84_v26, %v8005_v18  ;;  %v99_v32 = vrot.slane %v8017_v24, 2  ;;  %v102_v33 = vrot.slane %v8019_v25, 1 }
   0x9   :  { %v89_v34 = vsel %vm88_vm2, %v87_v27, %v86_v31  ;;  %7367 = vmatpush3.bf16.msra.mxu1 %v7825_v42  ;;  %v310_v44 = vrot.slane %v8009_v20, 7  ;;  %v309_v45 = vsel %vm85_vm0, %v8007_v19, %v308_v43  ;;  %v312_v46 = vrot.slane %v8011_v21, 6 }
   0xa   :  { %v92_v35 = vsel %vm91_vm3, %v90_v28, %v89_v34  ;;  %7380 = vmatprep.subr.bf16.mxu1 %v7928_v0  ;;  %v314_v48 = vrot.slane %v8013_v22, 5  ;;  %v316_v52 = vrot.slane %v8015_v23, 4  ;;  %v318_v57 = vrot.slane %v8017_v24, 3 }
   0xb   :  { %v95_v36 = vsel %vm94_vm4, %v93_v29, %v92_v35  ;;  %v311_v47 = vsel %vm88_vm2, %v310_v44, %v309_v45  ;;  %vm182_vm9 = vcmask 261120   ;;  %v320_v63 = vrot.slane %v8019_v25, 2  ;;  %v6713_v29 = vld [vmem:[%s10057_s2 + $0x1] ss:$0 sm:$0xff]  ;;  %v7831_v45 = vld [vmem:[%s10054_s1 + $0x10] sm:$0xff]  }
   0xc   :  { %v98_v37 = vsel %vm97_vm5, %v96_v30, %v95_v36  ;;  %v313_v50 = vsel %vm91_vm3, %v312_v46, %v311_v47  ;;  %v527_v7 = vrot.slane %v8005_v18, 2  ;;  %v528_v8 = vrot.slane %v8007_v19, 1  ;;  %v7829_v30 = vld [vmem:[%s10056_s3 + $0x18] sm:$0xff]  }
   0xd   :  { %v101_v38 = vsel %vm100_vm6, %v99_v32, %v98_v37  ;;  %v315_v54 = vsel %vm94_vm4, %v314_v48, %v313_v50  ;;  %v531_v14 = vrot.slane %v8011_v21, 7  ;;  %v533_v27 = vrot.slane %v8013_v22, 6 }
   0xe   :  { %v104_v39 = vsel %vm103_vm7, %v102_v33, %v101_v38  ;;  %v317_v59 = vsel %vm97_vm5, %v316_v52, %v315_v54  ;;  %v529_v11 = vsel %vm85_vm0, %v528_v8, %v527_v7  ;;  %v535_v34 = vrot.slane %v8015_v23, 5  ;;  %v7830_v38 = vld [vmem:[%s10056_s3 + $0x10] sm:$0xff]   ;;  %v6737_v7 = vld [vmem:[%s10057_s2 + $0x2] ss:$0 sm:$0xff] }
   0xf   :  { %v105_v40 = vpack.c.b16 %v104_v39, %v104_v39  ;;  %v319_v2 = vsel %vm100_vm6, %v318_v57, %v317_v59  ;;  %v530_v16 = vsel %vm88_vm2, %v8009_v20, %v529_v11  ;;  %v539_v46 = vrot.slane %v8019_v25, 3  ;;  %v7833_v52 = vld [vmem:[%s10058_s5 + $0x10] sm:$0xff]   ;;  %v6721_v59 = vld [vmem:[%s10059_s4 + $0x1] ss:$0 sm:$0xff] }
  0x10   :  { %v321_v3 = vsel %vm103_vm7, %v320_v63, %v319_v2  ;;  %v532_v31 = vsel %vm91_vm3, %v531_v14, %v530_v16  ;;  %v747_v57 = vrot.slane %v8007_v19, 2  ;;  %v752_v8 = vrot.slane %v8013_v22, 7 }
  0x11   :  { %7361 = vmatmul.mubr.msk.bf16.vlgmr.msra.gmra.mxu0 %vm112_vm8, %v105_v40  ;;  %v322_v4 = vpack.c.b16 %v321_v3, %v321_v3  ;;  %v534_v36 = vsel %vm94_vm4, %v533_v27, %v532_v31  ;;  %v537_v40 = vrot.slane %v8017_v24, 4  ;;  %v754_v14 = vrot.slane %v8015_v23, 6 }
  0x12   :  { %7376 = vmatprep.mubr.msk.bf16.mxu0 %vm7929_vm1, %v7928_v0  ;;  %7373 = vmatpush3.bf16.msra.mxu0 %v7827_v5  ;;  %v536_v42 = vsel %vm97_vm5, %v535_v34, %v534_v36  ;;  %v758_v34 = vrot.slane %v8019_v25, 4  ;;  %vm10066_vm10 = vcmask 1040384   ;;  %vm10065_vm11 = vcmask 1041408  }
  0x13   :  { %7374 = vmatprep.subr.bf16.mxu0 %v7928_v0  ;;  %v538_v48 = vsel %vm100_vm6, %v537_v40, %v536_v42  ;;  %v6706_v40 = vld [vmem:[%s10060_s6] ss:$0 sm:$0xff]  ;;  %vm10064_vm12 = vcmask 1042432   ;;  %vm10063_vm13 = vcmask 1043456   ;;  %vm6395_vm14 = vcmask 1044480  }
  0x14   :  { %vm10062_vm15 = vcmask 1045504  }
  0x16   :  { %7375 = vmatpush3.bf16.msra.mxu0 %v7828_v6 }
  0x17   :  { %7386 = vmatprep.subr.bf16.mxu0 %v7928_v0 }
  0xd1   :  { %v150_v51 = vpop.f32.mrf.mxu0 }
  0xd2   :  { %v151_v53 = vadd.f32 %v6699_v49, %v150_v51  ;;  %v540_v49 = vsel %vm103_vm7, %v539_v46, %v538_v48  ;;  %v7832_v51 = vld [vmem:[%s10058_s5 + $0x18] sm:$0xff]  }
  0xd3   :  { %v7362_v55 = vpop.f32.mrf.mxu0  ;;  %v541_v50 = vpack.c.b16 %v540_v49, %v540_v49 }
  0xd4   :  { %v156_v56 = vmul.f32 0.1, %v151_v53 }
  0xd5   :  { %v153_v58 = vpop.f32.mrf.mxu0 }
  0xd6   :  { %v157_v60 = vmax.f32 %v151_v53, %v156_v56  ;;  %v746_v56 = vrot.slane %v8005_v18, 3 }
  0xd7   :  { %v7363_v61 = vpop.f32.mrf.mxu0 }
  0xd8   :  { %v158_v1 = vpack.c.bf16 %v157_v60, %v157_v60  ;;  %v749_v61 = vrot.slane %v8009_v20, 1  ;;  %v748_v63 = vsel %vm85_vm0, %v747_v57, %v746_v56  ;;  %v965_v56 = vrot.slane %v8005_v18, 4 }
  0xd9   :  { %v966_v57 = vrot.slane %v8007_v19, 3 }
  0xda   :  { %7369 = vmatmul.mubr.msk.bf16.vlgmr.msra.gmra.mxu1 %vm182_vm9, %v158_v1 }
  0xdb   :  { %7381 = vmatpush3.bf16.msra.mxu1 %v7826_v62  ;;  %7382 = vmatprep.mubr.msk.bf16.mxu1 %vm7929_vm1, %v7928_v0 }
  0xdc   :  { %7394 = vmatprep.subr.bf16.mxu1 %v7928_v0 }
  0xe2   :  { %7383 = vmatmul.mubr.msk.bf16.vlgmr.msra.gmra.mxu1 %vm112_vm8, %v322_v4  ;;  %v750_v4 = vsel %vm88_vm2, %v749_v61, %v748_v63 }
  0xe3   :  { %7398 = vmatprep.mubr.msk.bf16.mxu1 %vm7929_vm1, %v7928_v0  ;;  %7395 = vmatpush3.bf16.msra.mxu1 %v7832_v51 }
  0xe4   :  { %7396 = vmatprep.subr.bf16.mxu1 %v7928_v0 }
  0xe7   :  { %7397 = vmatpush3.bf16.msra.mxu1 %v7833_v52 }
  0xe8   :  { %7408 = vmatprep.subr.bf16.mxu1 %v7928_v0 }
 0x19a   :  { %v220_v10 = vpop.f32.mrf.mxu1 }
 0x19b   :  { %v221_v12 = vadd.f32 %v6702_v9, %v220_v10  ;;  %v7834_v9 = vld [vmem:[%s10056_s3 + $0x28] sm:$0xff]   ;;  %v751_v10 = vsel %vm91_vm3, %v8011_v21, %v750_v4 }
 0x19c   :  { %v7370_v13 = vpop.f32.mrf.mxu1  ;;  %v753_v16 = vsel %vm94_vm4, %v752_v8, %v751_v10  ;;  %v6745_v8 = vld [vmem:[%s10059_s4 + $0x2] ss:$0 sm:$0xff] }
 0x19d   :  { %v226_v15 = vmul.f32 0.1, %v221_v12 }
 0x19e   :  { %v223_v17 = vpop.f32.mrf.mxu1 }
 0x19f   :  { %v227_v26 = vmax.f32 %v221_v12, %v226_v15 }
 0x1a0   :  { %v7371_v28 = vpop.f32.mrf.mxu1 }
 0x1a1   :  { %v228_v32 = vpack.c.bf16 %v227_v26, %v227_v26  ;;  %v7835_v26 = vld [vmem:[%s10056_s3 + $0x20] sm:$0xff]   ;;  %v756_v28 = vrot.slane %v8017_v24, 5 }
 0x1a2   :  { %v366_v33 = vpop.f32.mrf.mxu1 }
 0x1a3   :  { %v367_v35 = vadd.f32 %v6713_v29, %v366_v33  ;;  %7377 = vmatmul.mubr.msk.bf16.vlgmr.msra.gmra.mxu0 %vm182_vm9, %v228_v32  ;;  %v7836_v33 = vld [vmem:[%s10054_s1 + $0x18] sm:$0xff]  }
 0x1a4   :  { %7387 = vmatpush3.bf16.msra.mxu0 %v7829_v30  ;;  %v7384_v37 = vpop.f32.mrf.mxu1  ;;  %7390 = vmatprep.mubr.msk.bf16.mxu0 %vm7929_vm1, %v7928_v0  ;;  %v755_v30 = vsel %vm97_vm5, %v754_v14, %v753_v16 }
 0x1a5   :  { %v372_v39 = vmul.f32 0.1, %v367_v35  ;;  %7388 = vmatprep.subr.bf16.mxu0 %v7928_v0 }
 0x1a6   :  { %v369_v41 = vpop.f32.mrf.mxu1 }
 0x1a7   :  { %v373_v43 = vmax.f32 %v367_v35, %v372_v39  ;;  %v757_v35 = vsel %vm100_vm6, %v756_v28, %v755_v30  ;;  %v7838_v39 = vld [vmem:[%s10058_s5 + $0x20] sm:$0xff]  }
 0x1a8   :  { %7389 = vmatpush3.bf16.msra.mxu0 %v7830_v38  ;;  %v7385_v44 = vpop.f32.mrf.mxu1  ;;  %v759_v36 = vsel %vm103_vm7, %v758_v34, %v757_v35  ;;  %v7837_v38 = vld [vmem:[%s10058_s5 + $0x28] sm:$0xff]  }
 0x1a9   :  { %v374_v47 = vpack.c.bf16 %v373_v43, %v373_v43  ;;  %7402 = vmatprep.subr.bf16.mxu0 %v7928_v0  ;;  %v760_v37 = vpack.c.b16 %v759_v36, %v759_v36  ;;  %v7930_v43 = vmov 1966171168  }
 0x1aa   :  { %v4728_v44 = vunpack.c.l.s4 %v7930_v43 }
 0x1ab   :  { %7391 = vmatmul.mubr.msk.bf16.vlgmr.msra.gmra.mxu0 %vm182_vm9, %v374_v47 }
 0x1ac   :  { %7403 = vmatpush3.bf16.msra.mxu0 %v7831_v45  ;;  %7404 = vmatprep.mubr.msk.bf16.mxu0 %vm7929_vm1, %v7928_v0  ;;  %v4730_v45 = vlaneseq  ;;  %v4729_v47 = vunpack.c.0.s8 %v4728_v44 }
 0x1ad   :  { %7416 = vmatprep.subr.bf16.mxu0 %v7928_v0 }
 0x1ae   :  { %v4731_v48 = vshrl.u32 %v4730_v45, 7 }
 0x1b3   :  { %7405 = vmatmul.mubr.msk.bf16.vlgmr.msra.gmra.mxu0 %vm112_vm8, %v541_v50  ;;  %v8186_v50 = vsub.s32 %v4729_v47, %v4731_v48 }
 0x1b4   :  { %7420 = vmatprep.mubr.msk.bf16.mxu0 %vm7929_vm1, %v7928_v0  ;;  %7417 = vmatpush3.bf16.msra.mxu0 %v7837_v38 }
 0x1b5   :  { %7418 = vmatprep.subr.bf16.mxu0 %v7928_v0 }
 0x1b8   :  { %7419 = vmatpush3.bf16.msra.mxu0 %v7838_v39 }
 0x1b9   :  { %7430 = vmatprep.subr.bf16.mxu0 %v7928_v0 }
 0x263   :  { %v289_v53 = vpop.f32.mrf.mxu0 }
 0x264   :  { %v290_v41 = vadd.f32 %v6706_v40, %v289_v53  ;;  %v973_v40 = vrot.slane %v8015_v23, 7 }
 0x265   :  { %v7378_v54 = vpop.f32.mrf.mxu0 }
 0x266   :  { %v295_v42 = vmul.f32 0.1, %v290_v41  ;;  %v6730_v54 = vld [vmem:[%s10060_s6 + $0x1] ss:$0 sm:$0xff] }
 0x267   :  { %v292_v55 = vpop.f32.mrf.mxu0 }
 0x268   :  { %v296_v46 = vmax.f32 %v290_v41, %v295_v42 }
 0x269   :  { %v7379_v58 = vpop.f32.mrf.mxu0 }
 0x26a   :  { %v4726_v49 = vcombine.high %v296_v46, %v296_v46  ;;  %v4733_v51 = vrot.slane %v296_v46, %v8186_v50 }
 0x26b   :  { %v437_v60 = vpop.f32.mrf.mxu0 }
 0x26c   :  { %v438_v62 = vadd.f32 %v6721_v59, %v437_v60  ;;  %v4740_v52 = vrot.slane %v4726_v49, %v8186_v50  ;;  %v4741_v58 = vcombine.high %v4733_v51, %v4733_v51 }
 0x26d   :  { %v7392_v1 = vpop.f32.mrf.mxu0 }
 0x26e   :  { %v443_v2 = vmul.f32 0.1, %v438_v62  ;;  %v4742_v59 = vcombine.high %v4740_v52, %v4740_v52  ;;  %v968_v1 = vrot.slane %v8009_v20, 2  ;;  %v4756_v4 = vrot.slane %v4740_v52, %v8186_v50 }
 0x26f   :  { %v440_v3 = vpop.f32.mrf.mxu0 }
 0x270   :  { %v444_v5 = vmax.f32 %v438_v62, %v443_v2  ;;  %v4749_v62 = vrot.slane %v4733_v51, %v8186_v50  ;;  %v967_v3 = vsel %vm85_vm0, %v966_v57, %v965_v56  ;;  %v4772_v28 = vcombine.high %v4756_v4, %v4756_v4  ;;  %v7839_v56 = vld [vmem:[%s10056_s3 + $0x38] sm:$0xff]  }
 0x271   :  { %v7393_v6 = vpop.f32.mrf.mxu0  ;;  %v969_v14 = vsel %vm88_vm2, %v968_v1, %v967_v3 }
 0x272   :  { %v445_v11 = vpack.c.bf16 %v444_v5, %v444_v5  ;;  %v4763_v5 = vrot.slane %v4741_v58, %v8186_v50  ;;  %v4770_v6 = vrot.slane %v4742_v59, %v8186_v50 }
 0x273   :  { %v585_v12 = vpop.f32.mrf.mxu0 }
 0x274   :  { %v586_v13 = vadd.f32 %v6737_v7, %v585_v12  ;;  %7399 = vmatmul.mubr.msk.bf16.vlgmr.msra.gmra.mxu1 %vm182_vm9, %v445_v11  ;;  %v4771_v11 = vcombine.high %v4749_v62, %v4749_v62  ;;  %v8205_v12 = vsub.s32 0, %v4731_v48  ;;  %v4774_v30 = vcombine.high %v4770_v6, %v4770_v6 }
 0x275   :  { %v7406_v15 = vpop.f32.mrf.mxu0  ;;  %7409 = vmatpush3.bf16.msra.mxu1 %v7834_v9  ;;  %7412 = vmatprep.mubr.msk.bf16.mxu1 %vm7929_vm1, %v7928_v0 }
 0x276   :  { %v591_v17 = vmul.f32 0.1, %v586_v13  ;;  %7410 = vmatprep.subr.bf16.mxu1 %v7928_v0  ;;  %v970_v15 = vrot.slane %v8011_v21, 1 }
 0x277   :  { %v588_v27 = vpop.f32.mrf.mxu0 }
 0x278   :  { %v592_v29 = vmax.f32 %v586_v13, %v591_v17  ;;  %v971_v39 = vsel %vm91_vm3, %v970_v15, %v969_v14  ;;  %v7841_v15 = vld [vmem:[%s10054_s1 + $0x20] sm:$0xff]  }
 0x279   :  { %v7407_v31 = vpop.f32.mrf.mxu0  ;;  %7411 = vmatpush3.bf16.msra.mxu1 %v7835_v26 }
 0x27a   :  { %v593_v32 = vpack.c.bf16 %v592_v29, %v592_v29  ;;  %7424 = vmatprep.subr.bf16.mxu1 %v7928_v0  ;;  %v4773_v29 = vcombine.high %v4763_v5, %v4763_v5 }
 0x27c   :  { %7413 = vmatmul.mubr.msk.bf16.vlgmr.msra.gmra.mxu1 %vm182_vm9, %v593_v32 }
 0x27d   :  { %7425 = vmatpush3.bf16.msra.mxu1 %v7836_v33  ;;  %7426 = vmatprep.mubr.msk.bf16.mxu1 %vm7929_vm1, %v7928_v0 }
 0x27e   :  { %7438 = vmatprep.subr.bf16.mxu1 %v7928_v0 }
 0x284   :  { %7427 = vmatmul.mubr.msk.bf16.vlgmr.msra.gmra.mxu1 %vm112_vm8, %v760_v37 }
 0x285   :  { %7442 = vmatprep.mubr.msk.bf16.mxu1 %vm7929_vm1, %v7928_v0 }
 0x334   :  { %v508_v55 = vpop.f32.mrf.mxu1 }
 0x335   :  { %v509_v53 = vadd.f32 %v6730_v54, %v508_v55 }
 0x336   :  { %v7400_v60 = vpop.f32.mrf.mxu1 }
 0x337   :  { %v514_v61 = vmul.f32 0.1, %v509_v53 }
 0x338   :  { %v511_v63 = vpop.f32.mrf.mxu1 }
 0x339   :  { %v515_v2 = vmax.f32 %v509_v53, %v514_v61  ;;  %v6761_v53 = vld [vmem:[%s10057_s2 + $0x3] ss:$0 sm:$0xff] }
 0x33a   :  { %v7401_v7 = vpop.f32.mrf.mxu1 }
 0x33b   :  { %v4784_v9 = vcombine.high %v515_v2, %v515_v2  ;;  %v4791_v10 = vrot.slane %v515_v2, %v8186_v50 }
 0x33c   :  { %v656_v13 = vpop.f32.mrf.mxu1 }
 0x33d   :  { %v4798_v16 = vrot.slane %v4784_v9, %v8186_v50  ;;  %v4799_v17 = vcombine.high %v4791_v10, %v4791_v10  ;;  %v4807_v26 = vrot.slane %v4791_v10, %v8186_v50  ;;  %v657_v27 = vadd.f32 %v6745_v8, %v656_v13  ;;  %v7840_v8 = vld [vmem:[%s10056_s3 + $0x30] sm:$0xff]  }
 0x33e   :  { %v7414_v31 = vpop.f32.mrf.mxu1  ;;  %v975_v10 = vrot.slane %v8017_v24, 6 }
 0x33f   :  { %v4800_v32 = vcombine.high %v4798_v16, %v4798_v16  ;;  %v4814_v33 = vrot.slane %v4798_v16, %v8186_v50  ;;  %v4821_v34 = vrot.slane %v4799_v17, %v8186_v50  ;;  %v4829_v35 = vcombine.high %v4807_v26, %v4807_v26  ;;  %v6754_v31 = vld [vmem:[%s10060_s6 + $0x2] ss:$0 sm:$0xff] }
 0x340   :  { %v5802_v36 = vrot.slane %v4807_v26, %v8205_v12  ;;  %v662_v37 = vmul.f32 0.1, %v657_v27  ;;  %v659_v38 = vpop.f32.mrf.mxu1  ;;  %v977_v16 = vrot.slane %v8019_v25, 5 }
 0x341   :  { %v4828_v41 = vrot.slane %v4800_v32, %v8186_v50  ;;  %v4830_v42 = vcombine.high %v4814_v33, %v4814_v33  ;;  %v4831_v43 = vcombine.high %v4821_v34, %v4821_v34  ;;  %v5806_v44 = vrot.slane %v4821_v34, %v8205_v12 }
 0x342   :  { %v5810_v45 = vrot.slane %v4829_v35, %v8205_v12  ;;  %v5818_v46 = vrot.slane %v4814_v33, %v8205_v12  ;;  %v8221_v47 = vsel %vm10066_vm10, %v4749_v62, %v5802_v36  ;;  %v663_v48 = vmax.f32 %v657_v27, %v662_v37  ;;  %v7415_v49 = vpop.f32.mrf.mxu1 }
 0x343   :  { %v4832_v51 = vcombine.high %v4828_v41, %v4828_v41  ;;  %v5814_v52 = vrot.slane %v4831_v43, %v8205_v12  ;;  %v5822_v54 = vrot.slane %v4828_v41, %v8205_v12  ;;  %v5826_v55 = vrot.slane %v4830_v42, %v8205_v12  ;;  %v6769_v43 = vld [vmem:[%s10059_s4 + $0x3] ss:$0 sm:$0xff] }
 0x344   :  { %v8233_v57 = vsel %vm10066_vm10, %v4763_v5, %v5806_v44  ;;  %v8236_v58 = vsel %vm10066_vm10, %v4771_v11, %v5810_v45  ;;  %v8239_v59 = vsel %vm10066_vm10, %v4756_v4, %v5818_v46  ;;  %v664_v60 = vpack.c.bf16 %v663_v48, %v663_v48  ;;  %v804_v61 = vpop.f32.mrf.mxu1 }
 0x345   :  { %v5830_v62 = vrot.slane %v4832_v51, %v8205_v12  ;;  %v8243_v63 = vsel %vm10066_vm10, %v4773_v29, %v5814_v52  ;;  %v8246_v1 = vsel %vm10066_vm10, %v4770_v6, %v5822_v54  ;;  %v8249_v2 = vsel %vm10066_vm10, %v4772_v28, %v5826_v55  ;;  %v7842_v29 = vld [vmem:[%s10058_s5 + $0x38] sm:$0xff]  }
 0x346   :  { %v805_v3 = vadd.f32 %v6761_v53, %v804_v61  ;;  %7421 = vmatmul.mubr.msk.bf16.vlgmr.msra.gmra.mxu0 %vm182_vm9, %v664_v60  ;;  %v7428_v5 = vpop.f32.mrf.mxu1  ;;  %v972_v4 = vsel %vm94_vm4, %v8013_v22, %v971_v39  ;;  %7439 = vmatpush3.bf16.msra.mxu1 %v7842_v29  ;;  %v1184_v34 = vrot.slane %v8005_v18, 5  ;;  %v1185_v35 = vrot.slane %v8007_v19, 4 }
 0x347   :  { %v8255_v7 = vsel %vm10066_vm10, %v4774_v30, %v5830_v62  ;;  %7431 = vmatpush3.bf16.msra.mxu0 %v7839_v56  ;;  %7434 = vmatprep.mubr.msk.bf16.mxu0 %vm7929_vm1, %v7928_v0  ;;  %v974_v11 = vsel %vm97_vm5, %v973_v40, %v972_v4  ;;  %v7843_v30 = vld [vmem:[%s10058_s5 + $0x30] sm:$0xff]   ;;  %v1187_v39 = vrot.slane %v8009_v20, 3  ;;  %v1189_v49 = vrot.slane %v8011_v21, 2 }
 0x348   :  { %v810_v6 = vmul.f32 0.1, %v805_v3  ;;  %v807_v9 = vpop.f32.mrf.mxu1  ;;  %7432 = vmatprep.subr.bf16.mxu0 %v7928_v0  ;;  %v976_v26 = vsel %vm100_vm6, %v975_v10, %v974_v11  ;;  %7440 = vmatprep.subr.bf16.mxu1 %v7928_v0  ;;  %v1186_v41 = vsel %vm85_vm0, %v1185_v35, %v1184_v34 }
 0x349   :  { %v978_v27 = vsel %vm103_vm7, %v977_v16, %v976_v26  ;;  %v1188_v48 = vsel %vm88_vm2, %v1187_v39, %v1186_v41 }
 0x34a   :  { %v811_v13 = vmax.f32 %v805_v3, %v810_v6  ;;  %v7429_v14 = vpop.f32.mrf.mxu1  ;;  %v979_v28 = vpack.c.b16 %v978_v27, %v978_v27  ;;  %7441 = vmatpush3.bf16.msra.mxu1 %v7843_v30  ;;  %v1191_v6 = vrot.slane %v8013_v22, 1 }
 0x34b   :  { %7433 = vmatpush3.bf16.msra.mxu0 %v7840_v8  ;;  %7452 = vmatprep.subr.bf16.mxu1 %v7928_v0  ;;  %v1190_v8 = vsel %vm91_vm3, %v1189_v49, %v1188_v48 }
 0x34c   :  { %v812_v17 = vpack.c.bf16 %v811_v13, %v811_v13  ;;  %7446 = vmatprep.subr.bf16.mxu0 %v7928_v0 }
 0x34e   :  { %7435 = vmatmul.mubr.msk.bf16.vlgmr.msra.gmra.mxu0 %vm182_vm9, %v812_v17 }
 0x34f   :  { %7447 = vmatpush3.bf16.msra.mxu0 %v7841_v15  ;;  %7448 = vmatprep.mubr.msk.bf16.mxu0 %vm7929_vm1, %v7928_v0 }
 0x350   :  { %7460 = vmatprep.subr.bf16.mxu0 %v7928_v0 }
 0x356   :  { %7449 = vmatmul.mubr.msk.bf16.vlgmr.msra.gmra.mxu0 %vm112_vm8, %v979_v28 }
 0x357   :  { %7464 = vmatprep.mubr.msk.bf16.mxu0 %vm7929_vm1, %v7928_v0 }
 0x406   :  { %v727_v32 = vpop.f32.mrf.mxu0 }
 0x407   :  { %v728_v33 = vadd.f32 %v6754_v31, %v727_v32  ;;  %v6785_v31 = vld [vmem:[%s10057_s2 + $0x4] ss:$0 sm:$0xff]  ;;  %v7844_v32 = vld [vmem:[%s10056_s3 + $0x48] sm:$0xff]  }
 0x408   :  { %v7422_v36 = vpop.f32.mrf.mxu0 }
 0x409   :  { %v733_v37 = vmul.f32 0.1, %v728_v33 }
 0x40a   :  { %v730_v38 = vpop.f32.mrf.mxu0 }
 0x40b   :  { %v734_v40 = vmax.f32 %v728_v33, %v733_v37 }
 0x40c   :  { %v7423_v42 = vpop.f32.mrf.mxu0 }
 0x40d   :  { %v4834_v44 = vcombine.high %v734_v40, %v734_v40  ;;  %v4841_v45 = vrot.slane %v734_v40, %v8186_v50  ;;  %v1192_v40 = vsel %vm94_vm4, %v1191_v6, %v1190_v8  ;;  %v1194_v42 = vrot.slane %v8017_v24, 7 }
 0x40e   :  { %v875_v46 = vpop.f32.mrf.mxu0  ;;  %v1406_v8 = vrot.slane %v8009_v20, 4 }
 0x40f   :  { %v4848_v51 = vrot.slane %v4834_v44, %v8186_v50  ;;  %v4849_v52 = vcombine.high %v4841_v45, %v4841_v45  ;;  %v4857_v54 = vrot.slane %v4841_v45, %v8186_v50  ;;  %v876_v55 = vadd.f32 %v6769_v43, %v875_v46  ;;  %v7846_v45 = vld [vmem:[%s10054_s1 + $0x28] sm:$0xff]  }
 0x410   :  { %v7436_v53 = vpop.f32.mrf.mxu0  ;;  %v1193_v43 = vsel %vm97_vm5, %v8015_v23, %v1192_v40  ;;  %v1196_v46 = vrot.slane %v8019_v25, 6 }
 0x411   :  { %v4850_v56 = vcombine.high %v4848_v51, %v4848_v51  ;;  %v4864_v60 = vrot.slane %v4848_v51, %v8186_v50  ;;  %v4871_v61 = vrot.slane %v4849_v52, %v8186_v50  ;;  %v4879_v62 = vcombine.high %v4857_v54, %v4857_v54  ;;  %v6778_v53 = vld [vmem:[%s10060_s6 + $0x3] ss:$0 sm:$0xff] }
 0x412   :  { %v5842_v3 = vrot.slane %v4857_v54, %v8205_v12  ;;  %v881_v5 = vmul.f32 0.1, %v876_v55  ;;  %v878_v4 = vpop.f32.mrf.mxu0  ;;  %v1195_v49 = vsel %vm100_vm6, %v1194_v42, %v1193_v43  ;;  %v7847_v54 = vld [vmem:[%s10058_s5 + $0x48] sm:$0xff]  }
 0x413   :  { %v4878_v9 = vrot.slane %v4850_v56, %v8186_v50  ;;  %v4880_v10 = vcombine.high %v4864_v60, %v4864_v60  ;;  %v4881_v11 = vcombine.high %v4871_v61, %v4871_v61  ;;  %v5846_v13 = vrot.slane %v4871_v61, %v8205_v12  ;;  %7461 = vmatpush3.bf16.msra.mxu0 %v7847_v54 }
 0x414   :  { %v5850_v14 = vrot.slane %v4879_v62, %v8205_v12  ;;  %v5858_v15 = vrot.slane %v4864_v60, %v8205_v12  ;;  %v8313_v16 = vsel %vm10065_vm11, %v8221_v47, %v5842_v3  ;;  %v882_v17 = vmax.f32 %v876_v55, %v881_v5  ;;  %v7437_v26 = vpop.f32.mrf.mxu0  ;;  %7462 = vmatprep.subr.bf16.mxu0 %v7928_v0  ;;  %v7848_v55 = vld [vmem:[%s10058_s5 + $0x40] sm:$0xff]  }
 0x415   :  { %v4882_v27 = vcombine.high %v4878_v9, %v4878_v9  ;;  %v5854_v28 = vrot.slane %v4881_v11, %v8205_v12  ;;  %v5862_v29 = vrot.slane %v4878_v9, %v8205_v12  ;;  %v5866_v30 = vrot.slane %v4880_v10, %v8205_v12  ;;  %v6793_v11 = vld [vmem:[%s10059_s4 + $0x4] ss:$0 sm:$0xff] }
 0x416   :  { %v8326_v47 = vsel %vm10065_vm11, %v8233_v57, %v5846_v13  ;;  %v8330_v33 = vsel %vm10065_vm11, %v8236_v58, %v5850_v14  ;;  %v8334_v34 = vsel %vm10065_vm11, %v8239_v59, %v5858_v15  ;;  %v883_v35 = vpack.c.bf16 %v882_v17, %v882_v17  ;;  %v1023_v36 = vpop.f32.mrf.mxu0 }
 0x417   :  { %v5870_v37 = vrot.slane %v4882_v27, %v8205_v12  ;;  %v8339_v38 = vsel %vm10065_vm11, %v8243_v63, %v5854_v28  ;;  %v8343_v57 = vsel %vm10065_vm11, %v8246_v1, %v5862_v29  ;;  %v8347_v58 = vsel %vm10065_vm11, %v8249_v2, %v5866_v30  ;;  %v7845_v63 = vld [vmem:[%s10056_s3 + $0x40] sm:$0xff]   ;;  %7463 = vmatpush3.bf16.msra.mxu0 %v7848_v55 }
 0x418   :  { %v1024_v39 = vadd.f32 %v6785_v31, %v1023_v36  ;;  %7443 = vmatmul.mubr.msk.bf16.vlgmr.msra.gmra.mxu1 %vm182_vm9, %v883_v35  ;;  %v7450_v59 = vpop.f32.mrf.mxu0  ;;  %v1197_v51 = vsel %vm103_vm7, %v1196_v46, %v1195_v49  ;;  %7474 = vmatprep.subr.bf16.mxu0 %v7928_v0  ;;  %v1403_v61 = vrot.slane %v8005_v18, 6  ;;  %v1404_v62 = vrot.slane %v8007_v19, 5 }
 0x419   :  { %v8353_v41 = vsel %vm10065_vm11, %v8255_v7, %v5870_v37  ;;  %7453 = vmatpush3.bf16.msra.mxu1 %v7844_v32  ;;  %7456 = vmatprep.mubr.msk.bf16.mxu1 %vm7929_vm1, %v7928_v0  ;;  %v1198_v52 = vpack.c.b16 %v1197_v51, %v1197_v51  ;;  %v1408_v26 = vrot.slane %v8011_v21, 3  ;;  %v1410_v32 = vrot.slane %v8013_v22, 2 }
 0x41a   :  { %v1029_v1 = vmul.f32 0.1, %v1024_v39  ;;  %v1026_v2 = vpop.f32.mrf.mxu0  ;;  %7454 = vmatprep.subr.bf16.mxu1 %v7928_v0  ;;  %v1405_v9 = vsel %vm85_vm0, %v1404_v62, %v1403_v61 }
 0x41b   :  { %v1407_v17 = vsel %vm88_vm2, %v1406_v8, %v1405_v9  ;;  %v1412_v2 = vrot.slane %v8015_v23, 1 }
 0x41c   :  { %v1030_v44 = vmax.f32 %v1024_v39, %v1029_v1  ;;  %v7451_v7 = vpop.f32.mrf.mxu0  ;;  %v1409_v1 = vsel %vm91_vm3, %v1408_v26, %v1407_v17 }
 0x41d   :  { %7455 = vmatpush3.bf16.msra.mxu1 %v7845_v63  ;;  %v1411_v9 = vsel %vm94_vm4, %v1410_v32, %v1409_v1 }
 0x41e   :  { %v1031_v48 = vpack.c.bf16 %v1030_v44, %v1030_v44  ;;  %7468 = vmatprep.subr.bf16.mxu1 %v7928_v0 }
 0x420   :  { %7457 = vmatmul.mubr.msk.bf16.vlgmr.msra.gmra.mxu1 %vm182_vm9, %v1031_v48 }
 0x421   :  { %7469 = vmatpush3.bf16.msra.mxu1 %v7846_v45  ;;  %7470 = vmatprep.mubr.msk.bf16.mxu1 %vm7929_vm1, %v7928_v0 }
 0x422   :  { %7482 = vmatprep.subr.bf16.mxu1 %v7928_v0 }
 0x428   :  { %7471 = vmatmul.mubr.msk.bf16.vlgmr.msra.gmra.mxu1 %vm112_vm8, %v1198_v52 }
 0x429   :  { %7486 = vmatprep.mubr.msk.bf16.mxu1 %vm7929_vm1, %v7928_v0 }
 0x4d8   :  { %v946_v56 = vpop.f32.mrf.mxu1 }
 0x4d9   :  { %v947_v60 = vadd.f32 %v6778_v53, %v946_v56  ;;  %v6809_v56 = vld [vmem:[%s10057_s2 + $0x5] ss:$0 sm:$0xff] }
 0x4da   :  { %v7444_v3 = vpop.f32.mrf.mxu1 }
 0x4db   :  { %v952_v5 = vmul.f32 0.1, %v947_v60 }
 0x4dc   :  { %v949_v4 = vpop.f32.mrf.mxu1 }
 0x4dd   :  { %v953_v6 = vmax.f32 %v947_v60, %v952_v5  ;;  %v7849_v60 = vld [vmem:[%s10056_s3 + $0x58] sm:$0xff]  }
 0x4de   :  { %v7445_v10 = vpop.f32.mrf.mxu1 }
 0x4df   :  { %v4884_v13 = vcombine.high %v953_v6, %v953_v6  ;;  %v4891_v14 = vrot.slane %v953_v6, %v8186_v50 }
 0x4e0   :  { %v1094_v15 = vpop.f32.mrf.mxu1 }
 0x4e1   :  { %v4898_v27 = vrot.slane %v4884_v13, %v8186_v50  ;;  %v4899_v28 = vcombine.high %v4891_v14, %v4891_v14  ;;  %v4907_v29 = vrot.slane %v4891_v14, %v8186_v50  ;;  %v1095_v30 = vadd.f32 %v6793_v11, %v1094_v15 }
 0x4e2   :  { %v7458_v31 = vpop.f32.mrf.mxu1  ;;  %v1413_v11 = vsel %vm97_vm5, %v1412_v2, %v1411_v9  ;;  %v1415_v15 = vrot.slane %v8019_v25, 7 }
 0x4e3   :  { %v4900_v35 = vcombine.high %v4898_v27, %v4898_v27  ;;  %v4914_v36 = vrot.slane %v4898_v27, %v8186_v50  ;;  %v4921_v37 = vrot.slane %v4899_v28, %v8186_v50  ;;  %v4929_v39 = vcombine.high %v4907_v29, %v4907_v29  ;;  %v6802_v31 = vld [vmem:[%s10060_s6 + $0x4] ss:$0 sm:$0xff] }
 0x4e4   :  { %v5882_v59 = vrot.slane %v4907_v29, %v8205_v12  ;;  %v1100_v40 = vmul.f32 0.1, %v1095_v30  ;;  %v1097_v63 = vpop.f32.mrf.mxu1  ;;  %v1414_v26 = vsel %vm100_vm6, %v8017_v24, %v1413_v11  ;;  %v7852_v29 = vld [vmem:[%s10058_s5 + $0x58] sm:$0xff]  }
 0x4e5   :  { %v4928_v42 = vrot.slane %v4900_v35, %v8186_v50  ;;  %v4930_v43 = vcombine.high %v4914_v36, %v4914_v36  ;;  %v4931_v44 = vcombine.high %v4921_v37, %v4921_v37  ;;  %v5886_v7 = vrot.slane %v4921_v37, %v8205_v12  ;;  %7483 = vmatpush3.bf16.msra.mxu1 %v7852_v29 }
 0x4e6   :  { %v5890_v45 = vrot.slane %v4929_v39, %v8205_v12  ;;  %v5898_v46 = vrot.slane %v4914_v36, %v8205_v12  ;;  %v8413_v48 = vsel %vm10064_vm12, %v8313_v16, %v5882_v59  ;;  %v1101_v49 = vmax.f32 %v1095_v30, %v1100_v40  ;;  %v7459_v51 = vpop.f32.mrf.mxu1  ;;  %7484 = vmatprep.subr.bf16.mxu1 %v7928_v0  ;;  %v7853_v30 = vld [vmem:[%s10058_s5 + $0x50] sm:$0xff]  }
 0x4e7   :  { %v4932_v52 = vcombine.high %v4928_v42, %v4928_v42  ;;  %v5894_v54 = vrot.slane %v4931_v44, %v8205_v12  ;;  %v5902_v55 = vrot.slane %v4928_v42, %v8205_v12  ;;  %v5906_v53 = vrot.slane %v4930_v43, %v8205_v12  ;;  %v6817_v43 = vld [vmem:[%s10059_s4 + $0x5] ss:$0 sm:$0xff] }
 0x4e8   :  { %v8426_v16 = vsel %vm10064_vm12, %v8326_v47, %v5886_v7  ;;  %v8430_v61 = vsel %vm10064_vm12, %v8330_v33, %v5890_v45  ;;  %v8434_v62 = vsel %vm10064_vm12, %v8334_v34, %v5898_v46  ;;  %v1102_v3 = vpack.c.bf16 %v1101_v49, %v1101_v49  ;;  %v1242_v5 = vpop.f32.mrf.mxu1 }
 0x4e9   :  { %v5910_v4 = vrot.slane %v4932_v52, %v8205_v12  ;;  %v8439_v8 = vsel %vm10064_vm12, %v8339_v38, %v5894_v54  ;;  %v8443_v47 = vsel %vm10064_vm12, %v8343_v57, %v5902_v55  ;;  %v8447_v33 = vsel %vm10064_vm12, %v8347_v58, %v5906_v53  ;;  %v7850_v38 = vld [vmem:[%s10056_s3 + $0x50] sm:$0xff]   ;;  %7485 = vmatpush3.bf16.msra.mxu1 %v7853_v30 }
 0x4ea   :  { %v1243_v6 = vadd.f32 %v6809_v56, %v1242_v5  ;;  %7465 = vmatmul.mubr.msk.bf16.vlgmr.msra.gmra.mxu0 %vm182_vm9, %v1102_v3  ;;  %v7472_v34 = vpop.f32.mrf.mxu1  ;;  %v1416_v27 = vsel %vm103_vm7, %v1415_v15, %v1414_v26  ;;  %7496 = vmatprep.subr.bf16.mxu1 %v7928_v0  ;;  %v1622_v36 = vrot.slane %v8005_v18, 7  ;;  %v1623_v37 = vrot.slane %v8007_v19, 6  ;;  %v6833_v26 = vld [vmem:[%s10057_s2 + $0x6] ss:$0 sm:$0xff] }
 0x4eb   :  { %v8453_v10 = vsel %vm10064_vm12, %v8353_v41, %v5910_v4  ;;  %7475 = vmatpush3.bf16.msra.mxu0 %v7849_v60  ;;  %7478 = vmatprep.mubr.msk.bf16.mxu0 %vm7929_vm1, %v7928_v0  ;;  %v7851_v41 = vld [vmem:[%s10054_s1 + $0x30] sm:$0xff]   ;;  %v1417_v28 = vpack.c.b16 %v1416_v27, %v1416_v27  ;;  %v1625_v63 = vrot.slane %v8009_v20, 5  ;;  %v1627_v19 = vrot.slane %v8011_v21, 4  ;;  %v7854_v27 = vld [vmem:[%s10056_s3 + $0x68] sm:$0xff]  }
 0x4ec   :  { %v1248_v57 = vmul.f32 0.1, %v1243_v6  ;;  %v1245_v58 = vpop.f32.mrf.mxu1  ;;  %7476 = vmatprep.subr.bf16.mxu0 %v7928_v0  ;;  %v1624_v2 = vsel %vm85_vm0, %v1623_v37, %v1622_v36  ;;  %v1629_v54 = vrot.slane %v8013_v22, 3 }
 0x4ed   :  { %v1626_v18 = vsel %vm88_vm2, %v1625_v63, %v1624_v2 }
 0x4ee   :  { %v1249_v13 = vmax.f32 %v1243_v6, %v1248_v57  ;;  %v7473_v14 = vpop.f32.mrf.mxu1  ;;  %v1628_v4 = vsel %vm91_vm3, %v1627_v19, %v1626_v18  ;;  %v1631_v6 = vrot.slane %v8015_v23, 2  ;;  %v28_v19 = vld [vmem:[%s10055_s0 + $0x8] sm:$0xff] }
 0x4ef   :  { %7477 = vmatpush3.bf16.msra.mxu0 %v7850_v38  ;;  %v1630_v37 = vsel %vm94_vm4, %v1629_v54, %v1628_v4  ;;  %v40_v54 = vld [vmem:[%s10055_s0 + $0x68] sm:$0xff] }
 0x4f0   :  { %v1250_v17 = vpack.c.bf16 %v1249_v13, %v1249_v13  ;;  %7490 = vmatprep.subr.bf16.mxu0 %v7928_v0 }
 0x4f2   :  { %7479 = vmatmul.mubr.msk.bf16.vlgmr.msra.gmra.mxu0 %vm182_vm9, %v1250_v17 }
 0x4f3   :  { %7491 = vmatpush3.bf16.msra.mxu0 %v7851_v41  ;;  %7492 = vmatprep.mubr.msk.bf16.mxu0 %vm7929_vm1, %v7928_v0 }
 0x4f4   :  { %7504 = vmatprep.subr.bf16.mxu0 %v7928_v0 }
 0x4fa   :  { %7493 = vmatmul.mubr.msk.bf16.vlgmr.msra.gmra.mxu0 %vm112_vm8, %v1417_v28 }
 0x4fb   :  { %7508 = vmatprep.mubr.msk.bf16.mxu0 %vm7929_vm1, %v7928_v0 }
 0x5aa   :  { %v1165_v32 = vpop.f32.mrf.mxu0 }
 0x5ab   :  { %v1166_v35 = vadd.f32 %v6802_v31, %v1165_v32 }
 0x5ac   :  { %v7466_v39 = vpop.f32.mrf.mxu0 }
 0x5ad   :  { %v1171_v59 = vmul.f32 0.1, %v1166_v35 }
 0x5ae   :  { %v1168_v40 = vpop.f32.mrf.mxu0 }
 0x5af   :  { %v1172_v1 = vmax.f32 %v1166_v35, %v1171_v59  ;;  %v1633_v59 = vrot.slane %v8017_v24, 1  ;;  %v1632_v40 = vsel %vm97_vm5, %v1631_v6, %v1630_v37  ;;  %v1834_v6 = vpack.c.bf16 %v40_v54, %v40_v54 }
 0x5b0   :  { %v7467_v42 = vpop.f32.mrf.mxu0 }
 0x5b1   :  { %v4934_v44 = vcombine.high %v1172_v1, %v1172_v1  ;;  %v4941_v7 = vrot.slane %v1172_v1, %v8186_v50  ;;  %v1634_v42 = vsel %vm100_vm6, %v1633_v59, %v1632_v40 }
 0x5b2   :  { %v1313_v45 = vpop.f32.mrf.mxu0  ;;  %v1635_v24 = vsel %vm103_vm7, %v8019_v25, %v1634_v42  ;;  %v31_v25 = vld [vmem:[%s10055_s0 + $0x20] sm:$0xff] }
 0x5b3   :  { %v4948_v46 = vrot.slane %v4934_v44, %v8186_v50  ;;  %v4949_v49 = vcombine.high %v4941_v7, %v4941_v7  ;;  %v4957_v20 = vrot.slane %v4941_v7, %v8186_v50  ;;  %v1314_v51 = vadd.f32 %v6817_v43, %v1313_v45  ;;  %v7857_v44 = vld [vmem:[%s10058_s5 + $0x68] sm:$0xff]   ;;  %v7858_v7 = vld [vmem:[%s10058_s5 + $0x60] sm:$0xff]   ;;  %v34_v45 = vld [vmem:[%s10055_s0 + $0x38] sm:$0xff] }
 0x5b4   :  { %v7480_v52 = vpop.f32.mrf.mxu0  ;;  %v1636_v43 = vpack.c.b16 %v1635_v24, %v1635_v24  ;;  %7505 = vmatpush3.bf16.msra.mxu0 %v7857_v44  ;;  %v1831_v18 = vpack.c.bf16 %v31_v25, %v31_v25 }
 0x5b5   :  { %v4950_v55 = vcombine.high %v4948_v46, %v4948_v46  ;;  %v4964_v53 = vrot.slane %v4948_v46, %v8186_v50  ;;  %v4971_v56 = vrot.slane %v4949_v49, %v8186_v50  ;;  %v4979_v60 = vcombine.high %v4957_v20, %v4957_v20  ;;  %7506 = vmatprep.subr.bf16.mxu0 %v7928_v0  ;;  %v37_v49 = vld [vmem:[%s10055_s0 + $0x50] sm:$0xff]  ;;  %v6826_v52 = vld [vmem:[%s10060_s6 + $0x5] ss:$0 sm:$0xff] }
 0x5b6   :  { %v5922_v3 = vrot.slane %v4957_v20, %v8205_v12  ;;  %v1319_v5 = vmul.f32 0.1, %v1314_v51  ;;  %v1316_v21 = vpop.f32.mrf.mxu0  ;;  %v1832_v46 = vpack.c.bf16 %v34_v45, %v34_v45  ;;  %v1830_v20 = vpack.c.bf16 %v28_v19, %v28_v19 }
 0x5b7   :  { %v4978_v34 = vrot.slane %v4950_v55, %v8186_v50  ;;  %v4980_v9 = vcombine.high %v4964_v53, %v4964_v53  ;;  %v4981_v38 = vcombine.high %v4971_v56, %v4971_v56  ;;  %v5926_v22 = vrot.slane %v4971_v56, %v8205_v12 }
 0x5b8   :  { %v5930_v57 = vrot.slane %v4979_v60, %v8205_v12  ;;  %v5938_v58 = vrot.slane %v4964_v53, %v8205_v12  ;;  %v8512_v11 = vsel %vm10063_vm13, %v8413_v48, %v5922_v3  ;;  %v1320_v13 = vmax.f32 %v1314_v51, %v1319_v5  ;;  %v7481_v14 = vpop.f32.mrf.mxu0  ;;  %7507 = vmatpush3.bf16.msra.mxu0 %v7858_v7  ;;  %v43_v3 = vld [vmem:[%s10055_s0 + $0x80] sm:$0xff] }
 0x5b9   :  { %v4982_v41 = vcombine.high %v4978_v34, %v4978_v34  ;;  %v5934_v15 = vrot.slane %v4981_v38, %v8205_v12  ;;  %v5942_v23 = vrot.slane %v4978_v34, %v8205_v12  ;;  %v5946_v17 = vrot.slane %v4980_v9, %v8205_v12  ;;  %7518 = vmatprep.subr.bf16.mxu0 %v7928_v0  ;;  %v46_v9 = vld [vmem:[%s10055_s0 + $0x98] sm:$0xff] }
 0x5ba   :  { %v8525_v48 = vsel %vm10063_vm13, %v8426_v16, %v5926_v22  ;;  %v8529_v28 = vsel %vm10063_vm13, %v8430_v61, %v5930_v57  ;;  %v8533_v29 = vsel %vm10063_vm13, %v8434_v62, %v5938_v58  ;;  %v1321_v30 = vpack.c.bf16 %v1320_v13, %v1320_v13  ;;  %v1461_v31 = vpop.f32.mrf.mxu0 }
 0x5bb   :  { %v5950_v32 = vrot.slane %v4982_v41, %v8205_v12  ;;  %v8538_v35 = vsel %vm10063_vm13, %v8439_v8, %v5934_v15  ;;  %v8542_v16 = vsel %vm10063_vm13, %v8443_v47, %v5942_v23  ;;  %v8546_v61 = vsel %vm10063_vm13, %v8447_v33, %v5946_v17  ;;  %v7855_v8 = vld [vmem:[%s10056_s3 + $0x60] sm:$0xff]  }
 0x5bc   :  { %v1462_v36 = vadd.f32 %v6833_v26, %v1461_v31  ;;  %7487 = vmatmul.mubr.msk.bf16.vlgmr.msra.gmra.mxu1 %vm182_vm9, %v1321_v30  ;;  %v7494_v62 = vpop.f32.mrf.mxu0  ;;  %v8596_v51 = vunpack.c.l.b16 %v1831_v18  ;;  %v1833_v53 = vpack.c.bf16 %v37_v49, %v37_v49  ;;  %v8604_v56 = vunpack.c.l.b16 %v1832_v46  ;;  %v6841_v15 = vld [vmem:[%s10059_s4 + $0x6] ss:$0 sm:$0xff]  ;;  %v49_v30 = vld [vmem:[%s10055_s0 + $0xb0] sm:$0xff] }
 0x5bd   :  { %v8552_v39 = vsel %vm10063_vm13, %v8453_v10, %v5950_v32  ;;  %7497 = vmatpush3.bf16.msra.mxu1 %v7854_v27  ;;  %7500 = vmatprep.mubr.msk.bf16.mxu1 %vm7929_vm1, %v7928_v0  ;;  %v7856_v10 = vld [vmem:[%s10054_s1 + $0x38] sm:$0xff]   ;;  %v8609_v5 = vunpack.c.l.b16 %v1830_v20  ;;  %v1835_v22 = vpack.c.bf16 %v43_v3, %v43_v3  ;;  %v1836_v23 = vpack.c.bf16 %v46_v9, %v46_v9 }
 0x5be   :  { %v1467_v47 = vmul.f32 0.1, %v1462_v36  ;;  %v1464_v33 = vpop.f32.mrf.mxu0  ;;  %7498 = vmatprep.subr.bf16.mxu1 %v7928_v0  ;;  %v1865_v21 = vrot.slane %v8596_v51, 7  ;;  %v8615_v57 = vunpack.c.l.b16 %v1833_v53  ;;  %v1867_v58 = vrot.slane %v8604_v56, 6 }
 0x5bf   :  { %v8623_v17 = vunpack.c.l.b16 %v1834_v6  ;;  %v8629_v32 = vunpack.c.l.b16 %v1835_v22  ;;  %v1837_v40 = vpack.c.bf16 %v49_v30, %v49_v30  ;;  %v6857_v6 = vld [vmem:[%s10057_s2 + $0x7] ss:$0 sm:$0xff] }
 0x5c0   :  { %v1468_v63 = vmax.f32 %v1462_v36, %v1467_v47  ;;  %v7495_v1 = vpop.f32.mrf.mxu0  ;;  %v1866_v14 = vsel %vm85_vm0, %v1865_v21, %v8609_v5  ;;  %v1869_v62 = vrot.slane %v8615_v57, 5 }
 0x5c1   :  { %7499 = vmatpush3.bf16.msra.mxu1 %v7855_v8  ;;  %v1868_v36 = vsel %vm88_vm2, %v1867_v58, %v1866_v14  ;;  %v1871_v1 = vrot.slane %v8623_v17, 4  ;;  %v1873_v45 = vrot.slane %v8629_v32, 3 }
 0x5c2   :  { %v1469_v2 = vpack.c.bf16 %v1468_v63, %v1468_v63  ;;  %7512 = vmatprep.subr.bf16.mxu1 %v7928_v0  ;;  %v8635_v63 = vunpack.c.l.b16 %v1836_v23  ;;  %v1870_v25 = vsel %vm91_vm3, %v1869_v62, %v1868_v36  ;;  %v7861_v36 = vld [vmem:[%s10054_s1 + $0x40] sm:$0xff]  }
 0x5c4   :  { %7501 = vmatmul.mubr.msk.bf16.vlgmr.msra.gmra.mxu1 %vm182_vm9, %v1469_v2 }
 0x5c5   :  { %7513 = vmatpush3.bf16.msra.mxu1 %v7856_v10  ;;  %7514 = vmatprep.mubr.msk.bf16.mxu1 %vm7929_vm1, %v7928_v0 }
 0x5c6   :  { %7526 = vmatprep.subr.bf16.mxu1 %v7928_v0 }
 0x5cc   :  { %7515 = vmatmul.mubr.msk.bf16.vlgmr.msra.gmra.mxu1 %vm112_vm8, %v1636_v43 }
 0x5cd   :  { %7530 = vmatprep.mubr.msk.bf16.mxu1 %vm7929_vm1, %v7928_v0 }
 0x67c   :  { %v1384_v55 = vpop.f32.mrf.mxu1 }
 0x67d   :  { %v1385_v60 = vadd.f32 %v6826_v52, %v1384_v55 }
 0x67e   :  { %v7488_v4 = vpop.f32.mrf.mxu1 }
 0x67f   :  { %v1390_v34 = vmul.f32 0.1, %v1385_v60 }
 0x680   :  { %v1387_v38 = vpop.f32.mrf.mxu1 }
 0x681   :  { %v1391_v13 = vmax.f32 %v1385_v60, %v1390_v34  ;;  %v7859_v34 = vld [vmem:[%s10056_s3 + $0x78] sm:$0xff]  }
 0x682   :  { %v7489_v41 = vpop.f32.mrf.mxu1 }
 0x683   :  { %v4984_v26 = vcombine.high %v1391_v13, %v1391_v13  ;;  %v4991_v27 = vrot.slane %v1391_v13, %v8186_v50 }
 0x684   :  { %v1532_v31 = vpop.f32.mrf.mxu1 }
 0x685   :  { %v4998_v37 = vrot.slane %v4984_v26, %v8186_v50  ;;  %v4999_v8 = vcombine.high %v4991_v27, %v4991_v27  ;;  %v5007_v47 = vrot.slane %v4991_v27, %v8186_v50  ;;  %v1533_v33 = vadd.f32 %v6841_v15, %v1532_v31 }
 0x686   :  { %v7502_v59 = vpop.f32.mrf.mxu1  ;;  %v1872_v15 = vsel %vm94_vm4, %v1871_v1, %v1870_v25  ;;  %v1875_v27 = vrot.slane %v8635_v63, 2  ;;  %v6850_v1 = vld [vmem:[%s10060_s6 + $0x6] ss:$0 sm:$0xff] }
 0x687   :  { %v5000_v10 = vcombine.high %v4998_v37, %v4998_v37  ;;  %v5014_v2 = vrot.slane %v4998_v37, %v8186_v50  ;;  %v5021_v42 = vrot.slane %v4999_v8, %v8186_v50  ;;  %v5029_v24 = vcombine.high %v5007_v47, %v5007_v47  ;;  %v7862_v59 = vld [vmem:[%s10058_s5 + $0x78] sm:$0xff]  }
 0x688   :  { %v5962_v43 = vrot.slane %v5007_v47, %v8205_v12  ;;  %v1538_v44 = vmul.f32 0.1, %v1533_v33  ;;  %v1535_v7 = vpop.f32.mrf.mxu1  ;;  %v1874_v30 = vsel %vm97_vm5, %v1873_v45, %v1872_v15  ;;  %7527 = vmatpush3.bf16.msra.mxu1 %v7862_v59 }
 0x689   :  { %v5028_v18 = vrot.slane %v5000_v10, %v8186_v50  ;;  %v5030_v19 = vcombine.high %v5014_v2, %v5014_v2  ;;  %v5031_v46 = vcombine.high %v5021_v42, %v5021_v42  ;;  %v5966_v49 = vrot.slane %v5021_v42, %v8205_v12  ;;  %7528 = vmatprep.subr.bf16.mxu1 %v7928_v0 }
 0x68a   :  { %v5970_v20 = vrot.slane %v5029_v24, %v8205_v12  ;;  %v5978_v52 = vrot.slane %v5014_v2, %v8205_v12  ;;  %v8649_v54 = vsel %vm6395_vm14, %v8512_v11, %v5962_v43  ;;  %v1539_v55 = vmax.f32 %v1533_v33, %v1538_v44  ;;  %v7503_v53 = vpop.f32.mrf.mxu1 }
 0x68b   :  { %v5032_v60 = vcombine.high %v5028_v18, %v5028_v18  ;;  %v5974_v3 = vrot.slane %v5031_v46, %v8205_v12  ;;  %v5982_v21 = vrot.slane %v5028_v18, %v8205_v12  ;;  %v5986_v4 = vrot.slane %v5030_v19, %v8205_v12  ;;  %v6865_v19 = vld [vmem:[%s10059_s4 + $0x7] ss:$0 sm:$0xff] }
 0x68c   :  { %v8662_v11 = vsel %vm6395_vm14, %v8525_v48, %v5966_v49  ;;  %v8666_v9 = vsel %vm6395_vm14, %v8529_v28, %v5970_v20  ;;  %v8670_v38 = vsel %vm6395_vm14, %v8533_v29, %v5978_v52  ;;  %v1540_v22 = vpack.c.bf16 %v1539_v55, %v1539_v55  ;;  %v1680_v58 = vpop.f32.mrf.mxu1 }
 0x68d   :  { %v5990_v13 = vrot.slane %v5032_v60, %v8205_v12  ;;  %v8675_v14 = vsel %vm6395_vm14, %v8538_v35, %v5974_v3  ;;  %v8679_v48 = vsel %vm6395_vm14, %v8542_v16, %v5982_v21  ;;  %v8683_v28 = vsel %vm6395_vm14, %v8546_v61, %v5986_v4  ;;  %v7860_v35 = vld [vmem:[%s10056_s3 + $0x70] sm:$0xff]  }
 0x68e   :  { %v1681_v41 = vadd.f32 %v6857_v6, %v1680_v58  ;;  %7509 = vmatmul.mubr.msk.bf16.vlgmr.msra.gmra.mxu0 %vm182_vm9, %v1540_v22  ;;  %v7516_v29 = vpop.f32.mrf.mxu1  ;;  %v8696_v16 = vunpack.c.l.b16 %v1837_v40  ;;  %v1876_v8 = vsel %vm100_vm6, %v1875_v27, %v1874_v30  ;;  %v7863_v40 = vld [vmem:[%s10058_s5 + $0x70] sm:$0xff]   ;;  %v2084_v42 = vrot.slane %v8609_v5, 1 }
 0x68f   :  { %v8689_v23 = vsel %vm6395_vm14, %v8552_v39, %v5990_v13  ;;  %7519 = vmatpush3.bf16.msra.mxu0 %v7859_v34  ;;  %7522 = vmatprep.mubr.msk.bf16.mxu0 %vm7929_vm1, %v7928_v0  ;;  %v2086_v7 = vrot.slane %v8604_v56, 7  ;;  %v2088_v55 = vrot.slane %v8615_v57, 6  ;;  %v2090_v6 = vrot.slane %v8623_v17, 5 }
 0x690   :  { %v1686_v61 = vmul.f32 0.1, %v1681_v41  ;;  %v1683_v26 = vpop.f32.mrf.mxu1  ;;  %7520 = vmatprep.subr.bf16.mxu0 %v7928_v0  ;;  %v1877_v62 = vrot.slane %v8696_v16, 1  ;;  %7529 = vmatpush3.bf16.msra.mxu1 %v7863_v40  ;;  %v2085_v45 = vsel %vm85_vm0, %v8596_v51, %v2084_v42 }
 0x691   :  { %7540 = vmatprep.subr.bf16.mxu1 %v7928_v0  ;;  %v2087_v52 = vsel %vm88_vm2, %v2086_v7, %v2085_v45 }
 0x692   :  { %v1687_v39 = vmax.f32 %v1681_v41, %v1686_v61  ;;  %v7517_v31 = vpop.f32.mrf.mxu1  ;;  %v1878_v47 = vsel %vm103_vm7, %v1877_v62, %v1876_v8  ;;  %v2092_v61 = vrot.slane %v8629_v32, 4 }
 0x693   :  { %7521 = vmatpush3.bf16.msra.mxu0 %v7860_v35  ;;  %v1879_v33 = vpack.c.b16 %v1878_v47, %v1878_v47  ;;  %v2089_v35 = vsel %vm91_vm3, %v2088_v55, %v2087_v52  ;;  %v2096_v52 = vrot.slane %v8696_v16, 2 }
 0x694   :  { %v1688_v37 = vpack.c.bf16 %v1687_v39, %v1687_v39  ;;  %7534 = vmatprep.subr.bf16.mxu0 %v7928_v0  ;;  %v2091_v45 = vsel %vm94_vm4, %v2090_v6, %v2089_v35  ;;  %v6874_v6 = vld [vmem:[%s10060_s6 + $0x7] ss:$0 sm:$0xff] }
 0x696   :  { %7523 = vmatmul.mubr.msk.bf16.vlgmr.msra.gmra.mxu0 %vm182_vm9, %v1688_v37 }
 0x697   :  { %7535 = vmatpush3.bf16.msra.mxu0 %v7861_v36  ;;  %7536 = vmatprep.mubr.msk.bf16.mxu0 %vm7929_vm1, %v7928_v0 }
 0x698   :  { %7548 = vmatprep.subr.bf16.mxu0 %v7928_v0 }
 0x69e   :  { %7537 = vmatmul.mubr.msk.bf16.vlgmr.msra.gmra.mxu0 %vm112_vm8, %v1879_v33 }
 0x69f   :  { %7552 = vmatprep.mubr.msk.bf16.mxu0 %vm7929_vm1, %v7928_v0 }
 0x74e   :  { %v1603_v10 = vpop.f32.mrf.mxu0 }
 0x74f   :  { %v1604_v2 = vadd.f32 %v6850_v1, %v1603_v10  ;;  %v6881_v1 = vld [vmem:[%s10057_s2 + $0x8] ss:$0 sm:$0xff] }
 0x750   :  { %v7510_v24 = vpop.f32.mrf.mxu0  ;;  %v7864_v10 = vld [vmem:[%s10056_s3 + $0x88] sm:$0xff]  }
 0x751   :  { %v1609_v43 = vmul.f32 0.1, %v1604_v2 }
 0x752   :  { %v1606_v44 = vpop.f32.mrf.mxu0 }
 0x753   :  { %v1610_v25 = vmax.f32 %v1604_v2, %v1609_v43 }
 0x754   :  { %v7511_v18 = vpop.f32.mrf.mxu0 }
 0x755   :  { %v5034_v46 = vcombine.high %v1610_v25, %v1610_v25  ;;  %v5041_v49 = vrot.slane %v1610_v25, %v8186_v50 }
 0x756   :  { %v1751_v20 = vpop.f32.mrf.mxu0 }
 0x757   :  { %v5048_v53 = vrot.slane %v5034_v46, %v8186_v50  ;;  %v5049_v60 = vcombine.high %v5041_v49, %v5041_v49  ;;  %v5057_v3 = vrot.slane %v5041_v49, %v8186_v50  ;;  %v1752_v21 = vadd.f32 %v6865_v19, %v1751_v20 }
 0x758   :  { %v7524_v4 = vpop.f32.mrf.mxu0  ;;  %v2094_v19 = vrot.slane %v8635_v63, 3  ;;  %v2093_v46 = vsel %vm97_vm5, %v2092_v61, %v2091_v45 }
 0x759   :  { %v5050_v34 = vcombine.high %v5048_v53, %v5048_v53  ;;  %v5064_v22 = vrot.slane %v5048_v53, %v8186_v50  ;;  %v5071_v58 = vrot.slane %v5049_v60, %v8186_v50  ;;  %v5079_v13 = vcombine.high %v5057_v3, %v5057_v3  ;;  %v7868_v4 = vld [vmem:[%s10058_s5 + $0x80] sm:$0xff]  }
 0x75a   :  { %v6002_v41 = vrot.slane %v5057_v3, %v8205_v12  ;;  %v1757_v29 = vmul.f32 0.1, %v1752_v21  ;;  %v1754_v15 = vpop.f32.mrf.mxu0  ;;  %v2095_v53 = vsel %vm100_vm6, %v2094_v19, %v2093_v46 }
 0x75b   :  { %v5078_v26 = vrot.slane %v5050_v34, %v8186_v50  ;;  %v5080_v27 = vcombine.high %v5064_v22, %v5064_v22  ;;  %v5081_v30 = vcombine.high %v5071_v58, %v5071_v58  ;;  %v6006_v39 = vrot.slane %v5071_v58, %v8205_v12 }
 0x75c   :  { %v6010_v31 = vrot.slane %v5079_v13, %v8205_v12  ;;  %v6018_v36 = vrot.slane %v5064_v22, %v8205_v12  ;;  %v8750_v62 = vsel %vm10062_vm15, %v8649_v54, %v6002_v41  ;;  %v1758_v37 = vmax.f32 %v1752_v21, %v1757_v29  ;;  %v7525_v8 = vpop.f32.mrf.mxu0  ;;  %v7867_v21 = vld [vmem:[%s10058_s5 + $0x88] sm:$0xff]  }
 0x75d   :  { %v5082_v47 = vcombine.high %v5078_v26, %v5078_v26  ;;  %v6014_v33 = vrot.slane %v5081_v30, %v8205_v12  ;;  %v6022_v59 = vrot.slane %v5078_v26, %v8205_v12  ;;  %v6026_v40 = vrot.slane %v5080_v27, %v8205_v12  ;;  %7549 = vmatpush3.bf16.msra.mxu0 %v7867_v21  ;;  %v6889_v27 = vld [vmem:[%s10059_s4 + $0x8] ss:$0 sm:$0xff] }
 0x75e   :  { %v8763_v54 = vsel %vm10062_vm15, %v8662_v11, %v6006_v39  ;;  %v8767_v2 = vsel %vm10062_vm15, %v8666_v9, %v6010_v31  ;;  %v8771_v42 = vsel %vm10062_vm15, %v8670_v38, %v6018_v36  ;;  %v1759_v24 = vpack.c.bf16 %v1758_v37, %v1758_v37  ;;  %v1923_v43 = vpop.f32.mrf.mxu0  ;;  %7550 = vmatprep.subr.bf16.mxu0 %v7928_v0 }
 0x75f   :  { %v6030_v44 = vrot.slane %v5082_v47, %v8205_v12  ;;  %v8776_v7 = vsel %vm10062_vm15, %v8675_v14, %v6014_v33  ;;  %v8780_v11 = vsel %vm10062_vm15, %v8679_v48, %v6022_v59  ;;  %v8784_v9 = vsel %vm10062_vm15, %v8683_v28, %v6026_v40  ;;  %v7865_v14 = vld [vmem:[%s10056_s3 + $0x80] sm:$0xff]  }
 0x760   :  { %v1924_v25 = vadd.f32 %v6881_v1, %v1923_v43  ;;  %7531 = vmatmul.mubr.msk.bf16.vlgmr.msra.gmra.mxu1 %vm182_vm9, %v1759_v24  ;;  %v7538_v38 = vpop.f32.mrf.mxu0  ;;  %v2097_v60 = vsel %vm103_vm7, %v2096_v52, %v2095_v53  ;;  %v2303_v58 = vrot.slane %v8609_v5, 2  ;;  %v2304_v13 = vrot.slane %v8596_v51, 1 }
 0x761   :  { %v8790_v18 = vsel %vm10062_vm15, %v8689_v23, %v6030_v44  ;;  %7541 = vmatpush3.bf16.msra.mxu1 %v7864_v10  ;;  %7544 = vmatprep.mubr.msk.bf16.mxu1 %vm7929_vm1, %v7928_v0  ;;  %v7866_v23 = vld [vmem:[%s10054_s1 + $0x48] sm:$0xff]   ;;  %v2098_v3 = vpack.c.b16 %v2097_v60, %v2097_v60  ;;  %v2307_v37 = vrot.slane %v8615_v57, 7  ;;  %vm6413_vm15 = vcmask 1046528  }
 0x762   :  { %v1929_v48 = vmul.f32 0.1, %v1924_v25  ;;  %v1926_v28 = vpop.f32.mrf.mxu0  ;;  %7542 = vmatprep.subr.bf16.mxu1 %v7928_v0  ;;  %7551 = vmatpush3.bf16.msra.mxu0 %v7868_v4  ;;  %v2305_v61 = vsel %vm85_vm0, %v2304_v13, %v2303_v58  ;;  %v2309_v1 = vrot.slane %v8623_v17, 6 }
 0x763   :  { %7562 = vmatprep.subr.bf16.mxu0 %v7928_v0  ;;  %v2306_v36 = vsel %vm88_vm2, %v8604_v56, %v2305_v61 }
 0x764   :  { %v1930_v49 = vmax.f32 %v1924_v25, %v1929_v48  ;;  %v7539_v20 = vpop.f32.mrf.mxu0  ;;  %v2311_v48 = vrot.slane %v8629_v32, 5 }
 0x765   :  { %7543 = vmatpush3.bf16.msra.mxu1 %v7865_v14  ;;  %v2308_v14 = vsel %vm91_vm3, %v2307_v37, %v2306_v36  ;;  %v2315_v36 = vrot.slane %v8696_v16, 3 }
 0x766   :  { %v1931_v55 = vpack.c.bf16 %v1930_v49, %v1930_v49  ;;  %7556 = vmatprep.subr.bf16.mxu1 %v7928_v0 }
 0x768   :  { %7545 = vmatmul.mubr.msk.bf16.vlgmr.msra.gmra.mxu1 %vm182_vm9, %v1931_v55 }
 0x769   :  { %7557 = vmatpush3.bf16.msra.mxu1 %v7866_v23  ;;  %7558 = vmatprep.mubr.msk.bf16.mxu1 %vm7929_vm1, %v7928_v0 }
 0x76a   :  { %7570 = vmatprep.subr.bf16.mxu1 %v7928_v0 }
 0x770   :  { %7559 = vmatmul.mubr.msk.bf16.vlgmr.msra.gmra.mxu1 %vm112_vm8, %v2098_v3 }
 0x771   :  { %7574 = vmatprep.mubr.msk.bf16.mxu1 %vm7929_vm1, %v7928_v0 }
 0x820   :  { %v1822_v34 = vpop.f32.mrf.mxu1 }
 0x821   :  { %v1823_v22 = vadd.f32 %v6874_v6, %v1822_v34  ;;  %v6905_v6 = vld [vmem:[%s10057_s2 + $0x9] ss:$0 sm:$0xff] }
 0x822   :  { %v7532_v41 = vpop.f32.mrf.mxu1 }
 0x823   :  { %v1828_v29 = vmul.f32 0.1, %v1823_v22 }
 0x824   :  { %v1825_v15 = vpop.f32.mrf.mxu1 }
 0x825   :  { %v1829_v35 = vmax.f32 %v1823_v22, %v1828_v29 }
 0x826   :  { %v7533_v26 = vpop.f32.mrf.mxu1 }
 0x827   :  { %v5084_v30 = vcombine.high %v1829_v35, %v1829_v35  ;;  %v5091_v39 = vrot.slane %v1829_v35, %v8186_v50 }
 0x828   :  { %v1994_v31 = vpop.f32.mrf.mxu1 }
 0x829   :  { %v5098_v8 = vrot.slane %v5084_v30, %v8186_v50  ;;  %v5099_v47 = vcombine.high %v5091_v39, %v5091_v39  ;;  %v5107_v33 = vrot.slane %v5091_v39, %v8186_v50  ;;  %v1995_v59 = vadd.f32 %v6889_v27, %v1994_v31  ;;  %v7871_v31 = vld [vmem:[%s10054_s1 + $0x50] sm:$0xff]  }
 0x82a   :  { %v7546_v40 = vpop.f32.mrf.mxu1  ;;  %v2313_v27 = vrot.slane %v8635_v63, 4 }
 0x82b   :  { %v5100_v10 = vcombine.high %v5098_v8, %v5098_v8  ;;  %v5114_v24 = vrot.slane %v5098_v8, %v8186_v50  ;;  %v5121_v43 = vrot.slane %v5099_v47, %v8186_v50  ;;  %v5129_v44 = vcombine.high %v5107_v33, %v5107_v33  ;;  %v7873_v40 = vld [vmem:[%s10058_s5 + $0x90] sm:$0xff]  }
 0x82c   :  { %v6042_v25 = vrot.slane %v5107_v33, %v8205_v12  ;;  %v2000_v38 = vmul.f32 0.1, %v1995_v59  ;;  %v1997_v45 = vpop.f32.mrf.mxu1 }
 0x82d   :  { %v5128_v28 = vrot.slane %v5100_v10, %v8186_v50  ;;  %v5130_v19 = vcombine.high %v5114_v24, %v5114_v24  ;;  %v5131_v46 = vcombine.high %v5121_v43, %v5121_v43  ;;  %v6046_v49 = vrot.slane %v5121_v43, %v8205_v12 }
 0x82e   :  { %v6050_v20 = vrot.slane %v5129_v44, %v8205_v12  ;;  %v6058_v23 = vrot.slane %v5114_v24, %v8205_v12  ;;  %v6414_v52 = vsel %vm6413_vm15, %v8750_v62, %v6042_v25  ;;  %v2001_v55 = vmax.f32 %v1995_v59, %v2000_v38  ;;  %v7547_v53 = vpop.f32.mrf.mxu1  ;;  %v7869_v62 = vld [vmem:[%s10056_s3 + $0x98] sm:$0xff]   ;;  %v6913_v38 = vld [vmem:[%s10059_s4 + $0x9] ss:$0 sm:$0xff] }
 0x82f   :  { %v5132_v60 = vcombine.high %v5128_v28, %v5128_v28  ;;  %v6054_v3 = vrot.slane %v5131_v46, %v8205_v12  ;;  %v6062_v21 = vrot.slane %v5128_v28, %v8205_v12  ;;  %v6066_v4 = vrot.slane %v5130_v19, %v8205_v12  ;;  %6670 = vst.msk [vmem:[%s10061_s7] sm:$0xff] %vm112_vm8, %v6414_v52  ;;  %v7872_v59 = vld [vmem:[%s10058_s5 + $0x98] sm:$0xff]  }
 0x830   :  { %v6415_v34 = vsel %vm6413_vm15, %v8763_v54, %v6046_v49  ;;  %v6416_v22 = vsel %vm6413_vm15, %v8767_v2, %v6050_v20  ;;  %v6418_v58 = vsel %vm6413_vm15, %v8771_v42, %v6058_v23  ;;  %v2002_v13 = vpack.c.bf16 %v2001_v55, %v2001_v55  ;;  %v2142_v41 = vpop.f32.mrf.mxu1  ;;  %7571 = vmatpush3.bf16.msra.mxu1 %v7872_v59  ;;  %v6929_v55 = vld [vmem:[%s10057_s2 + $0xa] ss:$0 sm:$0xff] }
 0x831   :  { %v6070_v29 = vrot.slane %v5132_v60, %v8205_v12  ;;  %v6417_v15 = vsel %vm6413_vm15, %v8776_v7, %v6054_v3  ;;  %v6419_v35 = vsel %vm6413_vm15, %v8780_v11, %v6062_v21  ;;  %v6420_v61 = vsel %vm6413_vm15, %v8784_v9, %v6066_v4  ;;  %6674 = vst.msk [vmem:[%s10061_s7 + $0x18] sm:$0xff] %vm112_vm8, %v6415_v34  ;;  %v7870_v11 = vld [vmem:[%s10056_s3 + $0x90] sm:$0xff]   ;;  %v7874_v60 = vld [vmem:[%s10056_s3 + $0xa8] sm:$0xff]  }
 0x832   :  { %6677 = vst.msk [vmem:[%s10061_s7 + $0x30] sm:$0xff] %vm112_vm8, %v6416_v22  ;;  %6683 = vst.msk [vmem:[%s10061_s7 + $0x60] sm:$0xff] %vm112_vm8, %v6418_v58  ;;  %v2143_v54 = vadd.f32 %v6905_v6, %v2142_v41  ;;  %7553 = vmatmul.mubr.msk.bf16.vlgmr.msra.gmra.mxu0 %vm182_vm9, %v2002_v13  ;;  %v7560_v2 = vpop.f32.mrf.mxu1  ;;  %v2310_v42 = vsel %vm94_vm4, %v2309_v1, %v2308_v14  ;;  %7572 = vmatprep.subr.bf16.mxu1 %v7928_v0  ;;  %v2522_v43 = vrot.slane %v8609_v5, 3  ;;  %v7875_v13 = vld [vmem:[%s10056_s3 + $0xa0] sm:$0xff]  }
 0x833   :  { %6680 = vst.msk [vmem:[%s10061_s7 + $0x48] sm:$0xff] %vm112_vm8, %v6417_v15  ;;  %6686 = vst.msk [vmem:[%s10061_s7 + $0x78] sm:$0xff] %vm112_vm8, %v6419_v35  ;;  %v6421_v7 = vsel %vm6413_vm15, %v8790_v18, %v6070_v29  ;;  %7563 = vmatpush3.bf16.msra.mxu0 %v7869_v62  ;;  %7566 = vmatprep.mubr.msk.bf16.mxu0 %vm7929_vm1, %v7928_v0  ;;  %v2312_v18 = vsel %vm97_vm5, %v2311_v48, %v2310_v42  ;;  %v2523_v44 = vrot.slane %v8596_v51, 2  ;;  %v7876_v2 = vld [vmem:[%s10054_s1 + $0x58] sm:$0xff]  }
 0x834   :  { %6689 = vst.msk [vmem:[%s10061_s7 + $0x90] sm:$0xff] %vm112_vm8, %v6420_v61  ;;  %6692 = vst.msk [vmem:[%s10061_s7 + $0xa8] sm:$0xff] %vm112_vm8, %v6421_v7  ;;  %v2148_v9 = vmul.f32 0.1, %v2143_v54  ;;  %v2145_v26 = vpop.f32.mrf.mxu1  ;;  %7564 = vmatprep.subr.bf16.mxu0 %v7928_v0  ;;  %v2314_v8 = vsel %vm100_vm6, %v2313_v27, %v2312_v18  ;;  %7573 = vmatpush3.bf16.msra.mxu1 %v7873_v40  ;;  %v2525_v14 = vrot.slane %v8604_v56, 1  ;;  %v2528_v53 = vrot.slane %v8623_v17, 7 }
 0x835   :  { %v2316_v47 = vsel %vm103_vm7, %v2315_v36, %v2314_v8  ;;  %7584 = vmatprep.subr.bf16.mxu1 %v7928_v0  ;;  %v2524_v28 = vsel %vm85_vm0, %v2523_v44, %v2522_v43  ;;  %v2530_v62 = vrot.slane %v8629_v32, 6  ;;  %v2532_v29 = vrot.slane %v8635_v63, 5  ;;  %v7877_v26 = vld [vmem:[%s10058_s5 + $0xa8] sm:$0xff]   ;;  %v7878_v27 = vld [vmem:[%s10058_s5 + $0xa0] sm:$0xff]  }
 0x836   :  { %v2149_v30 = vmax.f32 %v2143_v54, %v2148_v9  ;;  %v7561_v39 = vpop.f32.mrf.mxu1  ;;  %v2317_v33 = vpack.c.b16 %v2316_v47, %v2316_v47  ;;  %v2526_v20 = vsel %vm88_vm2, %v2525_v14, %v2524_v28  ;;  %v2534_v42 = vrot.slane %v8696_v16, 4  ;;  %v6898_v18 = vld [vmem:[%s10060_s6 + $0x8] ss:$0 sm:$0xff]  ;;  %v6922_v47 = vld [vmem:[%s10060_s6 + $0x9] ss:$0 sm:$0xff] }
 0x837   :  { %7565 = vmatpush3.bf16.msra.mxu0 %v7870_v11  ;;  %v2527_v3 = vsel %vm91_vm3, %v8615_v57, %v2526_v20  ;;  %v2741_v40 = vrot.slane %v8609_v5, 4  ;;  %v6937_v20 = vld [vmem:[%s10059_s4 + $0xa] ss:$0 sm:$0xff] }
 0x838   :  { %v2150_v37 = vpack.c.bf16 %v2149_v30, %v2149_v30  ;;  %7578 = vmatprep.subr.bf16.mxu0 %v7928_v0  ;;  %v2529_v22 = vsel %vm94_vm4, %v2528_v53, %v2527_v3 }
 0x839   :  { %v2531_v35 = vsel %vm97_vm5, %v2530_v62, %v2529_v22 }
 0x83a   :  { %7567 = vmatmul.mubr.msk.bf16.vlgmr.msra.gmra.mxu0 %vm182_vm9, %v2150_v37  ;;  %v2533_v7 = vsel %vm100_vm6, %v2532_v29, %v2531_v35 }
 0x83b   :  { %7579 = vmatpush3.bf16.msra.mxu0 %v7871_v31  ;;  %7580 = vmatprep.mubr.msk.bf16.mxu0 %vm7929_vm1, %v7928_v0  ;;  %v2535_v11 = vsel %vm103_vm7, %v2534_v42, %v2533_v7  ;;  %v2749_v7 = vrot.slane %v8629_v32, 7 }
 0x83c   :  { %7592 = vmatprep.subr.bf16.mxu0 %v7928_v0  ;;  %v2536_v9 = vpack.c.b16 %v2535_v11, %v2535_v11 }
 0x842   :  { %7581 = vmatmul.mubr.msk.bf16.vlgmr.msra.gmra.mxu0 %vm112_vm8, %v2317_v33 }
 0x843   :  { %7596 = vmatprep.mubr.msk.bf16.mxu0 %vm7929_vm1, %v7928_v0  ;;  %7593 = vmatpush3.bf16.msra.mxu0 %v7877_v26 }
 0x844   :  { %7594 = vmatprep.subr.bf16.mxu0 %v7928_v0 }
 0x847   :  { %7595 = vmatpush3.bf16.msra.mxu0 %v7878_v27 }
 0x848   :  { %7606 = vmatprep.subr.bf16.mxu0 %v7928_v0 }
 0x8f2   :  { %v2065_v1 = vpop.f32.mrf.mxu0 }
 0x8f3   :  { %v2066_v30 = vadd.f32 %v6898_v18, %v2065_v1 }
 0x8f4   :  { %v7554_v10 = vpop.f32.mrf.mxu0 }
 0x8f5   :  { %v2071_v39 = vmul.f32 0.1, %v2066_v30  ;;  %v2742_v10 = vrot.slane %v8596_v51, 3 }
 0x8f6   :  { %v2068_v24 = vpop.f32.mrf.mxu0 }
 0x8f7   :  { %v2072_v31 = vmax.f32 %v2066_v30, %v2071_v39  ;;  %v2743_v14 = vsel %vm85_vm0, %v2742_v10, %v2741_v40  ;;  %v7879_v40 = vld [vmem:[%s10056_s3 + $0xb8] sm:$0xff]  }
 0x8f8   :  { %v7555_v25 = vpop.f32.mrf.mxu0 }
 0x8f9   :  { %v5134_v36 = vcombine.high %v2072_v31, %v2072_v31  ;;  %v5141_v37 = vrot.slane %v2072_v31, %v8186_v50 }
 0x8fa   :  { %v2213_v45 = vpop.f32.mrf.mxu0 }
 0x8fb   :  { %v2214_v48 = vadd.f32 %v6913_v38, %v2213_v45  ;;  %v5148_v8 = vrot.slane %v5134_v36, %v8186_v50  ;;  %v5149_v24 = vcombine.high %v5141_v37, %v5141_v37  ;;  %v2744_v38 = vrot.slane %v8604_v56, 2 }
 0x8fc   :  { %v7568_v19 = vpop.f32.mrf.mxu0 }
 0x8fd   :  { %v2219_v46 = vmul.f32 0.1, %v2214_v48  ;;  %v5150_v43 = vcombine.high %v5148_v8, %v5148_v8  ;;  %v5164_v28 = vrot.slane %v5148_v8, %v8186_v50  ;;  %v5171_v19 = vrot.slane %v5149_v24, %v8186_v50 }
 0x8fe   :  { %v2216_v49 = vpop.f32.mrf.mxu0  ;;  %v2745_v53 = vsel %vm88_vm2, %v2744_v38, %v2743_v14 }
 0x8ff   :  { %v2220_v23 = vmax.f32 %v2214_v48, %v2219_v46  ;;  %v5157_v48 = vrot.slane %v5141_v37, %v8186_v50  ;;  %v5178_v46 = vrot.slane %v5150_v43, %v8186_v50  ;;  %v5181_v22 = vcombine.high %v5171_v19, %v5171_v19 }
 0x900   :  { %v7569_v52 = vpop.f32.mrf.mxu0 }
 0x901   :  { %v2221_v21 = vpack.c.bf16 %v2220_v23, %v2220_v23  ;;  %v5179_v62 = vcombine.high %v5157_v48, %v5157_v48 }
 0x902   :  { %v2361_v4 = vpop.f32.mrf.mxu0 }
 0x903   :  { %v2362_v6 = vadd.f32 %v6929_v55, %v2361_v4  ;;  %7575 = vmatmul.mubr.msk.bf16.vlgmr.msra.gmra.mxu1 %vm182_vm9, %v2221_v21 }
 0x904   :  { %v7582_v34 = vpop.f32.mrf.mxu0  ;;  %7585 = vmatpush3.bf16.msra.mxu1 %v7874_v60  ;;  %7588 = vmatprep.mubr.msk.bf16.mxu1 %vm7929_vm1, %v7928_v0  ;;  %v2746_v60 = vrot.slane %v8615_v57, 1 }
 0x905   :  { %v2367_v58 = vmul.f32 0.1, %v2362_v6  ;;  %7586 = vmatprep.subr.bf16.mxu1 %v7928_v0  ;;  %v5180_v34 = vcombine.high %v5164_v28, %v5164_v28 }
 0x906   :  { %v2364_v41 = vpop.f32.mrf.mxu0  ;;  %v2747_v42 = vsel %vm91_vm3, %v2746_v60, %v2745_v53 }
 0x907   :  { %v2368_v15 = vmax.f32 %v2362_v6, %v2367_v58  ;;  %v5182_v58 = vcombine.high %v5178_v46, %v5178_v46 }
 0x908   :  { %v7583_v61 = vpop.f32.mrf.mxu0  ;;  %7587 = vmatpush3.bf16.msra.mxu1 %v7875_v13 }
 0x909   :  { %v2369_v54 = vpack.c.bf16 %v2368_v15, %v2368_v15  ;;  %7600 = vmatprep.subr.bf16.mxu1 %v7928_v0 }
 0x90b   :  { %7589 = vmatmul.mubr.msk.bf16.vlgmr.msra.gmra.mxu1 %vm182_vm9, %v2369_v54 }
 0x90c   :  { %7601 = vmatpush3.bf16.msra.mxu1 %v7876_v2  ;;  %7602 = vmatprep.mubr.msk.bf16.mxu1 %vm7929_vm1, %v7928_v0 }
 0x90d   :  { %7614 = vmatprep.subr.bf16.mxu1 %v7928_v0 }
 0x913   :  { %7603 = vmatmul.mubr.msk.bf16.vlgmr.msra.gmra.mxu1 %vm112_vm8, %v2536_v9 }
 0x914   :  { %7618 = vmatprep.mubr.msk.bf16.mxu1 %vm7929_vm1, %v7928_v0 }
 0x9c3   :  { %v2284_v33 = vpop.f32.mrf.mxu1 }
 0x9c4   :  { %v2285_v59 = vadd.f32 %v6922_v47, %v2284_v33 }
 0x9c5   :  { %v7576_v1 = vpop.f32.mrf.mxu1 }
 0x9c6   :  { %v2290_v44 = vmul.f32 0.1, %v2285_v59 }
 0x9c7   :  { %v2287_v25 = vpop.f32.mrf.mxu1 }
 0x9c8   :  { %v2291_v45 = vmax.f32 %v2285_v59, %v2290_v44  ;;  %v6953_v59 = vld [vmem:[%s10057_s2 + $0xb] ss:$0 sm:$0xff] }
 0x9c9   :  { %v7577_v49 = vpop.f32.mrf.mxu1 }
 0x9ca   :  { %v5192_v23 = vcombine.high %v2291_v45, %v2291_v45  ;;  %v5199_v52 = vrot.slane %v2291_v45, %v8186_v50 }
 0x9cb   :  { %v2432_v55 = vpop.f32.mrf.mxu1 }
 0x9cc   :  { %v5206_v3 = vrot.slane %v5192_v23, %v8186_v50  ;;  %v5207_v21 = vcombine.high %v5199_v52, %v5199_v52  ;;  %v5215_v4 = vrot.slane %v5199_v52, %v8186_v50  ;;  %v2433_v6 = vadd.f32 %v6937_v20, %v2432_v55  ;;  %v7880_v20 = vld [vmem:[%s10056_s3 + $0xb0] sm:$0xff]  }
 0x9cd   :  { %v7590_v13 = vpop.f32.mrf.mxu1  ;;  %v2751_v52 = vrot.slane %v8635_v63, 6 }
 0x9ce   :  { %v5208_v41 = vcombine.high %v5206_v3, %v5206_v3  ;;  %v5222_v29 = vrot.slane %v5206_v3, %v8186_v50  ;;  %v5229_v15 = vrot.slane %v5207_v21, %v8186_v50  ;;  %v5237_v35 = vcombine.high %v5215_v4, %v5215_v4  ;;  %v7881_v3 = vld [vmem:[%s10054_s1 + $0x60] sm:$0xff]   ;;  %v6946_v13 = vld [vmem:[%s10060_s6 + $0xa] ss:$0 sm:$0xff] }
 0x9cf   :  { %v6082_v61 = vrot.slane %v5215_v4, %v8205_v12  ;;  %v2438_v54 = vmul.f32 0.1, %v2433_v6  ;;  %v2435_v2 = vpop.f32.mrf.mxu1  ;;  %v2753_v21 = vrot.slane %v8696_v16, 5 }
 0x9d0   :  { %v5236_v11 = vrot.slane %v5208_v41, %v8186_v50  ;;  %v5238_v9 = vcombine.high %v5222_v29, %v5222_v29  ;;  %v5239_v26 = vcombine.high %v5229_v15, %v5229_v15  ;;  %v6086_v27 = vrot.slane %v5229_v15, %v8205_v12 }
 0x9d1   :  { %v6090_v18 = vrot.slane %v5237_v35, %v8205_v12  ;;  %v6098_v30 = vrot.slane %v5222_v29, %v8205_v12  ;;  %v9021_v39 = vsel %vm10066_vm10, %v5157_v48, %v6082_v61  ;;  %v2439_v31 = vmax.f32 %v2433_v6, %v2438_v54  ;;  %v7591_v36 = vpop.f32.mrf.mxu1 }
 0x9d2   :  { %v5240_v37 = vcombine.high %v5236_v11, %v5236_v11  ;;  %v6094_v8 = vrot.slane %v5239_v26, %v8205_v12  ;;  %v6102_v47 = vrot.slane %v5236_v11, %v8205_v12  ;;  %v6106_v33 = vrot.slane %v5238_v9, %v8205_v12  ;;  %v6961_v26 = vld [vmem:[%s10059_s4 + $0xb] ss:$0 sm:$0xff] }
 0x9d3   :  { %v9033_v10 = vsel %vm10066_vm10, %v5171_v19, %v6086_v27  ;;  %v9036_v24 = vsel %vm10066_vm10, %v5179_v62, %v6090_v18  ;;  %v9039_v43 = vsel %vm10066_vm10, %v5164_v28, %v6098_v30  ;;  %v2440_v1 = vpack.c.bf16 %v2439_v31, %v2439_v31  ;;  %v2580_v44 = vpop.f32.mrf.mxu1 }
 0x9d4   :  { %v6110_v25 = vrot.slane %v5240_v37, %v8205_v12  ;;  %v9043_v38 = vsel %vm10066_vm10, %v5181_v22, %v6094_v8  ;;  %v9046_v45 = vsel %vm10066_vm10, %v5178_v46, %v6102_v47  ;;  %v9049_v14 = vsel %vm10066_vm10, %v5180_v34, %v6106_v33  ;;  %v7882_v22 = vld [vmem:[%s10058_s5 + $0xb8] sm:$0xff]  }
 0x9d5   :  { %v2581_v48 = vadd.f32 %v6953_v59, %v2580_v44  ;;  %7597 = vmatmul.mubr.msk.bf16.vlgmr.msra.gmra.mxu0 %vm182_vm9, %v2440_v1  ;;  %v7604_v19 = vpop.f32.mrf.mxu1  ;;  %v2748_v28 = vsel %vm94_vm4, %v8623_v17, %v2747_v42  ;;  %7615 = vmatpush3.bf16.msra.mxu1 %v7882_v22  ;;  %v2960_v15 = vrot.slane %v8609_v5, 5  ;;  %v2961_v35 = vrot.slane %v8596_v51, 4 }
 0x9d6   :  { %v9055_v49 = vsel %vm10066_vm10, %v5182_v58, %v6110_v25  ;;  %7607 = vmatpush3.bf16.msra.mxu0 %v7879_v40  ;;  %7610 = vmatprep.mubr.msk.bf16.mxu0 %vm7929_vm1, %v7928_v0  ;;  %v2750_v55 = vsel %vm97_vm5, %v2749_v7, %v2748_v28  ;;  %v7883_v58 = vld [vmem:[%s10058_s5 + $0xb0] sm:$0xff]   ;;  %v2963_v42 = vrot.slane %v8604_v56, 3  ;;  %v2965_v36 = vrot.slane %v8615_v57, 2 }
 0x9d7   :  { %v2586_v46 = vmul.f32 0.1, %v2581_v48  ;;  %v2583_v23 = vpop.f32.mrf.mxu1  ;;  %7608 = vmatprep.subr.bf16.mxu0 %v7928_v0  ;;  %v2752_v6 = vsel %vm100_vm6, %v2751_v52, %v2750_v55  ;;  %7616 = vmatprep.subr.bf16.mxu1 %v7928_v0  ;;  %v2962_v11 = vsel %vm85_vm0, %v2961_v35, %v2960_v15 }
 0x9d8   :  { %v2754_v62 = vsel %vm103_vm7, %v2753_v21, %v2752_v6  ;;  %v2964_v31 = vsel %vm88_vm2, %v2963_v42, %v2962_v11 }
 0x9d9   :  { %v2587_v53 = vmax.f32 %v2581_v48, %v2586_v46  ;;  %v7605_v60 = vpop.f32.mrf.mxu1  ;;  %v2755_v34 = vpack.c.b16 %v2754_v62, %v2754_v62  ;;  %7617 = vmatpush3.bf16.msra.mxu1 %v7883_v58  ;;  %v2967_v46 = vrot.slane %v8623_v17, 1 }
 0x9da   :  { %7609 = vmatpush3.bf16.msra.mxu0 %v7880_v20  ;;  %7628 = vmatprep.subr.bf16.mxu1 %v7928_v0  ;;  %v2966_v20 = vsel %vm91_vm3, %v2965_v36, %v2964_v31 }
 0x9db   :  { %v2588_v4 = vpack.c.bf16 %v2587_v53, %v2587_v53  ;;  %7622 = vmatprep.subr.bf16.mxu0 %v7928_v0 }
 0x9dd   :  { %7611 = vmatmul.mubr.msk.bf16.vlgmr.msra.gmra.mxu0 %vm182_vm9, %v2588_v4 }
 0x9de   :  { %7623 = vmatpush3.bf16.msra.mxu0 %v7881_v3  ;;  %7624 = vmatprep.mubr.msk.bf16.mxu0 %vm7929_vm1, %v7928_v0 }
 0x9df   :  { %7636 = vmatprep.subr.bf16.mxu0 %v7928_v0 }
 0x9e5   :  { %7625 = vmatmul.mubr.msk.bf16.vlgmr.msra.gmra.mxu0 %vm112_vm8, %v2755_v34 }
 0x9e6   :  { %7640 = vmatprep.mubr.msk.bf16.mxu0 %vm7929_vm1, %v7928_v0 }
 0xa95   :  { %v2503_v41 = vpop.f32.mrf.mxu0 }
 0xa96   :  { %v2504_v29 = vadd.f32 %v6946_v13, %v2503_v41  ;;  %v6977_v13 = vld [vmem:[%s10057_s2 + $0xc] ss:$0 sm:$0xff] }
 0xa97   :  { %v7598_v61 = vpop.f32.mrf.mxu0  ;;  %v7884_v41 = vld [vmem:[%s10056_s3 + $0xc8] sm:$0xff]  }
 0xa98   :  { %v2509_v54 = vmul.f32 0.1, %v2504_v29 }
 0xa99   :  { %v2506_v2 = vpop.f32.mrf.mxu0 }
 0xa9a   :  { %v2510_v7 = vmax.f32 %v2504_v29, %v2509_v54 }
 0xa9b   :  { %v7599_v9 = vpop.f32.mrf.mxu0 }
 0xa9c   :  { %v5242_v27 = vcombine.high %v2510_v7, %v2510_v7  ;;  %v5249_v18 = vrot.slane %v2510_v7, %v8186_v50  ;;  %v2968_v7 = vsel %vm94_vm4, %v2967_v46, %v2966_v20  ;;  %v2970_v9 = vrot.slane %v8635_v63, 7 }
 0xa9d   :  { %v2651_v30 = vpop.f32.mrf.mxu0  ;;  %v3182_v20 = vrot.slane %v8604_v56, 4 }
 0xa9e   :  { %v5256_v37 = vrot.slane %v5242_v27, %v8186_v50  ;;  %v5257_v8 = vcombine.high %v5249_v18, %v5249_v18  ;;  %v5265_v47 = vrot.slane %v5249_v18, %v8186_v50  ;;  %v2652_v33 = vadd.f32 %v6961_v26, %v2651_v30  ;;  %v7886_v18 = vld [vmem:[%s10054_s1 + $0x68] sm:$0xff]  }
 0xa9f   :  { %v7612_v59 = vpop.f32.mrf.mxu0  ;;  %v2969_v26 = vsel %vm97_vm5, %v8629_v32, %v2968_v7  ;;  %v2972_v30 = vrot.slane %v8696_v16, 6 }
 0xaa0   :  { %v5258_v40 = vcombine.high %v5256_v37, %v5256_v37  ;;  %v5272_v1 = vrot.slane %v5256_v37, %v8186_v50  ;;  %v5279_v44 = vrot.slane %v5257_v8, %v8186_v50  ;;  %v5287_v25 = vcombine.high %v5265_v47, %v5265_v47  ;;  %v6970_v59 = vld [vmem:[%s10060_s6 + $0xb] ss:$0 sm:$0xff] }
 0xaa1   :  { %v6122_v48 = vrot.slane %v5265_v47, %v8205_v12  ;;  %v2657_v19 = vmul.f32 0.1, %v2652_v33  ;;  %v2654_v28 = vpop.f32.mrf.mxu0  ;;  %v2971_v36 = vsel %vm100_vm6, %v2970_v9, %v2969_v26  ;;  %v7887_v47 = vld [vmem:[%s10058_s5 + $0xc8] sm:$0xff]  }
 0xaa2   :  { %v5286_v23 = vrot.slane %v5258_v40, %v8186_v50  ;;  %v5288_v52 = vcombine.high %v5272_v1, %v5272_v1  ;;  %v5289_v55 = vcombine.high %v5279_v44, %v5279_v44  ;;  %v6126_v53 = vrot.slane %v5279_v44, %v8205_v12  ;;  %7637 = vmatpush3.bf16.msra.mxu0 %v7887_v47 }
 0xaa3   :  { %v6130_v60 = vrot.slane %v5287_v25, %v8205_v12  ;;  %v6138_v3 = vrot.slane %v5272_v1, %v8205_v12  ;;  %v9113_v21 = vsel %vm10065_vm11, %v9021_v39, %v6122_v48  ;;  %v2658_v4 = vmax.f32 %v2652_v33, %v2657_v19  ;;  %v7613_v6 = vpop.f32.mrf.mxu0  ;;  %7638 = vmatprep.subr.bf16.mxu0 %v7928_v0  ;;  %v7888_v33 = vld [vmem:[%s10058_s5 + $0xc0] sm:$0xff]  }
 0xaa4   :  { %v5290_v62 = vcombine.high %v5286_v23, %v5286_v23  ;;  %v6134_v34 = vrot.slane %v5289_v55, %v8205_v12  ;;  %v6142_v22 = vrot.slane %v5286_v23, %v8205_v12  ;;  %v6146_v58 = vrot.slane %v5288_v52, %v8205_v12  ;;  %v6985_v55 = vld [vmem:[%s10059_s4 + $0xc] ss:$0 sm:$0xff] }
 0xaa5   :  { %v9126_v39 = vsel %vm10065_vm11, %v9033_v10, %v6126_v53  ;;  %v9130_v29 = vsel %vm10065_vm11, %v9036_v24, %v6130_v60  ;;  %v9134_v15 = vsel %vm10065_vm11, %v9039_v43, %v6138_v3  ;;  %v2659_v35 = vpack.c.bf16 %v2658_v4, %v2658_v4  ;;  %v2799_v61 = vpop.f32.mrf.mxu0 }
 0xaa6   :  { %v6150_v54 = vrot.slane %v5290_v62, %v8205_v12  ;;  %v9139_v2 = vsel %vm10065_vm11, %v9043_v38, %v6134_v34  ;;  %v9143_v10 = vsel %vm10065_vm11, %v9046_v45, %v6142_v22  ;;  %v9147_v24 = vsel %vm10065_vm11, %v9049_v14, %v6146_v58  ;;  %v7885_v38 = vld [vmem:[%s10056_s3 + $0xc0] sm:$0xff]   ;;  %7639 = vmatpush3.bf16.msra.mxu0 %v7888_v33 }
 0xaa7   :  { %v2800_v42 = vadd.f32 %v6977_v13, %v2799_v61  ;;  %7619 = vmatmul.mubr.msk.bf16.vlgmr.msra.gmra.mxu1 %vm182_vm9, %v2659_v35  ;;  %v7626_v43 = vpop.f32.mrf.mxu0  ;;  %v2973_v37 = vsel %vm103_vm7, %v2972_v30, %v2971_v36  ;;  %7650 = vmatprep.subr.bf16.mxu0 %v7928_v0  ;;  %v3179_v44 = vrot.slane %v8609_v5, 6  ;;  %v3180_v25 = vrot.slane %v8596_v51, 5 }
 0xaa8   :  { %v9153_v11 = vsel %vm10065_vm11, %v9055_v49, %v6150_v54  ;;  %7629 = vmatpush3.bf16.msra.mxu1 %v7884_v41  ;;  %7632 = vmatprep.mubr.msk.bf16.mxu1 %vm7929_vm1, %v7928_v0  ;;  %v2974_v8 = vpack.c.b16 %v2973_v37, %v2973_v37  ;;  %v3184_v6 = vrot.slane %v8615_v57, 3  ;;  %v3186_v41 = vrot.slane %v8623_v17, 2 }
 0xaa9   :  { %v2805_v45 = vmul.f32 0.1, %v2800_v42  ;;  %v2802_v14 = vpop.f32.mrf.mxu0  ;;  %7630 = vmatprep.subr.bf16.mxu1 %v7928_v0  ;;  %v3181_v23 = vsel %vm85_vm0, %v3180_v25, %v3179_v44 }
 0xaaa   :  { %v3183_v4 = vsel %vm88_vm2, %v3182_v20, %v3181_v23  ;;  %v3188_v14 = vrot.slane %v8629_v32, 1 }
 0xaab   :  { %v2806_v27 = vmax.f32 %v2800_v42, %v2805_v45  ;;  %v7627_v49 = vpop.f32.mrf.mxu0  ;;  %v3185_v45 = vsel %vm91_vm3, %v3184_v6, %v3183_v4 }
 0xaac   :  { %7631 = vmatpush3.bf16.msra.mxu1 %v7885_v38  ;;  %v3187_v23 = vsel %vm94_vm4, %v3186_v41, %v3185_v45 }
 0xaad   :  { %v2807_v31 = vpack.c.bf16 %v2806_v27, %v2806_v27  ;;  %7644 = vmatprep.subr.bf16.mxu1 %v7928_v0 }
 0xaaf   :  { %7633 = vmatmul.mubr.msk.bf16.vlgmr.msra.gmra.mxu1 %vm182_vm9, %v2807_v31 }
 0xab0   :  { %7645 = vmatpush3.bf16.msra.mxu1 %v7886_v18  ;;  %7646 = vmatprep.mubr.msk.bf16.mxu1 %vm7929_vm1, %v7928_v0 }
 0xab1   :  { %7658 = vmatprep.subr.bf16.mxu1 %v7928_v0 }
 0xab7   :  { %7647 = vmatmul.mubr.msk.bf16.vlgmr.msra.gmra.mxu1 %vm112_vm8, %v2974_v8 }
 0xab8   :  { %7662 = vmatprep.mubr.msk.bf16.mxu1 %vm7929_vm1, %v7928_v0 }
 0xb67   :  { %v2722_v40 = vpop.f32.mrf.mxu1 }
 0xb68   :  { %v2723_v1 = vadd.f32 %v6970_v59, %v2722_v40  ;;  %v7001_v40 = vld [vmem:[%s10057_s2 + $0xd] ss:$0 sm:$0xff] }
 0xb69   :  { %v7620_v48 = vpop.f32.mrf.mxu1 }
 0xb6a   :  { %v2728_v19 = vmul.f32 0.1, %v2723_v1 }
 0xb6b   :  { %v2725_v28 = vpop.f32.mrf.mxu1 }
 0xb6c   :  { %v2729_v46 = vmax.f32 %v2723_v1, %v2728_v19  ;;  %v7889_v1 = vld [vmem:[%s10056_s3 + $0xd8] sm:$0xff]  }
 0xb6d   :  { %v7621_v52 = vpop.f32.mrf.mxu1 }
 0xb6e   :  { %v5292_v53 = vcombine.high %v2729_v46, %v2729_v46  ;;  %v5299_v60 = vrot.slane %v2729_v46, %v8186_v50 }
 0xb6f   :  { %v2870_v3 = vpop.f32.mrf.mxu1 }
 0xb70   :  { %v5306_v62 = vrot.slane %v5292_v53, %v8186_v50  ;;  %v5307_v34 = vcombine.high %v5299_v60, %v5299_v60  ;;  %v5315_v22 = vrot.slane %v5299_v60, %v8186_v50  ;;  %v2871_v58 = vadd.f32 %v6985_v55, %v2870_v3 }
 0xb71   :  { %v7634_v13 = vpop.f32.mrf.mxu1  ;;  %v3189_v55 = vsel %vm97_vm5, %v3188_v14, %v3187_v23  ;;  %v3191_v3 = vrot.slane %v8696_v16, 7 }
 0xb72   :  { %v5308_v35 = vcombine.high %v5306_v62, %v5306_v62  ;;  %v5322_v61 = vrot.slane %v5306_v62, %v8186_v50  ;;  %v5329_v54 = vrot.slane %v5307_v34, %v8186_v50  ;;  %v5337_v42 = vcombine.high %v5315_v22, %v5315_v22  ;;  %v6994_v13 = vld [vmem:[%s10060_s6 + $0xc] ss:$0 sm:$0xff] }
 0xb73   :  { %v6162_v43 = vrot.slane %v5315_v22, %v8205_v12  ;;  %v2876_v7 = vmul.f32 0.1, %v2871_v58  ;;  %v2873_v38 = vpop.f32.mrf.mxu1  ;;  %v3190_v6 = vsel %vm100_vm6, %v8635_v63, %v3189_v55  ;;  %v7892_v22 = vld [vmem:[%s10058_s5 + $0xd8] sm:$0xff]  }
 0xb74   :  { %v5336_v9 = vrot.slane %v5308_v35, %v8186_v50  ;;  %v5338_v26 = vcombine.high %v5322_v61, %v5322_v61  ;;  %v5339_v27 = vcombine.high %v5329_v54, %v5329_v54  ;;  %v6166_v49 = vrot.slane %v5329_v54, %v8205_v12  ;;  %7659 = vmatpush3.bf16.msra.mxu1 %v7892_v22 }
 0xb75   :  { %v6170_v18 = vrot.slane %v5337_v42, %v8205_v12  ;;  %v6178_v30 = vrot.slane %v5322_v61, %v8205_v12  ;;  %v9213_v31 = vsel %vm10064_vm12, %v9113_v21, %v6162_v43  ;;  %v2877_v36 = vmax.f32 %v2871_v58, %v2876_v7  ;;  %v7635_v37 = vpop.f32.mrf.mxu1  ;;  %7660 = vmatprep.subr.bf16.mxu1 %v7928_v0  ;;  %v7893_v58 = vld [vmem:[%s10058_s5 + $0xd0] sm:$0xff]  }
 0xb76   :  { %v5340_v8 = vcombine.high %v5336_v9, %v5336_v9  ;;  %v6174_v47 = vrot.slane %v5339_v27, %v8205_v12  ;;  %v6182_v33 = vrot.slane %v5336_v9, %v8205_v12  ;;  %v6186_v59 = vrot.slane %v5338_v26, %v8205_v12  ;;  %v7009_v26 = vld [vmem:[%s10059_s4 + $0xd] ss:$0 sm:$0xff] }
 0xb77   :  { %v9226_v21 = vsel %vm10064_vm12, %v9126_v39, %v6166_v49  ;;  %v9230_v44 = vsel %vm10064_vm12, %v9130_v29, %v6170_v18  ;;  %v9234_v25 = vsel %vm10064_vm12, %v9134_v15, %v6178_v30  ;;  %v2878_v48 = vpack.c.bf16 %v2877_v36, %v2877_v36  ;;  %v3018_v19 = vpop.f32.mrf.mxu1 }
 0xb78   :  { %v6190_v28 = vrot.slane %v5340_v8, %v8205_v12  ;;  %v9239_v20 = vsel %vm10064_vm12, %v9139_v2, %v6174_v47  ;;  %v9243_v39 = vsel %vm10064_vm12, %v9143_v10, %v6182_v33  ;;  %v9247_v29 = vsel %vm10064_vm12, %v9147_v24, %v6186_v59  ;;  %v7890_v2 = vld [vmem:[%s10056_s3 + $0xd0] sm:$0xff]   ;;  %7661 = vmatpush3.bf16.msra.mxu1 %v7893_v58 }
 0xb79   :  { %v3019_v46 = vadd.f32 %v7001_v40, %v3018_v19  ;;  %7641 = vmatmul.mubr.msk.bf16.vlgmr.msra.gmra.mxu0 %vm182_vm9, %v2878_v48  ;;  %v7648_v15 = vpop.f32.mrf.mxu1  ;;  %v3192_v62 = vsel %vm103_vm7, %v3191_v3, %v3190_v6  ;;  %7672 = vmatprep.subr.bf16.mxu1 %v7928_v0  ;;  %v3398_v61 = vrot.slane %v8609_v5, 7  ;;  %v3399_v54 = vrot.slane %v8596_v51, 6  ;;  %v7025_v6 = vld [vmem:[%s10057_s2 + $0xe] ss:$0 sm:$0xff] }
 0xb7a   :  { %v9253_v52 = vsel %vm10064_vm12, %v9153_v11, %v6190_v28  ;;  %7651 = vmatpush3.bf16.msra.mxu0 %v7889_v1  ;;  %7654 = vmatprep.mubr.msk.bf16.mxu0 %vm7929_vm1, %v7928_v0  ;;  %v7891_v11 = vld [vmem:[%s10054_s1 + $0x70] sm:$0xff]   ;;  %v3193_v34 = vpack.c.b16 %v3192_v62, %v3192_v62  ;;  %v3401_v38 = vrot.slane %v8604_v56, 5  ;;  %v3403_v51 = vrot.slane %v8615_v57, 4  ;;  %v7894_v62 = vld [vmem:[%s10056_s3 + $0xe8] sm:$0xff]  }
 0xb7b   :  { %v3024_v10 = vmul.f32 0.1, %v3019_v46  ;;  %v3021_v24 = vpop.f32.mrf.mxu1  ;;  %7652 = vmatprep.subr.bf16.mxu0 %v7928_v0  ;;  %v3400_v14 = vsel %vm85_vm0, %v3399_v54, %v3398_v61  ;;  %v3405_v47 = vrot.slane %v8623_v17, 3 }
 0xb7c   :  { %v3402_v5 = vsel %vm88_vm2, %v3401_v38, %v3400_v14 }
 0xb7d   :  { %v3025_v53 = vmax.f32 %v3019_v46, %v3024_v10  ;;  %v7649_v60 = vpop.f32.mrf.mxu1  ;;  %v3404_v57 = vsel %vm91_vm3, %v3403_v51, %v3402_v5  ;;  %v3407_v46 = vrot.slane %v8629_v32, 2  ;;  %v29_v51 = vld [vmem:[%s10055_s0 + $0x10] sm:$0x1f] }
 0xb7e   :  { %7653 = vmatpush3.bf16.msra.mxu0 %v7890_v2  ;;  %v3406_v54 = vsel %vm94_vm4, %v3405_v47, %v3404_v57  ;;  %v41_v47 = vld [vmem:[%s10055_s0 + $0x70] sm:$0x1f] }
 0xb7f   :  { %v3026_v4 = vpack.c.bf16 %v3025_v53, %v3025_v53  ;;  %7666 = vmatprep.subr.bf16.mxu0 %v7928_v0 }
 0xb81   :  { %7655 = vmatmul.mubr.msk.bf16.vlgmr.msra.gmra.mxu0 %vm182_vm9, %v3026_v4 }
 0xb82   :  { %7667 = vmatpush3.bf16.msra.mxu0 %v7891_v11  ;;  %7668 = vmatprep.mubr.msk.bf16.mxu0 %vm7929_vm1, %v7928_v0 }
 0xb83   :  { %7680 = vmatprep.subr.bf16.mxu0 %v7928_v0 }
 0xb89   :  { %7669 = vmatmul.mubr.msk.bf16.vlgmr.msra.gmra.mxu0 %vm112_vm8, %v3193_v34 }
 0xb8a   :  { %7684 = vmatprep.mubr.msk.bf16.mxu0 %vm7929_vm1, %v7928_v0 }
 0xc39   :  { %v2941_v41 = vpop.f32.mrf.mxu0 }
 0xc3a   :  { %v2942_v35 = vadd.f32 %v6994_v13, %v2941_v41 }
 0xc3b   :  { %v7642_v42 = vpop.f32.mrf.mxu0 }
 0xc3c   :  { %v2947_v43 = vmul.f32 0.1, %v2942_v35 }
 0xc3d   :  { %v2944_v7 = vpop.f32.mrf.mxu0 }
 0xc3e   :  { %v2948_v45 = vmax.f32 %v2942_v35, %v2947_v43  ;;  %v3409_v43 = vrot.slane %v8635_v63, 1  ;;  %v3408_v7 = vsel %vm97_vm5, %v3407_v46, %v3406_v54  ;;  %v3610_v46 = vpack.c.bf16 %v41_v47, %v41_v47 }
 0xc3f   :  { %v7643_v9 = vpop.f32.mrf.mxu0 }
 0xc40   :  { %v5342_v27 = vcombine.high %v2948_v45, %v2948_v45  ;;  %v5349_v49 = vrot.slane %v2948_v45, %v8186_v50  ;;  %v3410_v9 = vsel %vm100_vm6, %v3409_v43, %v3408_v7 }
 0xc41   :  { %v3089_v18 = vpop.f32.mrf.mxu0  ;;  %v3411_v63 = vsel %vm103_vm7, %v8696_v16, %v3410_v9  ;;  %v32_v16 = vld [vmem:[%s10055_s0 + $0x28] sm:$0x1f] }
 0xc42   :  { %v5356_v30 = vrot.slane %v5342_v27, %v8186_v50  ;;  %v5357_v36 = vcombine.high %v5349_v49, %v5349_v49  ;;  %v5365_v56 = vrot.slane %v5349_v49, %v8186_v50  ;;  %v3090_v37 = vadd.f32 %v7009_v26, %v3089_v18  ;;  %v7897_v27 = vld [vmem:[%s10058_s5 + $0xe8] sm:$0xff]   ;;  %v7898_v49 = vld [vmem:[%s10058_s5 + $0xe0] sm:$0xff]  }
 0xc43   :  { %v7656_v8 = vpop.f32.mrf.mxu0  ;;  %v3412_v26 = vpack.c.b16 %v3411_v63, %v3411_v63  ;;  %7681 = vmatpush3.bf16.msra.mxu0 %v7897_v27  ;;  %v35_v18 = vld [vmem:[%s10055_s0 + $0x40] sm:$0x1f]  ;;  %v3607_v5 = vpack.c.bf16 %v32_v16, %v32_v16 }
 0xc44   :  { %v5358_v33 = vcombine.high %v5356_v30, %v5356_v30  ;;  %v5372_v59 = vrot.slane %v5356_v30, %v8186_v50  ;;  %v5379_v40 = vrot.slane %v5357_v36, %v8186_v50  ;;  %v5387_v1 = vcombine.high %v5365_v56, %v5365_v56  ;;  %7682 = vmatprep.subr.bf16.mxu0 %v7928_v0  ;;  %v38_v36 = vld [vmem:[%s10055_s0 + $0x58] sm:$0x1f]  ;;  %v7018_v8 = vld [vmem:[%s10060_s6 + $0xd] ss:$0 sm:$0xff] }
 0xc45   :  { %v6202_v48 = vrot.slane %v5365_v56, %v8205_v12  ;;  %v3095_v19 = vmul.f32 0.1, %v3090_v37  ;;  %v3092_v28 = vpop.f32.mrf.mxu0  ;;  %v3608_v30 = vpack.c.bf16 %v35_v18, %v35_v18  ;;  %v3606_v56 = vpack.c.bf16 %v29_v51, %v29_v51 }
 0xc46   :  { %v5386_v15 = vrot.slane %v5358_v33, %v8186_v50  ;;  %v5388_v23 = vcombine.high %v5372_v59, %v5372_v59  ;;  %v5389_v2 = vcombine.high %v5379_v40, %v5379_v40  ;;  %v6206_v17 = vrot.slane %v5379_v40, %v8205_v12 }
 0xc47   :  { %v6210_v10 = vrot.slane %v5387_v1, %v8205_v12  ;;  %v6218_v24 = vrot.slane %v5372_v59, %v8205_v12  ;;  %v9312_v55 = vsel %vm10063_vm13, %v9213_v31, %v6202_v48  ;;  %v3096_v53 = vmax.f32 %v3090_v37, %v3095_v19  ;;  %v7657_v60 = vpop.f32.mrf.mxu0  ;;  %7683 = vmatpush3.bf16.msra.mxu0 %v7898_v49  ;;  %v44_v48 = vld [vmem:[%s10055_s0 + $0x88] sm:$0x1f] }
 0xc48   :  { %v5390_v11 = vcombine.high %v5386_v15, %v5386_v15  ;;  %v6214_v3 = vrot.slane %v5389_v2, %v8205_v12  ;;  %v6222_v32 = vrot.slane %v5386_v15, %v8205_v12  ;;  %v6226_v4 = vrot.slane %v5388_v23, %v8205_v12  ;;  %7694 = vmatprep.subr.bf16.mxu0 %v7928_v0  ;;  %v47_v23 = vld [vmem:[%s10055_s0 + $0xa0] sm:$0x1f] }
 0xc49   :  { %v9325_v31 = vsel %vm10063_vm13, %v9226_v21, %v6206_v17  ;;  %v9329_v34 = vsel %vm10063_vm13, %v9230_v44, %v6210_v10  ;;  %v9333_v22 = vsel %vm10063_vm13, %v9234_v25, %v6218_v24  ;;  %v3097_v58 = vpack.c.bf16 %v3096_v53, %v3096_v53  ;;  %v3237_v13 = vpop.f32.mrf.mxu0 }
 0xc4a   :  { %v6230_v41 = vrot.slane %v5390_v11, %v8205_v12  ;;  %v9338_v35 = vsel %vm10063_vm13, %v9239_v20, %v6214_v3  ;;  %v9342_v21 = vsel %vm10063_vm13, %v9243_v39, %v6222_v32  ;;  %v9346_v44 = vsel %vm10063_vm13, %v9247_v29, %v6226_v4  ;;  %v7895_v20 = vld [vmem:[%s10056_s3 + $0xe0] sm:$0xff]   ;;  %v7033_v3 = vld [vmem:[%s10059_s4 + $0xe] ss:$0 sm:$0xff] }
 0xc4b   :  { %v3238_v61 = vadd.f32 %v7025_v6, %v3237_v13  ;;  %7663 = vmatmul.mubr.msk.bf16.vlgmr.msra.gmra.mxu1 %vm182_vm9, %v3097_v58  ;;  %v7670_v25 = vpop.f32.mrf.mxu0  ;;  %v9396_v37 = vunpack.c.l.b16 %v3607_v5  ;;  %v3609_v59 = vpack.c.bf16 %v38_v36, %v38_v36  ;;  %v9404_v40 = vunpack.c.l.b16 %v3608_v30  ;;  %v50_v58 = vld [vmem:[%s10055_s0 + $0xb8] sm:$0x1f] }
 0xc4c   :  { %v9352_v42 = vsel %vm10063_vm13, %v9253_v52, %v6230_v41  ;;  %7673 = vmatpush3.bf16.msra.mxu1 %v7894_v62  ;;  %7676 = vmatprep.mubr.msk.bf16.mxu1 %vm7929_vm1, %v7928_v0  ;;  %v7896_v52 = vld [vmem:[%s10054_s1 + $0x78] sm:$0xff]   ;;  %v9409_v19 = vunpack.c.l.b16 %v3606_v56  ;;  %v3611_v17 = vpack.c.bf16 %v44_v48, %v44_v48  ;;  %v3612_v32 = vpack.c.bf16 %v47_v23, %v47_v23 }
 0xc4d   :  { %v3243_v39 = vmul.f32 0.1, %v3238_v61  ;;  %v3240_v29 = vpop.f32.mrf.mxu0  ;;  %7674 = vmatprep.subr.bf16.mxu1 %v7928_v0  ;;  %v3641_v28 = vrot.slane %v9396_v37, 7  ;;  %v9415_v10 = vunpack.c.l.b16 %v3609_v59  ;;  %v3643_v24 = vrot.slane %v9404_v40, 6 }
 0xc4e   :  { %v9423_v4 = vunpack.c.l.b16 %v3610_v46  ;;  %v9429_v41 = vunpack.c.l.b16 %v3611_v17  ;;  %v3613_v7 = vpack.c.bf16 %v50_v58, %v50_v58  ;;  %v7049_v46 = vld [vmem:[%s10057_s2 + $0xf] ss:$0 sm:$0xff] }
 0xc4f   :  { %v3244_v38 = vmax.f32 %v3238_v61, %v3243_v39  ;;  %v7671_v45 = vpop.f32.mrf.mxu0  ;;  %v3642_v60 = vsel %vm85_vm0, %v3641_v28, %v9409_v19  ;;  %v3645_v25 = vrot.slane %v9415_v10, 5 }
 0xc50   :  { %7675 = vmatpush3.bf16.msra.mxu1 %v7895_v20  ;;  %v3644_v61 = vsel %vm88_vm2, %v3643_v24, %v3642_v60  ;;  %v3647_v45 = vrot.slane %v9423_v4, 4  ;;  %v3649_v18 = vrot.slane %v9429_v41, 3 }
 0xc51   :  { %v3245_v14 = vpack.c.bf16 %v3244_v38, %v3244_v38  ;;  %7688 = vmatprep.subr.bf16.mxu1 %v7928_v0  ;;  %v9435_v38 = vunpack.c.l.b16 %v3612_v32  ;;  %v3646_v16 = vsel %vm91_vm3, %v3645_v25, %v3644_v61  ;;  %v7901_v61 = vld [vmem:[%s10054_s1 + $0x80] sm:$0xff]  }
 0xc53   :  { %7677 = vmatmul.mubr.msk.bf16.vlgmr.msra.gmra.mxu1 %vm182_vm9, %v3245_v14 }
 0xc54   :  { %7689 = vmatpush3.bf16.msra.mxu1 %v7896_v52  ;;  %7690 = vmatprep.mubr.msk.bf16.mxu1 %vm7929_vm1, %v7928_v0 }
 0xc55   :  { %7702 = vmatprep.subr.bf16.mxu1 %v7928_v0 }
 0xc5b   :  { %7691 = vmatmul.mubr.msk.bf16.vlgmr.msra.gmra.mxu1 %vm112_vm8, %v3412_v26 }
 0xc5c   :  { %7706 = vmatprep.mubr.msk.bf16.mxu1 %vm7929_vm1, %v7928_v0 }
 0xd0b   :  { %v3160_v33 = vpop.f32.mrf.mxu1 }
 0xd0c   :  { %v3161_v1 = vadd.f32 %v7018_v8, %v3160_v33 }
 0xd0d   :  { %v7664_v57 = vpop.f32.mrf.mxu1 }
 0xd0e   :  { %v3166_v15 = vmul.f32 0.1, %v3161_v1 }
 0xd0f   :  { %v3163_v2 = vpop.f32.mrf.mxu1 }
 0xd10   :  { %v3167_v53 = vmax.f32 %v3161_v1, %v3166_v15  ;;  %v7899_v15 = vld [vmem:[%s10056_s3 + $0xf8] sm:$0xff]  }
 0xd11   :  { %v7665_v11 = vpop.f32.mrf.mxu1 }
 0xd12   :  { %v5392_v6 = vcombine.high %v3167_v53, %v3167_v53  ;;  %v5399_v62 = vrot.slane %v3167_v53, %v8186_v50 }
 0xd13   :  { %v3308_v13 = vpop.f32.mrf.mxu1 }
 0xd14   :  { %v5406_v54 = vrot.slane %v5392_v6, %v8186_v50  ;;  %v5407_v20 = vcombine.high %v5399_v62, %v5399_v62  ;;  %v5415_v39 = vrot.slane %v5399_v62, %v8186_v50  ;;  %v3309_v29 = vadd.f32 %v7033_v3, %v3308_v13 }
 0xd15   :  { %v7678_v43 = vpop.f32.mrf.mxu1  ;;  %v3648_v3 = vsel %vm94_vm4, %v3647_v45, %v3646_v16  ;;  %v3651_v62 = vrot.slane %v9435_v38, 2  ;;  %v7042_v45 = vld [vmem:[%s10060_s6 + $0xe] ss:$0 sm:$0xff] }
 0xd16   :  { %v5408_v52 = vcombine.high %v5406_v54, %v5406_v54  ;;  %v5422_v14 = vrot.slane %v5406_v54, %v8186_v50  ;;  %v5429_v9 = vrot.slane %v5407_v20, %v8186_v50  ;;  %v5437_v63 = vcombine.high %v5415_v39, %v5415_v39  ;;  %v7902_v43 = vld [vmem:[%s10058_s5 + $0xf8] sm:$0xff]  }
 0xd17   :  { %v6242_v26 = vrot.slane %v5415_v39, %v8205_v12  ;;  %v3314_v27 = vmul.f32 0.1, %v3309_v29  ;;  %v3311_v49 = vpop.f32.mrf.mxu1  ;;  %v3650_v58 = vsel %vm97_vm5, %v3649_v18, %v3648_v3  ;;  %7703 = vmatpush3.bf16.msra.mxu1 %v7902_v43 }
 0xd18   :  { %v5436_v5 = vrot.slane %v5408_v52, %v8186_v50  ;;  %v5438_v51 = vcombine.high %v5422_v14, %v5422_v14  ;;  %v5439_v30 = vcombine.high %v5429_v9, %v5429_v9  ;;  %v6246_v36 = vrot.slane %v5429_v9, %v8205_v12  ;;  %7704 = vmatprep.subr.bf16.mxu1 %v7928_v0 }
 0xd19   :  { %v6250_v56 = vrot.slane %v5437_v63, %v8205_v12  ;;  %v6258_v8 = vrot.slane %v5422_v14, %v8205_v12  ;;  %v9449_v47 = vsel %vm6395_vm14, %v9312_v55, %v6242_v26  ;;  %v3315_v33 = vmax.f32 %v3309_v29, %v3314_v27  ;;  %v7679_v59 = vpop.f32.mrf.mxu1 }
 0xd1a   :  { %v5440_v1 = vcombine.high %v5436_v5, %v5436_v5  ;;  %v6254_v48 = vrot.slane %v5439_v30, %v8205_v12  ;;  %v6262_v28 = vrot.slane %v5436_v5, %v8205_v12  ;;  %v6266_v57 = vrot.slane %v5438_v51, %v8205_v12  ;;  %v7057_v51 = vld [vmem:[%s10059_s4 + $0xf] ss:$0 sm:$0xff] }
 0xd1b   :  { %v9462_v55 = vsel %vm6395_vm14, %v9325_v31, %v6246_v36  ;;  %v9466_v23 = vsel %vm6395_vm14, %v9329_v34, %v6250_v56  ;;  %v9470_v2 = vsel %vm6395_vm14, %v9333_v22, %v6258_v8  ;;  %v3316_v17 = vpack.c.bf16 %v3315_v33, %v3315_v33  ;;  %v3456_v24 = vpop.f32.mrf.mxu1 }
 0xd1c   :  { %v6270_v53 = vrot.slane %v5440_v1, %v8205_v12  ;;  %v9475_v60 = vsel %vm6395_vm14, %v9338_v35, %v6254_v48  ;;  %v9479_v31 = vsel %vm6395_vm14, %v9342_v21, %v6262_v28  ;;  %v9483_v34 = vsel %vm6395_vm14, %v9346_v44, %v6266_v57  ;;  %v7900_v35 = vld [vmem:[%s10056_s3 + $0xf0] sm:$0xff]  }
 0xd1d   :  { %v3457_v11 = vadd.f32 %v7049_v46, %v3456_v24  ;;  %7685 = vmatmul.mubr.msk.bf16.vlgmr.msra.gmra.mxu0 %vm182_vm9, %v3316_v17  ;;  %v7692_v22 = vpop.f32.mrf.mxu1  ;;  %v9496_v21 = vunpack.c.l.b16 %v3613_v7  ;;  %v3652_v20 = vsel %vm100_vm6, %v3651_v62, %v3650_v58  ;;  %v7903_v7 = vld [vmem:[%s10058_s5 + $0xf0] sm:$0xff]   ;;  %v3860_v9 = vrot.slane %v9409_v19, 1 }
 0xd1e   :  { %v9489_v32 = vsel %vm6395_vm14, %v9352_v42, %v6270_v53  ;;  %7695 = vmatpush3.bf16.msra.mxu0 %v7899_v15  ;;  %7698 = vmatprep.mubr.msk.bf16.mxu0 %vm7929_vm1, %v7928_v0  ;;  %v3862_v49 = vrot.slane %v9404_v40, 7  ;;  %v3864_v33 = vrot.slane %v9415_v10, 6  ;;  %v3866_v46 = vrot.slane %v9423_v4, 5 }
 0xd1f   :  { %v3462_v44 = vmul.f32 0.1, %v3457_v11  ;;  %v3459_v6 = vpop.f32.mrf.mxu1  ;;  %7696 = vmatprep.subr.bf16.mxu0 %v7928_v0  ;;  %v3653_v25 = vrot.slane %v9496_v21, 1  ;;  %7705 = vmatpush3.bf16.msra.mxu1 %v7903_v7  ;;  %v3861_v18 = vsel %vm85_vm0, %v9396_v37, %v3860_v9  ;;  %vm10067_vm14 = vcmask 1045504  }
 0xd20   :  { %7716 = vmatprep.subr.bf16.mxu1 %v7928_v0  ;;  %v3863_v8 = vsel %vm88_vm2, %v3862_v49, %v3861_v18  ;;  %vm10068_vm13 = vmmov %vm10067_vm14 }
 0xd21   :  { %v3463_v42 = vmax.f32 %v3457_v11, %v3462_v44  ;;  %v7693_v13 = vpop.f32.mrf.mxu1  ;;  %v3654_v39 = vsel %vm103_vm7, %v3653_v25, %v3652_v20  ;;  %v3868_v44 = vrot.slane %v9429_v41, 4  ;;  %vm10069_vm12 = vmmov %vm10068_vm13 }
 0xd22   :  { %7697 = vmatpush3.bf16.msra.mxu0 %v7900_v35  ;;  %v3655_v29 = vpack.c.b16 %v3654_v39, %v3654_v39  ;;  %v3865_v35 = vsel %vm91_vm3, %v3864_v33, %v3863_v8  ;;  %vm10070_vm11 = vmmov %vm10069_vm12  ;;  %v3872_v8 = vrot.slane %v9496_v21, 2 }
 0xd23   :  { %v3464_v54 = vpack.c.bf16 %v3463_v42, %v3463_v42  ;;  %7710 = vmatprep.subr.bf16.mxu0 %v7928_v0  ;;  %vm10071_vm10 = vmmov %vm10070_vm11  ;;  %v3867_v18 = vsel %vm94_vm4, %v3866_v46, %v3865_v35  ;;  %v7066_v46 = vld [vmem:[%s10060_s6 + $0xf] ss:$0 sm:$0xff] }
 0xd25   :  { %7699 = vmatmul.mubr.msk.bf16.vlgmr.msra.gmra.mxu0 %vm182_vm9, %v3464_v54 }
 0xd26   :  { %7711 = vmatpush3.bf16.msra.mxu0 %v7901_v61  ;;  %7712 = vmatprep.mubr.msk.bf16.mxu0 %vm7929_vm1, %v7928_v0 }
 0xd27   :  { %7724 = vmatprep.subr.bf16.mxu0 %v7928_v0 }
 0xd2d   :  { %7713 = vmatmul.mubr.msk.bf16.vlgmr.msra.gmra.mxu0 %vm112_vm8, %v3655_v29 }
 0xd2e   :  { %7728 = vmatprep.mubr.msk.bf16.mxu0 %vm7929_vm1, %v7928_v0 }
 0xddd   :  { %v3379_v52 = vpop.f32.mrf.mxu0 }
 0xdde   :  { %v3380_v14 = vadd.f32 %v7042_v45, %v3379_v52  ;;  %v7073_v45 = vld [vmem:[%s10057_s2 + $0x10] ss:$0 sm:$0xff]  ;;  %v7904_v52 = vld [vmem:[%s10056_s3 + $0x108] sm:$0xff]  }
 0xddf   :  { %v7686_v63 = vpop.f32.mrf.mxu0 }
 0xde0   :  { %v3385_v26 = vmul.f32 0.1, %v3380_v14 }
 0xde1   :  { %v3382_v27 = vpop.f32.mrf.mxu0 }
 0xde2   :  { %v3386_v16 = vmax.f32 %v3380_v14, %v3385_v26 }
 0xde3   :  { %v7687_v5 = vpop.f32.mrf.mxu0 }
 0xde4   :  { %v5442_v30 = vcombine.high %v3386_v16, %v3386_v16  ;;  %v5449_v36 = vrot.slane %v3386_v16, %v8186_v50 }
 0xde5   :  { %v3527_v56 = vpop.f32.mrf.mxu0 }
 0xde6   :  { %v5456_v59 = vrot.slane %v5442_v30, %v8186_v50  ;;  %v5457_v1 = vcombine.high %v5449_v36, %v5449_v36  ;;  %v5465_v48 = vrot.slane %v5449_v36, %v8186_v50  ;;  %v3528_v28 = vadd.f32 %v7057_v51, %v3527_v56 }
 0xde7   :  { %v7700_v57 = vpop.f32.mrf.mxu0  ;;  %v3870_v51 = vrot.slane %v9435_v38, 3  ;;  %v3869_v30 = vsel %vm97_vm5, %v3868_v44, %v3867_v18 }
 0xde8   :  { %v5458_v15 = vcombine.high %v5456_v59, %v5456_v59  ;;  %v5472_v17 = vrot.slane %v5456_v59, %v8186_v50  ;;  %v5479_v24 = vrot.slane %v5457_v1, %v8186_v50  ;;  %v5487_v53 = vcombine.high %v5465_v48, %v5465_v48  ;;  %v7908_v57 = vld [vmem:[%s10058_s5 + $0x100] sm:$0xff]  }
 0xde9   :  { %v6282_v11 = vrot.slane %v5465_v48, %v8205_v12  ;;  %v3533_v22 = vmul.f32 0.1, %v3528_v28  ;;  %v3530_v3 = vpop.f32.mrf.mxu0  ;;  %v3871_v59 = vsel %vm100_vm6, %v3870_v51, %v3869_v30 }
 0xdea   :  { %v5486_v6 = vrot.slane %v5458_v15, %v8186_v50  ;;  %v5488_v62 = vcombine.high %v5472_v17, %v5472_v17  ;;  %v5489_v58 = vcombine.high %v5479_v24, %v5479_v24  ;;  %v6286_v42 = vrot.slane %v5479_v24, %v8205_v12 }
 0xdeb   :  { %v6290_v13 = vrot.slane %v5487_v53, %v8205_v12  ;;  %v6298_v61 = vrot.slane %v5472_v17, %v8205_v12  ;;  %v9550_v25 = vsel %vm10067_vm14, %v9449_v47, %v6282_v11  ;;  %v3534_v54 = vmax.f32 %v3528_v28, %v3533_v22  ;;  %v7701_v20 = vpop.f32.mrf.mxu0  ;;  %v7907_v28 = vld [vmem:[%s10058_s5 + $0x108] sm:$0xff]  }
 0xdec   :  { %v5490_v39 = vcombine.high %v5486_v6, %v5486_v6  ;;  %v6294_v29 = vrot.slane %v5489_v58, %v8205_v12  ;;  %v6302_v43 = vrot.slane %v5486_v6, %v8205_v12  ;;  %v6306_v7 = vrot.slane %v5488_v62, %v8205_v12  ;;  %7725 = vmatpush3.bf16.msra.mxu0 %v7907_v28  ;;  %v7081_v62 = vld [vmem:[%s10059_s4 + $0x10] ss:$0 sm:$0xff] }
 0xded   :  { %v9563_v47 = vsel %vm10067_vm14, %v9462_v55, %v6286_v42  ;;  %v9567_v14 = vsel %vm10068_vm13, %v9466_v23, %v6290_v13  ;;  %v9571_v9 = vsel %vm10069_vm12, %v9470_v2, %v6298_v61  ;;  %v3535_v63 = vpack.c.bf16 %v3534_v54, %v3534_v54  ;;  %v3699_v26 = vpop.f32.mrf.mxu0  ;;  %vm10072_vm14 = vmmov %vm10071_vm10  ;;  %7726 = vmatprep.subr.bf16.mxu0 %v7928_v0 }
 0xdee   :  { %v6310_v27 = vrot.slane %v5490_v39, %v8205_v12  ;;  %v9576_v49 = vsel %vm10070_vm11, %v9475_v60, %v6294_v29  ;;  %v9580_v55 = vsel %vm10071_vm10, %v9479_v31, %v6302_v43  ;;  %v9584_v23 = vsel %vm10072_vm14, %v9483_v34, %v6306_v7  ;;  %vm10073_vm12 = vmmov %vm10071_vm10  ;;  %v7905_v60 = vld [vmem:[%s10056_s3 + $0x100] sm:$0xff]  }
 0xdef   :  { %v3700_v16 = vadd.f32 %v7073_v45, %v3699_v26  ;;  %7707 = vmatmul.mubr.msk.bf16.vlgmr.msra.gmra.mxu1 %vm182_vm9, %v3535_v63  ;;  %v7714_v2 = vpop.f32.mrf.mxu0  ;;  %v3873_v1 = vsel %vm103_vm7, %v3872_v8, %v3871_v59  ;;  %v4079_v24 = vrot.slane %v9409_v19, 2  ;;  %v4080_v53 = vrot.slane %v9396_v37, 1 }
 0xdf0   :  { %v9590_v5 = vsel %vm10073_vm12, %v9489_v32, %v6310_v27  ;;  %7717 = vmatpush3.bf16.msra.mxu1 %v7904_v52  ;;  %7720 = vmatprep.mubr.msk.bf16.mxu1 %vm7929_vm1, %v7928_v0  ;;  %v7906_v32 = vld [vmem:[%s10054_s1 + $0x88] sm:$0xff]   ;;  %v3874_v48 = vpack.c.b16 %v3873_v1, %v3873_v1  ;;  %v4083_v54 = vrot.slane %v9415_v10, 7  ;;  %v4085_v45 = vrot.slane %v9423_v4, 6 }
 0xdf1   :  { %v3705_v31 = vmul.f32 0.1, %v3700_v16  ;;  %v3702_v34 = vpop.f32.mrf.mxu0  ;;  %7718 = vmatprep.subr.bf16.mxu1 %v7928_v0  ;;  %7727 = vmatpush3.bf16.msra.mxu0 %v7908_v57  ;;  %v4081_v44 = vsel %vm85_vm0, %v4080_v53, %v4079_v24 }
 0xdf2   :  { %7738 = vmatprep.subr.bf16.mxu0 %v7928_v0  ;;  %v4082_v61 = vsel %vm88_vm2, %v9404_v40, %v4081_v44 }
 0xdf3   :  { %v3706_v36 = vmax.f32 %v3700_v16, %v3705_v31  ;;  %v7715_v56 = vpop.f32.mrf.mxu0  ;;  %v4087_v31 = vrot.slane %v9429_v41, 5 }
 0xdf4   :  { %7719 = vmatpush3.bf16.msra.mxu1 %v7905_v60  ;;  %v4084_v60 = vsel %vm91_vm3, %v4083_v54, %v4082_v61  ;;  %v4091_v61 = vrot.slane %v9496_v21, 3 }
 0xdf5   :  { %v3707_v33 = vpack.c.bf16 %v3706_v36, %v3706_v36  ;;  %7732 = vmatprep.subr.bf16.mxu1 %v7928_v0 }
 0xdf7   :  { %7721 = vmatmul.mubr.msk.bf16.vlgmr.msra.gmra.mxu1 %vm182_vm9, %v3707_v33 }
 0xdf8   :  { %7733 = vmatpush3.bf16.msra.mxu1 %v7906_v32  ;;  %7734 = vmatprep.mubr.msk.bf16.mxu1 %vm7929_vm1, %v7928_v0 }
 0xdf9   :  { %7746 = vmatprep.subr.bf16.mxu1 %v7928_v0 }
 0xdff   :  { %7735 = vmatmul.mubr.msk.bf16.vlgmr.msra.gmra.mxu1 %vm112_vm8, %v3874_v48 }
 0xe00   :  { %7750 = vmatprep.mubr.msk.bf16.mxu1 %vm7929_vm1, %v7928_v0 }
 0xeaf   :  { %v3598_v15 = vpop.f32.mrf.mxu1 }
 0xeb0   :  { %v3599_v17 = vadd.f32 %v7066_v46, %v3598_v15  ;;  %v7097_v46 = vld [vmem:[%s10057_s2 + $0x11] ss:$0 sm:$0xff] }
 0xeb1   :  { %v7708_v11 = vpop.f32.mrf.mxu1 }
 0xeb2   :  { %v3604_v22 = vmul.f32 0.1, %v3599_v17 }
 0xeb3   :  { %v3601_v3 = vpop.f32.mrf.mxu1 }
 0xeb4   :  { %v3605_v35 = vmax.f32 %v3599_v17, %v3604_v22 }
 0xeb5   :  { %v7709_v6 = vpop.f32.mrf.mxu1 }
 0xeb6   :  { %v5492_v58 = vcombine.high %v3605_v35, %v3605_v35  ;;  %v5499_v42 = vrot.slane %v3605_v35, %v8186_v50 }
 0xeb7   :  { %v3770_v13 = vpop.f32.mrf.mxu1 }
 0xeb8   :  { %v5506_v20 = vrot.slane %v5492_v58, %v8186_v50  ;;  %v5507_v39 = vcombine.high %v5499_v42, %v5499_v42  ;;  %v5515_v29 = vrot.slane %v5499_v42, %v8186_v50  ;;  %v3771_v43 = vadd.f32 %v7081_v62, %v3770_v13  ;;  %v7911_v13 = vld [vmem:[%s10054_s1 + $0x90] sm:$0xff]  }
 0xeb9   :  { %v7722_v7 = vpop.f32.mrf.mxu1  ;;  %v4089_v62 = vrot.slane %v9435_v38, 4 }
 0xeba   :  { %v5508_v52 = vcombine.high %v5506_v20, %v5506_v20  ;;  %v5522_v63 = vrot.slane %v5506_v20, %v8186_v50  ;;  %v5529_v26 = vrot.slane %v5507_v39, %v8186_v50  ;;  %v5537_v27 = vcombine.high %v5515_v29, %v5515_v29  ;;  %v7913_v7 = vld [vmem:[%s10058_s5 + $0x110] sm:$0xff]  }
 0xebb   :  { %v6322_v16 = vrot.slane %v5515_v29, %v8205_v12  ;;  %v3776_v2 = vmul.f32 0.1, %v3771_v43  ;;  %v3773_v18 = vpop.f32.mrf.mxu1 }
 0xebc   :  { %v5536_v34 = vrot.slane %v5508_v52, %v8186_v50  ;;  %v5538_v51 = vcombine.high %v5522_v63, %v5522_v63  ;;  %v5539_v30 = vcombine.high %v5529_v26, %v5529_v26  ;;  %v6326_v36 = vrot.slane %v5529_v26, %v8205_v12 }
 0xebd   :  { %v6330_v56 = vrot.slane %v5537_v27, %v8205_v12  ;;  %v6338_v32 = vrot.slane %v5522_v63, %v8205_v12  ;;  %v6470_v8 = vsel %vm6413_vm15, %v9550_v25, %v6322_v16  ;;  %v3777_v33 = vmax.f32 %v3771_v43, %v3776_v2  ;;  %v7723_v59 = vpop.f32.mrf.mxu1  ;;  %v7909_v25 = vld [vmem:[%s10056_s3 + $0x118] sm:$0xff]   ;;  %v7105_v2 = vld [vmem:[%s10059_s4 + $0x11] ss:$0 sm:$0xff] }
 0xebe   :  { %v5540_v1 = vcombine.high %v5536_v34, %v5536_v34  ;;  %v6334_v48 = vrot.slane %v5539_v30, %v8205_v12  ;;  %v6342_v28 = vrot.slane %v5536_v34, %v8205_v12  ;;  %v6346_v57 = vrot.slane %v5538_v51, %v8205_v12  ;;  %6671 = vst.msk [vmem:[%s10061_s7 + $0x8] sm:$0xff] %vm112_vm8, %v6470_v8  ;;  %v7912_v43 = vld [vmem:[%s10058_s5 + $0x118] sm:$0xff]  }
 0xebf   :  { %v6471_v15 = vsel %vm6413_vm15, %v9563_v47, %v6326_v36  ;;  %v6472_v17 = vsel %vm6413_vm15, %v9567_v14, %v6330_v56  ;;  %v6474_v24 = vsel %vm6413_vm15, %v9571_v9, %v6338_v32  ;;  %v3778_v53 = vpack.c.bf16 %v3777_v33, %v3777_v33  ;;  %v3918_v11 = vpop.f32.mrf.mxu1  ;;  %7747 = vmatpush3.bf16.msra.mxu1 %v7912_v43  ;;  %v7121_v33 = vld [vmem:[%s10057_s2 + $0x12] ss:$0 sm:$0xff] }
 0xec0   :  { %v6350_v22 = vrot.slane %v5540_v1, %v8205_v12  ;;  %v6473_v3 = vsel %vm6413_vm15, %v9576_v49, %v6334_v48  ;;  %v6475_v35 = vsel %vm6413_vm15, %v9580_v55, %v6342_v28  ;;  %v6476_v44 = vsel %vm6413_vm15, %v9584_v23, %v6346_v57  ;;  %6675 = vst.msk [vmem:[%s10061_s7 + $0x20] sm:$0xff] %vm112_vm8, %v6471_v15  ;;  %v7910_v55 = vld [vmem:[%s10056_s3 + $0x110] sm:$0xff]   ;;  %v7914_v1 = vld [vmem:[%s10056_s3 + $0x128] sm:$0xff]  }
 0xec1   :  { %6678 = vst.msk [vmem:[%s10061_s7 + $0x38] sm:$0xff] %vm112_vm8, %v6472_v17  ;;  %6684 = vst.msk [vmem:[%s10061_s7 + $0x68] sm:$0xff] %vm112_vm8, %v6474_v24  ;;  %v3919_v47 = vadd.f32 %v7097_v46, %v3918_v11  ;;  %7729 = vmatmul.mubr.msk.bf16.vlgmr.msra.gmra.mxu0 %vm182_vm9, %v3778_v53  ;;  %v7736_v14 = vpop.f32.mrf.mxu1  ;;  %v4086_v9 = vsel %vm94_vm4, %v4085_v45, %v4084_v60  ;;  %7748 = vmatprep.subr.bf16.mxu1 %v7928_v0  ;;  %v4298_v26 = vrot.slane %v9409_v19, 3  ;;  %v7915_v53 = vld [vmem:[%s10056_s3 + $0x120] sm:$0xff]  }
 0xec2   :  { %6681 = vst.msk [vmem:[%s10061_s7 + $0x50] sm:$0xff] %vm112_vm8, %v6473_v3  ;;  %6687 = vst.msk [vmem:[%s10061_s7 + $0x80] sm:$0xff] %vm112_vm8, %v6475_v35  ;;  %v6477_v49 = vsel %vm6413_vm15, %v9590_v5, %v6350_v22  ;;  %7739 = vmatpush3.bf16.msra.mxu0 %v7909_v25  ;;  %7742 = vmatprep.mubr.msk.bf16.mxu0 %vm7929_vm1, %v7928_v0  ;;  %v4088_v5 = vsel %vm97_vm5, %v4087_v31, %v4086_v9  ;;  %v4299_v27 = vrot.slane %v9396_v37, 2  ;;  %v7916_v14 = vld [vmem:[%s10054_s1 + $0x98] sm:$0xff]  }
 0xec3   :  { %6690 = vst.msk [vmem:[%s10061_s7 + $0x98] sm:$0xff] %vm112_vm8, %v6476_v44  ;;  %6693 = vst.msk [vmem:[%s10061_s7 + $0xb0] sm:$0xff] %vm112_vm8, %v6477_v49  ;;  %v3924_v23 = vmul.f32 0.1, %v3919_v47  ;;  %v3921_v6 = vpop.f32.mrf.mxu1  ;;  %7740 = vmatprep.subr.bf16.mxu0 %v7928_v0  ;;  %v4090_v20 = vsel %vm100_vm6, %v4089_v62, %v4088_v5  ;;  %7749 = vmatpush3.bf16.msra.mxu1 %v7913_v7  ;;  %v4301_v60 = vrot.slane %v9404_v40, 1  ;;  %v4304_v59 = vrot.slane %v9423_v4, 7 }
 0xec4   :  { %v4092_v39 = vsel %vm103_vm7, %v4091_v61, %v4090_v20  ;;  %7760 = vmatprep.subr.bf16.mxu1 %v7928_v0  ;;  %v4300_v34 = vsel %vm85_vm0, %v4299_v27, %v4298_v26  ;;  %v4306_v25 = vrot.slane %v9429_v41, 6  ;;  %v4308_v22 = vrot.slane %v9435_v38, 5  ;;  %v7917_v6 = vld [vmem:[%s10058_s5 + $0x128] sm:$0xff]   ;;  %v7918_v62 = vld [vmem:[%s10058_s5 + $0x120] sm:$0xff]   ;;  %v7090_v5 = vld [vmem:[%s10060_s6 + $0x10] ss:$0 sm:$0xff] }
 0xec5   :  { %v3925_v58 = vmax.f32 %v3919_v47, %v3924_v23  ;;  %v7737_v42 = vpop.f32.mrf.mxu1  ;;  %v4093_v29 = vpack.c.b16 %v4092_v39, %v4092_v39  ;;  %v4302_v56 = vsel %vm88_vm2, %v4301_v60, %v4300_v34  ;;  %v4310_v9 = vrot.slane %v9496_v21, 4  ;;  %v7114_v39 = vld [vmem:[%s10060_s6 + $0x11] ss:$0 sm:$0xff] }
 0xec6   :  { %7741 = vmatpush3.bf16.msra.mxu0 %v7910_v55  ;;  %v4303_v48 = vsel %vm91_vm3, %v9415_v10, %v4302_v56  ;;  %v4517_v7 = vrot.slane %v9409_v19, 4 }
 0xec7   :  { %v3926_v54 = vpack.c.bf16 %v3925_v58, %v3925_v58  ;;  %7754 = vmatprep.subr.bf16.mxu0 %v7928_v0  ;;  %v4305_v17 = vsel %vm94_vm4, %v4304_v59, %v4303_v48 }
 0xec8   :  { %v4307_v35 = vsel %vm97_vm5, %v4306_v25, %v4305_v17 }
 0xec9   :  { %7743 = vmatmul.mubr.msk.bf16.vlgmr.msra.gmra.mxu0 %vm182_vm9, %v3926_v54  ;;  %v4309_v49 = vsel %vm100_vm6, %v4308_v22, %v4307_v35 }
 0xeca   :  { %7755 = vmatpush3.bf16.msra.mxu0 %v7911_v13  ;;  %7756 = vmatprep.mubr.msk.bf16.mxu0 %vm7929_vm1, %v7928_v0  ;;  %v4311_v55 = vsel %vm103_vm7, %v4310_v9, %v4309_v49 }
 0xecb   :  { %7768 = vmatprep.subr.bf16.mxu0 %v7928_v0  ;;  %v4312_v23 = vpack.c.b16 %v4311_v55, %v4311_v55 }
 0xed1   :  { %7757 = vmatmul.mubr.msk.bf16.vlgmr.msra.gmra.mxu0 %vm112_vm8, %v4093_v29 }
 0xed2   :  { %7772 = vmatprep.mubr.msk.bf16.mxu0 %vm7929_vm1, %v7928_v0  ;;  %7769 = vmatpush3.bf16.msra.mxu0 %v7917_v6 }
 0xed3   :  { %7770 = vmatprep.subr.bf16.mxu0 %v7928_v0 }
 0xed6   :  { %7771 = vmatpush3.bf16.msra.mxu0 %v7918_v62 }
 0xed7   :  { %7782 = vmatprep.subr.bf16.mxu0 %v7928_v0 }
 0xf81   :  { %v3841_v45 = vpop.f32.mrf.mxu0 }
 0xf82   :  { %v3842_v58 = vadd.f32 %v7090_v5, %v3841_v45 }
 0xf83   :  { %v7730_v52 = vpop.f32.mrf.mxu0 }
 0xf84   :  { %v3847_v42 = vmul.f32 0.1, %v3842_v58  ;;  %v4518_v52 = vrot.slane %v9396_v37, 3  ;;  %v7129_v37 = vld [vmem:[%s10059_s4 + $0x12] ss:$0 sm:$0xff] }
 0xf85   :  { %v3844_v63 = vpop.f32.mrf.mxu0 }
 0xf86   :  { %v3848_v13 = vmax.f32 %v3842_v58, %v3847_v42  ;;  %v4519_v60 = vsel %vm85_vm0, %v4518_v52, %v4517_v7  ;;  %vm10074_vm0 = vcmask 1040384  }
 0xf87   :  { %v7731_v16 = vpop.f32.mrf.mxu0  ;;  %vm10077_vm10 = vmmov %vm10074_vm0 }
 0xf88   :  { %v5542_v61 = vcombine.high %v3848_v13, %v3848_v13  ;;  %v5549_v54 = vrot.slane %v3848_v13, %v8186_v50  ;;  %vm10078_vm11 = vmmov %vm10074_vm0 }
 0xf89   :  { %v3989_v18 = vpop.f32.mrf.mxu0  ;;  %vm10079_vm13 = vmmov %vm10074_vm0 }
 0xf8a   :  { %v3990_v31 = vadd.f32 %v7105_v2, %v3989_v18  ;;  %v5556_v20 = vrot.slane %v5542_v61, %v8186_v50  ;;  %v5557_v63 = vcombine.high %v5549_v54, %v5549_v54  ;;  %v4520_v2 = vrot.slane %v9404_v40, 2  ;;  %v7145_v61 = vld [vmem:[%s10057_s2 + $0x13] ss:$0 sm:$0xff]  ;;  %vm10080_vm15 = vmmov %vm10074_vm0 }
 0xf8b   :  { %v7744_v51 = vpop.f32.mrf.mxu0  ;;  %vm10081_vm14 = vmmov %vm10074_vm0 }
 0xf8c   :  { %v3995_v30 = vmul.f32 0.1, %v3990_v31  ;;  %v5558_v26 = vcombine.high %v5556_v20, %v5556_v20  ;;  %v5572_v34 = vrot.slane %v5556_v20, %v8186_v50  ;;  %v5579_v51 = vrot.slane %v5557_v63, %v8186_v50 }
 0xf8d   :  { %v3992_v36 = vpop.f32.mrf.mxu0 }
 0xf8e   :  { %v3996_v32 = vmax.f32 %v3990_v31, %v3995_v30  ;;  %v5565_v31 = vrot.slane %v5549_v54, %v8186_v50  ;;  %v5586_v19 = vrot.slane %v5558_v26, %v8186_v50  ;;  %v7919_v54 = vld [vmem:[%s10056_s3 + $0x138] sm:$0xff]  }
 0xf8f   :  { %v7745_v8 = vpop.f32.mrf.mxu0 }
 0xf90   :  { %v3997_v28 = vpack.c.bf16 %v3996_v32, %v3996_v32  ;;  %v4521_v32 = vsel %vm88_vm2, %v4520_v2, %v4519_v60  ;;  %v4522_v8 = vrot.slane %v9415_v10, 1  ;;  %v5590_v25 = vcombine.high %v5586_v19, %v5586_v19  ;;  %vm10075_vm2 = vmmov %vm10074_vm0  ;;  %v7920_v60 = vld [vmem:[%s10056_s3 + $0x130] sm:$0xff]  }
 0xf91   :  { %v4137_v57 = vpop.f32.mrf.mxu0 }
 0xf92   :  { %v4138_v46 = vadd.f32 %v7121_v33, %v4137_v57  ;;  %7751 = vmatmul.mubr.msk.bf16.vlgmr.msra.gmra.mxu1 %vm182_vm9, %v3997_v28  ;;  %v5587_v28 = vcombine.high %v5565_v31, %v5565_v31  ;;  %v5588_v57 = vcombine.high %v5572_v34, %v5572_v34  ;;  %v4523_v35 = vsel %vm91_vm3, %v4522_v8, %v4521_v32  ;;  %vm10076_vm3 = vmmov %vm10074_vm0  ;;  %v7923_v8 = vld [vmem:[%s10058_s5 + $0x130] sm:$0xff]  }
 0xf93   :  { %v7758_v15 = vpop.f32.mrf.mxu0  ;;  %7761 = vmatpush3.bf16.msra.mxu1 %v7914_v1  ;;  %7764 = vmatprep.mubr.msk.bf16.mxu1 %vm7929_vm1, %v7928_v0  ;;  %v4524_v2 = vsel %vm94_vm4, %v9423_v4, %v4523_v35  ;;  %vm10082_vm4 = vcmask 1041408  }
 0xf94   :  { %v4143_v24 = vmul.f32 0.1, %v4138_v46  ;;  %7762 = vmatprep.subr.bf16.mxu1 %v7928_v0  ;;  %vm10087_vm12 = vmmov %vm10082_vm4 }
 0xf95   :  { %v4140_v11 = vpop.f32.mrf.mxu0 }
 0xf96   :  { %v4144_v3 = vmax.f32 %v4138_v46, %v4143_v24  ;;  %v5589_v46 = vcombine.high %v5579_v51, %v5579_v51 }
 0xf97   :  { %v7759_v44 = vpop.f32.mrf.mxu0  ;;  %7763 = vmatpush3.bf16.msra.mxu1 %v7915_v53 }
 0xf98   :  { %v4145_v47 = vpack.c.bf16 %v4144_v3, %v4144_v3  ;;  %7776 = vmatprep.subr.bf16.mxu1 %v7928_v0  ;;  %v4525_v44 = vrot.slane %v9429_v41, 7 }
 0xf9a   :  { %7765 = vmatmul.mubr.msk.bf16.vlgmr.msra.gmra.mxu1 %vm182_vm9, %v4145_v47 }
 0xf9b   :  { %7777 = vmatpush3.bf16.msra.mxu1 %v7916_v14  ;;  %7778 = vmatprep.mubr.msk.bf16.mxu1 %vm7929_vm1, %v7928_v0 }
 0xf9c   :  { %7790 = vmatprep.subr.bf16.mxu1 %v7928_v0 }
 0xfa2   :  { %7779 = vmatmul.mubr.msk.bf16.vlgmr.msra.gmra.mxu1 %vm112_vm8, %v4312_v23 }
 0xfa3   :  { %7794 = vmatprep.mubr.msk.bf16.mxu1 %vm7929_vm1, %v7928_v0 }
0x1052   :  { %v4060_v29 = vpop.f32.mrf.mxu1 }
0x1053   :  { %v4061_v43 = vadd.f32 %v7114_v39, %v4060_v29 }
0x1054   :  { %v7752_v45 = vpop.f32.mrf.mxu1 }
0x1055   :  { %v4066_v27 = vmul.f32 0.1, %v4061_v43 }
0x1056   :  { %v4063_v16 = vpop.f32.mrf.mxu1 }
0x1057   :  { %v4067_v18 = vmax.f32 %v4061_v43, %v4066_v27 }
0x1058   :  { %v7753_v30 = vpop.f32.mrf.mxu1 }
0x1059   :  { %v5600_v36 = vcombine.high %v4067_v18, %v4067_v18  ;;  %v5607_v56 = vrot.slane %v4067_v18, %v8186_v50 }
0x105a   :  { %v4208_v40 = vpop.f32.mrf.mxu1 }
0x105b   :  { %v5614_v33 = vrot.slane %v5600_v36, %v8186_v50  ;;  %v5615_v59 = vcombine.high %v5607_v56, %v5607_v56  ;;  %v5623_v1 = vrot.slane %v5607_v56, %v8186_v50  ;;  %v4209_v48 = vadd.f32 %v7129_v37, %v4208_v40  ;;  %v7921_v37 = vld [vmem:[%s10054_s1 + $0xa0] sm:$0xff]  }
0x105c   :  { %v7766_v15 = vpop.f32.mrf.mxu1  ;;  %v4529_v36 = vrot.slane %v9496_v21, 5  ;;  %v7922_v21 = vld [vmem:[%s10058_s5 + $0x138] sm:$0xff]  }
0x105d   :  { %v5616_v17 = vcombine.high %v5614_v33, %v5614_v33  ;;  %v5630_v24 = vrot.slane %v5614_v33, %v8186_v50  ;;  %v5637_v53 = vrot.slane %v5615_v59, %v8186_v50  ;;  %v5645_v11 = vcombine.high %v5623_v1, %v5623_v1  ;;  %7791 = vmatpush3.bf16.msra.mxu1 %v7922_v21  ;;  %v7138_v33 = vld [vmem:[%s10060_s6 + $0x12] ss:$0 sm:$0xff]  ;;  %v7153_v15 = vld [vmem:[%s10059_s4 + $0x13] ss:$0 sm:$0xff] }
0x105e   :  { %v6481_v22 = vrot.slane %v5623_v1, %v8205_v12  ;;  %v4214_v10 = vmul.f32 0.1, %v4209_v48  ;;  %v4211_v3 = vpop.f32.mrf.mxu1  ;;  %7792 = vmatprep.subr.bf16.mxu1 %v7928_v0  ;;  %v7162_v21 = vld [vmem:[%s10060_s6 + $0x13] ss:$0 sm:$0xff] }
0x105f   :  { %v5644_v47 = vrot.slane %v5616_v17, %v8186_v50  ;;  %v5646_v14 = vcombine.high %v5630_v24, %v5630_v24  ;;  %v5647_v9 = vcombine.high %v5637_v53, %v5637_v53  ;;  %v6485_v49 = vrot.slane %v5637_v53, %v8205_v12 }
0x1060   :  { %v6489_v55 = vrot.slane %v5645_v11, %v8205_v12  ;;  %v6497_v23 = vrot.slane %v5630_v24, %v8205_v12  ;;  %v9821_v6 = vsel %vm10074_vm0, %v5565_v31, %v6481_v22  ;;  %v4215_v62 = vmax.f32 %v4209_v48, %v4214_v10  ;;  %v7767_v5 = vpop.f32.mrf.mxu1  ;;  %vm10088_vm0 = vmmov %vm10082_vm4 }
0x1061   :  { %v5648_v58 = vcombine.high %v5644_v47, %v5644_v47  ;;  %v6493_v42 = vrot.slane %v5647_v9, %v8205_v12  ;;  %v6501_v41 = vrot.slane %v5644_v47, %v8205_v12  ;;  %v6505_v13 = vrot.slane %v5646_v14, %v8205_v12  ;;  %7793 = vmatpush3.bf16.msra.mxu1 %v7923_v8 }
0x1062   :  { %v9833_v20 = vsel %vm10075_vm2, %v5579_v51, %v6485_v49  ;;  %v9836_v39 = vsel %vm10076_vm3, %v5587_v28, %v6489_v55  ;;  %v9839_v29 = vsel %vm10077_vm10, %v5572_v34, %v6497_v23  ;;  %v4216_v43 = vpack.c.bf16 %v4215_v62, %v4215_v62  ;;  %v4356_v7 = vpop.f32.mrf.mxu1  ;;  %7804 = vmatprep.subr.bf16.mxu1 %v7928_v0  ;;  %vm10089_vm2 = vmmov %vm10088_vm0 }
0x1063   :  { %v6509_v52 = vrot.slane %v5648_v58, %v8205_v12  ;;  %v9843_v63 = vsel %vm10078_vm11, %v5589_v46, %v6493_v42  ;;  %v9846_v26 = vsel %vm10079_vm13, %v5586_v19, %v6501_v41  ;;  %v9849_v45 = vsel %vm10080_vm15, %v5588_v57, %v6505_v13 }
0x1064   :  { %v4357_v27 = vadd.f32 %v7145_v61, %v4356_v7  ;;  %7773 = vmatmul.mubr.msk.bf16.vlgmr.msra.gmra.mxu0 %vm182_vm9, %v4216_v43  ;;  %v7780_v16 = vpop.f32.mrf.mxu1  ;;  %v4527_v51 = vrot.slane %v9435_v38, 6  ;;  %v4526_v19 = vsel %vm97_vm5, %v4525_v44, %v4524_v2  ;;  %v7169_v2 = vld [vmem:[%s10057_s2 + $0x14] ss:$0 sm:$0xff]  ;;  %vm10083_vm5 = vmmov %vm10082_vm4 }
0x1065   :  { %v9855_v18 = vsel %vm10081_vm14, %v5590_v25, %v6509_v52  ;;  %7783 = vmatpush3.bf16.msra.mxu0 %v7919_v54  ;;  %7786 = vmatprep.mubr.msk.bf16.mxu0 %vm7929_vm1, %v7928_v0 }
0x1066   :  { %v4362_v31 = vmul.f32 0.1, %v4357_v27  ;;  %v4359_v34 = vpop.f32.mrf.mxu1  ;;  %7784 = vmatprep.subr.bf16.mxu0 %v7928_v0  ;;  %v4528_v40 = vsel %vm100_vm6, %v4527_v51, %v4526_v19  ;;  %vm10084_vm6 = vmmov %vm10082_vm4 }
0x1067   :  { %v4530_v38 = vsel %vm103_vm7, %v4529_v36, %v4528_v40  ;;  %vm10085_vm7 = vmmov %vm10082_vm4 }
0x1068   :  { %v4363_v4 = vmax.f32 %v4357_v27, %v4362_v31  ;;  %v7781_v30 = vpop.f32.mrf.mxu1  ;;  %v4531_v32 = vpack.c.b16 %v4530_v38, %v4530_v38 }
0x1069   :  { %7785 = vmatpush3.bf16.msra.mxu0 %v7920_v60  ;;  %v7924_v60 = vld [vmem:[%s10056_s3 + $0x148] sm:$0xff]  }
0x106a   :  { %v4364_v56 = vpack.c.bf16 %v4363_v4, %v4363_v4  ;;  %7798 = vmatprep.subr.bf16.mxu0 %v7928_v0 }
0x106c   :  { %7787 = vmatmul.mubr.msk.bf16.vlgmr.msra.gmra.mxu0 %vm182_vm9, %v4364_v56 }
0x106d   :  { %7799 = vmatpush3.bf16.msra.mxu0 %v7921_v37  ;;  %7800 = vmatprep.mubr.msk.bf16.mxu0 %vm7929_vm1, %v7928_v0 }
0x106e   :  { %7812 = vmatprep.subr.bf16.mxu0 %v7928_v0 }
0x1074   :  { %7801 = vmatmul.mubr.msk.bf16.vlgmr.msra.gmra.mxu0 %vm112_vm8, %v4531_v32  ;;  %vm10086_vm8 = vmmov %vm10082_vm4  ;;  %v7927_v32 = vld [vmem:[%s10058_s5 + $0x140] sm:$0xff]  }
0x1075   :  { %7816 = vmatprep.mubr.msk.bf16.mxu0 %vm7929_vm1, %v7928_v0 }
0x1124   :  { %v4279_v59 = vpop.f32.mrf.mxu0 }
0x1125   :  { %v4280_v1 = vadd.f32 %v7138_v33, %v4279_v59 }
0x1126   :  { %v7774_v48 = vpop.f32.mrf.mxu0 }
0x1127   :  { %v4285_v28 = vmul.f32 0.1, %v4280_v1 }
0x1128   :  { %v4282_v57 = vpop.f32.mrf.mxu0 }
0x1129   :  { %v4286_v46 = vmax.f32 %v4280_v1, %v4285_v28 }
0x112a   :  { %v7775_v25 = vpop.f32.mrf.mxu0 }
0x112b   :  { %v5650_v17 = vcombine.high %v4286_v46, %v4286_v46  ;;  %v5657_v24 = vrot.slane %v4286_v46, %v8186_v50 }
0x112c   :  { %v4427_v53 = vpop.f32.mrf.mxu0 }
0x112d   :  { %v5664_v11 = vrot.slane %v5650_v17, %v8186_v50  ;;  %v5665_v22 = vcombine.high %v5657_v24, %v5657_v24  ;;  %v5673_v10 = vrot.slane %v5657_v24, %v8186_v50  ;;  %v4428_v3 = vadd.f32 %v7153_v15, %v4427_v53 }
0x112e   :  { %v7788_v35 = vpop.f32.mrf.mxu0 }
0x112f   :  { %v5666_v44 = vcombine.high %v5664_v11, %v5664_v11  ;;  %v5680_v47 = vrot.slane %v5664_v11, %v8186_v50  ;;  %v5687_v14 = vrot.slane %v5665_v22, %v8186_v50  ;;  %v5695_v9 = vcombine.high %v5673_v10, %v5673_v10 }
0x1130   :  { %v6521_v49 = vrot.slane %v5673_v10, %v8205_v12  ;;  %v4433_v55 = vmul.f32 0.1, %v4428_v3  ;;  %v4430_v23 = vpop.f32.mrf.mxu0 }
0x1131   :  { %v5694_v62 = vrot.slane %v5666_v44, %v8186_v50  ;;  %v5696_v5 = vcombine.high %v5680_v47, %v5680_v47  ;;  %v5697_v58 = vcombine.high %v5687_v14, %v5687_v14  ;;  %v6525_v42 = vrot.slane %v5687_v14, %v8205_v12 }
0x1132   :  { %v6529_v41 = vrot.slane %v5695_v9, %v8205_v12  ;;  %v6537_v13 = vrot.slane %v5680_v47, %v8205_v12  ;;  %v9905_v61 = vsel %vm10082_vm4, %v9821_v6, %v6521_v49  ;;  %v4434_v54 = vmax.f32 %v4428_v3, %v4433_v55  ;;  %v7789_v43 = vpop.f32.mrf.mxu0 }
0x1133   :  { %v5698_v7 = vcombine.high %v5694_v62, %v5694_v62  ;;  %v6533_v52 = vrot.slane %v5697_v58, %v8205_v12  ;;  %v6541_v27 = vrot.slane %v5694_v62, %v8205_v12  ;;  %v6545_v16 = vrot.slane %v5696_v5, %v8205_v12 }
0x1134   :  { %v9918_v6 = vsel %vm10083_vm5, %v9833_v20, %v6525_v42  ;;  %v9922_v31 = vsel %vm10084_vm6, %v9836_v39, %v6529_v41  ;;  %v9926_v34 = vsel %vm10085_vm7, %v9839_v29, %v6537_v13  ;;  %v4435_v51 = vpack.c.bf16 %v4434_v54, %v4434_v54  ;;  %v4575_v19 = vpop.f32.mrf.mxu0 }
0x1135   :  { %v6549_v4 = vrot.slane %v5698_v7, %v8205_v12  ;;  %v9931_v30 = vsel %vm10086_vm8, %v9843_v63, %v6533_v52  ;;  %v9935_v20 = vsel %vm10087_vm12, %v9846_v26, %v6541_v27  ;;  %v9939_v39 = vsel %vm10088_vm0, %v9849_v45, %v6545_v16  ;;  %v7925_v63 = vld [vmem:[%s10056_s3 + $0x140] sm:$0xff]  }
0x1136   :  { %v4576_v37 = vadd.f32 %v7169_v2, %v4575_v19  ;;  %7795 = vmatmul.mubr.msk.bf16.vlgmr.msra.gmra.mxu1 %vm182_vm9, %v4435_v51  ;;  %v7802_v29 = vpop.f32.mrf.mxu0  ;;  %vm10098_vm5 = vcmask 1043456  }
0x1137   :  { %v9944_v36 = vsel %vm10089_vm2, %v9855_v18, %v6549_v4  ;;  %7805 = vmatpush3.bf16.msra.mxu1 %v7924_v60  ;;  %7808 = vmatprep.mubr.msk.bf16.mxu1 %vm7929_vm1, %v7928_v0  ;;  %v7926_v18 = vld [vmem:[%s10058_s5 + $0x148] sm:$0xff]   ;;  %vm10090_vm1 = vcmask 1042432   ;;  %vm10099_vm6 = vmmov %vm10098_vm5 }
0x1138   :  { %v4581_v26 = vmul.f32 0.1, %v4576_v37  ;;  %v4578_v56 = vpop.f32.mrf.mxu0  ;;  %7806 = vmatprep.subr.bf16.mxu1 %v7928_v0  ;;  %7813 = vmatpush3.bf16.msra.mxu0 %v7926_v18  ;;  %vm10091_vm3 = vmmov %vm10090_vm1 }
0x1139   :  { %7814 = vmatprep.subr.bf16.mxu0 %v7928_v0  ;;  %v7177_v0 = vld [vmem:[%s10059_s4 + $0x14] ss:$0 sm:$0xff]  ;;  %vm10092_vm10 = vmmov %vm10090_vm1 }
0x113a   :  { %v4582_v45 = vmax.f32 %v4576_v37, %v4581_v26  ;;  %v7803_v40 = vpop.f32.mrf.mxu0  ;;  %vm10093_vm11 = vmmov %vm10090_vm1 }
0x113b   :  { %7807 = vmatpush3.bf16.msra.mxu1 %v7925_v63  ;;  %vm10094_vm13 = vmmov %vm10090_vm1 }
0x113c   :  { %v4583_v38 = vpack.c.bf16 %v4582_v45, %v4582_v45  ;;  %7815 = vmatpush3.bf16.msra.mxu0 %v7927_v32  ;;  %vm10095_vm15 = vmmov %vm10090_vm1 }
0x113d   :  { %vm10096_vm14 = vmmov %vm10090_vm1 }
0x113e   :  { %7809 = vmatmul.mubr.msk.bf16.vlgmr.msra.gmra.mxu1 %vm182_vm9, %v4583_v38  ;;  %vm10097_vm4 = vmmov %vm10090_vm1 }
0x113f   :  { %vm10100_vm7 = vmmov %vm10098_vm5 }
0x1140   :  { %vm10101_vm8 = vmmov %vm10098_vm5 }
0x1141   :  { %vm10102_vm12 = vmmov %vm10098_vm5 }
0x1142   :  { %vm10103_vm0 = vmmov %vm10098_vm5 }
0x1143   :  { %vm10104_vm2 = vmmov %vm10103_vm0 }
0x11f6   :  { %v4498_v8 = vpop.f32.mrf.mxu1 }
0x11f7   :  { %v4499_v33 = vadd.f32 %v7162_v21, %v4498_v8 }
0x11f8   :  { %v7796_v59 = vpop.f32.mrf.mxu1 }
0x11f9   :  { %v4504_v1 = vmul.f32 0.1, %v4499_v33 }
0x11fa   :  { %v4501_v48 = vpop.f32.mrf.mxu1 }
0x11fb   :  { %v4505_v28 = vmax.f32 %v4499_v33, %v4504_v1 }
0x11fc   :  { %v7797_v57 = vpop.f32.mrf.mxu1 }
0x11fd   :  { %v5700_v46 = vcombine.high %v4505_v28, %v4505_v28  ;;  %v5707_v25 = vrot.slane %v4505_v28, %v8186_v50 }
0x11fe   :  { %v4646_v15 = vpop.f32.mrf.mxu1 }
0x11ff   :  { %v5714_v17 = vrot.slane %v5700_v46, %v8186_v50  ;;  %v5715_v24 = vcombine.high %v5707_v25, %v5707_v25  ;;  %v5723_v53 = vrot.slane %v5707_v25, %v8186_v50  ;;  %v4647_v11 = vadd.f32 %v7177_v0, %v4646_v15 }
0x1200   :  { %v7810_v22 = vpop.f32.mrf.mxu1 }
0x1201   :  { %v5716_v10 = vcombine.high %v5714_v17, %v5714_v17  ;;  %v5730_v3 = vrot.slane %v5714_v17, %v8186_v50  ;;  %v5737_v35 = vrot.slane %v5715_v24, %v8186_v50  ;;  %v5745_v44 = vcombine.high %v5723_v53, %v5723_v53 }
0x1202   :  { %v6561_v47 = vrot.slane %v5723_v53, %v8205_v12  ;;  %v4652_v14 = vmul.f32 0.1, %v4647_v11  ;;  %v4649_v9 = vpop.f32.mrf.mxu1 }
0x1203   :  { %v5744_v49 = vrot.slane %v5716_v10, %v8186_v50  ;;  %v5746_v55 = vcombine.high %v5730_v3, %v5730_v3  ;;  %v5747_v23 = vcombine.high %v5737_v35, %v5737_v35  ;;  %v6565_v62 = vrot.slane %v5737_v35, %v8205_v12 }
0x1204   :  { %v6569_v5 = vrot.slane %v5745_v44, %v8205_v12  ;;  %v6577_v58 = vrot.slane %v5730_v3, %v8205_v12  ;;  %v6654_v42 = vsel %vm10090_vm1, %v9905_v61, %v6561_v47  ;;  %v4653_v41 = vmax.f32 %v4647_v11, %v4652_v14  ;;  %v7811_v13 = vpop.f32.mrf.mxu1  ;;  %vm10105_vm1 = vmmov %vm10103_vm0 }
0x1205   :  { %v5748_v54 = vcombine.high %v5744_v49, %v5744_v49  ;;  %v6573_v43 = vrot.slane %v5747_v23, %v8205_v12  ;;  %v6581_v7 = vrot.slane %v5744_v49, %v8205_v12  ;;  %v6585_v52 = vrot.slane %v5746_v55, %v8205_v12 }
0x1206   :  { %v6655_v27 = vsel %vm10091_vm3, %v9918_v6, %v6565_v62  ;;  %v6656_v16 = vsel %vm10092_vm10, %v9922_v31, %v6569_v5  ;;  %v6658_v2 = vsel %vm10093_vm11, %v9926_v34, %v6577_v58  ;;  %v4654_v60 = vpack.c.bf16 %v4653_v41, %v4653_v41  ;;  %v7186_v31 = vld [vmem:[%s10060_s6 + $0x14] ss:$0 sm:$0xff] }
0x1207   :  { %v6589_v61 = vrot.slane %v5748_v54, %v8205_v12  ;;  %v6657_v51 = vsel %vm10094_vm13, %v9931_v30, %v6573_v43  ;;  %v6659_v19 = vsel %vm10095_vm15, %v9935_v20, %v6581_v7  ;;  %v6660_v4 = vsel %vm10096_vm14, %v9939_v39, %v6585_v52 }
0x1208   :  { %7817 = vmatmul.mubr.msk.bf16.vlgmr.msra.gmra.mxu0 %vm182_vm9, %v4654_v60  ;;  %vm6672_vm9 = vcmask 126976  }
0x1209   :  { %v6661_v6 = vsel %vm10097_vm4, %v9944_v36, %v6589_v61 }
0x12c8   :  { %v4717_v34 = vpop.f32.mrf.mxu0 }
0x12c9   :  { %v4718_v37 = vadd.f32 %v7186_v31, %v4717_v34 }
0x12ca   :  { %v7818_v29 = vpop.f32.mrf.mxu0 }
0x12cb   :  { %v4723_v63 = vmul.f32 0.1, %v4718_v37 }
0x12cc   :  { %v4720_v30 = vpop.f32.mrf.mxu0 }
0x12cd   :  { %v4724_v26 = vmax.f32 %v4718_v37, %v4723_v63 }
0x12ce   :  { %v7819_v56 = vpop.f32.mrf.mxu0 }
0x12cf   :  { %v5750_v20 = vcombine.high %v4724_v26, %v4724_v26  ;;  %v5757_v45 = vrot.slane %v4724_v26, %v8186_v50 }
0x12d1   :  { %v5764_v39 = vrot.slane %v5750_v20, %v8186_v50  ;;  %v5765_v40 = vcombine.high %v5757_v45, %v5757_v45  ;;  %v5773_v38 = vrot.slane %v5757_v45, %v8186_v50 }
0x12d3   :  { %v5766_v36 = vcombine.high %v5764_v39, %v5764_v39  ;;  %v5780_v18 = vrot.slane %v5764_v39, %v8186_v50  ;;  %v5787_v32 = vrot.slane %v5765_v40, %v8186_v50  ;;  %v5795_v21 = vcombine.high %v5773_v38, %v5773_v38 }
0x12d4   :  { %v6601_v8 = vrot.slane %v5773_v38, %v8205_v12 }
0x12d5   :  { %v5794_v33 = vrot.slane %v5766_v36, %v8186_v50  ;;  %v5796_v59 = vcombine.high %v5780_v18, %v5780_v18  ;;  %v5797_v1 = vcombine.high %v5787_v32, %v5787_v32  ;;  %v6605_v48 = vrot.slane %v5787_v32, %v8205_v12 }
0x12d6   :  { %v6609_v28 = vrot.slane %v5795_v21, %v8205_v12  ;;  %v6617_v57 = vrot.slane %v5780_v18, %v8205_v12  ;;  %v6662_v0 = vsel %vm10098_vm5, %v6654_v42, %v6601_v8 }
0x12d7   :  { %v5798_v46 = vcombine.high %v5794_v33, %v5794_v33  ;;  %v6613_v25 = vrot.slane %v5797_v1, %v8205_v12  ;;  %v6621_v15 = vrot.slane %v5794_v33, %v8205_v12  ;;  %v6625_v17 = vrot.slane %v5796_v59, %v8205_v12  ;;  %6673 = vst.msk [vmem:[%s10061_s7 + $0x10] sm:$0x1f] %vm6672_vm9, %v6662_v0 }
0x12d8   :  { %v6663_v50 = vsel %vm10099_vm6, %v6655_v27, %v6605_v48  ;;  %v6664_v24 = vsel %vm10100_vm7, %v6656_v16, %v6609_v28  ;;  %v6666_v53 = vsel %vm10101_vm8, %v6658_v2, %v6617_v57 }
0x12d9   :  { %v6629_v11 = vrot.slane %v5798_v46, %v8205_v12  ;;  %v6665_v22 = vsel %vm10102_vm12, %v6657_v51, %v6613_v25  ;;  %v6667_v10 = vsel %vm10103_vm0, %v6659_v19, %v6621_v15  ;;  %v6668_v3 = vsel %vm10104_vm2, %v6660_v4, %v6625_v17  ;;  %6676 = vst.msk [vmem:[%s10061_s7 + $0x28] sm:$0x1f] %vm6672_vm9, %v6663_v50 }
0x12da   :  { %6679 = vst.msk [vmem:[%s10061_s7 + $0x40] sm:$0x1f] %vm6672_vm9, %v6664_v24  ;;  %6685 = vst.msk [vmem:[%s10061_s7 + $0x70] sm:$0x1f] %vm6672_vm9, %v6666_v53 }
0x12db   :  { %6682 = vst.msk [vmem:[%s10061_s7 + $0x58] sm:$0x1f] %vm6672_vm9, %v6665_v22  ;;  %6688 = vst.msk [vmem:[%s10061_s7 + $0x88] sm:$0x1f] %vm6672_vm9, %v6667_v10  ;;  %v6669_v12 = vsel %vm10105_vm1, %v6661_v6, %v6629_v11 }
0x12dc   :  { %6691 = vst.msk [vmem:[%s10061_s7 + $0xa0] sm:$0x1f] %vm6672_vm9, %v6668_v3  ;;  %6694 = vst.msk [vmem:[%s10061_s7 + $0xb8] sm:$0x1f] %vm6672_vm9, %v6669_v12 }

</bundles_post_ra>
